<compile_context>
chip_gen: v7x
topology: tpu7x:2x2x1
jax: 0.10.0
libtpu: 0.0.40
codegen_flags: <defaults>
</compile_context>

<pallas_src>
import functools

import jax
import jax.numpy as jnp
from jax.experimental import pallas as pl
from jax.experimental.pallas import tpu as pltpu

_LANE = 128


def _round_up(n, m):
    return ((n + m - 1) // m) * m


# ----------------------------- Pallas kernel ------------------------------- #

def _resblock_kernel(*refs, ksize, stride, pad, Ho, Wo, has_proj):
    """Fused residual block for one batch image.

    refs = (x_ref, w1_ref, s1_ref, b1_ref, w2_ref, s2_ref, b2_ref,
            [wsc_ref, ssc_ref, bsc_ref,]  o_ref, h_ref)

    x_ref : (H+2p, W+2p, Cin_p)   spatially+channel padded input (VMEM block)
    wK    : (ksize*ksize, Cin', Cout_p) per-tap weight matrices (resident)
    sK/bK : (1, Cout_p)           folded BN scale / shift
    o_ref : (Ho, Wo, Cout_p)      final output block
    h_ref : (Ho+2p, Wo+2p, Cout_p) VMEM scratch for conv1 output (zero border
                                   == conv2 zero padding).
    """
    if has_proj:
        (x_ref, w1_ref, s1_ref, b1_ref, w2_ref, s2_ref, b2_ref,
         wsc_ref, ssc_ref, bsc_ref, o_ref, h_ref) = refs
    else:
        (x_ref, w1_ref, s1_ref, b1_ref, w2_ref, s2_ref, b2_ref,
         o_ref, h_ref) = refs
        wsc_ref = ssc_ref = bsc_ref = None

    cout_p = o_ref.shape[-1]
    M = Ho * Wo

    def conv_taps(src_ref, w_ref, st):
        """Implicit GEMM: sum over ksize*ksize shifted windows, f32 accumulation."""
        cin_p = src_ref.shape[-1]
        acc = jnp.zeros((M, cout_p), jnp.float32)
        for ki in range(ksize):
            for kj in range(ksize):
                if st == 1:
                    win = src_ref[pl.ds(ki, Ho), pl.ds(kj, Wo), :]
                else:
                    # TODO(synk): strided (stride>1) tap loads are functional in spec
                    #             but not exercised by this test.
                    win = src_ref[pl.ds(ki, Ho, stride=st),
                                  pl.ds(kj, Wo, stride=st), :]
                win = win.reshape(M, cin_p)
                acc = acc + jnp.dot(win, w_ref[ki * ksize + kj],
                                    preferred_element_type=jnp.float32)
        return acc

    # ---- conv1 + bn1 + relu -> h scratch (interior); border stays zero ----
    h_ref[...] = jnp.zeros_like(h_ref)
    h1 = conv_taps(x_ref, w1_ref, stride)
    h1 = jnp.maximum(h1 * s1_ref[...] + b1_ref[...], 0.0)
    h_ref[pl.ds(pad, Ho), pl.ds(pad, Wo), :] = (
        h1.reshape(Ho, Wo, cout_p).astype(h_ref.dtype))

    # ---- conv2 + bn2 (stride 1, zero-padded h already in scratch) ----
    out = conv_taps(h_ref, w2_ref, 1)
    out = out * s2_ref[...] + b2_ref[...]

    # ---- shortcut ----
    if has_proj:
        # 1x1 conv (stride) + BN: single matmul on the MXU.
        if stride == 1:
            xc = x_ref[pl.ds(pad, Ho), pl.ds(pad, Wo), :]
        else:
            xc = x_ref[pl.ds(pad, Ho, stride=stride),
                       pl.ds(pad, Wo, stride=stride), :]
        xc = xc.reshape(M, x_ref.shape[-1])
        sc = jnp.dot(xc, wsc_ref[...], preferred_element_type=jnp.float32)
        sc = sc * ssc_ref[...] + bsc_ref[...]
    else:
        # Identity shortcut: plain VPU add of the input tile (no eye-matrix matmul).
        sc = x_ref[pl.ds(pad, Ho), pl.ds(pad, Wo), :].reshape(M, cout_p)
        sc = sc.astype(jnp.float32)

    o_ref[...] = jnp.maximum(out + sc, 0.0).reshape(Ho, Wo, cout_p).astype(o_ref.dtype)


# ----------------------------- parameter prep ------------------------------ #

def init_params(key, cin, cout, stride, ksize):
    ks = jax.random.split(key, 18)
    p = {
        "w1": 0.1 * jax.random.normal(ks[0], (cout, cin, ksize, ksize), jnp.float32),
        "b1": 0.05 * jax.random.normal(ks[1], (cout,), jnp.float32),
        "g1": 0.8 + 0.4 * jax.random.uniform(ks[2], (cout,), jnp.float32),
        "beta1": 0.1 * jax.random.normal(ks[3], (cout,), jnp.float32),
        "m1": 0.1 * jax.random.normal(ks[4], (cout,), jnp.float32),
        "v1": 0.5 + jax.random.uniform(ks[5], (cout,), jnp.float32),
        "w2": 0.1 * jax.random.normal(ks[6], (cout, cout, ksize, ksize), jnp.float32),
        "b2": 0.05 * jax.random.normal(ks[7], (cout,), jnp.float32),
        "g2": 0.8 + 0.4 * jax.random.uniform(ks[8], (cout,), jnp.float32),
        "beta2": 0.1 * jax.random.normal(ks[9], (cout,), jnp.float32),
        "m2": 0.1 * jax.random.normal(ks[10], (cout,), jnp.float32),
        "v2": 0.5 + jax.random.uniform(ks[11], (cout,), jnp.float32),
    }
    if stride != 1 or cin != cout:
        p.update({
            "wsc": 0.1 * jax.random.normal(ks[12], (cout, cin, 1, 1), jnp.float32),
            "bsc": 0.05 * jax.random.normal(ks[13], (cout,), jnp.float32),
            "gsc": 0.8 + 0.4 * jax.random.uniform(ks[14], (cout,), jnp.float32),
            "betasc": 0.1 * jax.random.normal(ks[15], (cout,), jnp.float32),
            "msc": 0.1 * jax.random.normal(ks[16], (cout,), jnp.float32),
            "vsc": 0.5 + jax.random.uniform(ks[17], (cout,), jnp.float32),
        })
    return p


def prepare_kernel_params(raw, compute_dtype=jnp.float32):
    """Reshape weights to per-tap matrices, fold BN, pad channels to 128."""
    cout, cin, kh, _ = raw["w1"].shape
    cin_p = _round_up(cin, _LANE)
    cout_p = _round_up(cout, _LANE)

    def w_taps(w, cpi, cpo):
        co, ci, a, b = w.shape
        m = jnp.transpose(w, (2, 3, 1, 0)).reshape(a * b, ci, co)   # (taps, Cin, Cout)
        m = jnp.pad(m, ((0, 0), (0, cpi - ci), (0, cpo - co)))
        return m.astype(compute_dtype)

    def fold_bn(bias, g, beta, mean, var, cp, eps=1e-5):
        scale = g / jnp.sqrt(var + eps)
        shift = (bias - mean) * scale + beta
        scale = jnp.pad(scale, (0, cp - scale.shape[0]))
        shift = jnp.pad(shift, (0, cp - shift.shape[0]))
        return (scale.reshape(1, cp).astype(jnp.float32),
                shift.reshape(1, cp).astype(jnp.float32))

    kp = {
        "cin": int(cin), "cout": int(cout),
        "cin_p": int(cin_p), "cout_p": int(cout_p),
        "ksize": int(kh), "compute_dtype": compute_dtype,
        "w1": w_taps(raw["w1"], cin_p, cout_p),
        "w2": w_taps(raw["w2"], cout_p, cout_p),
    }
    kp["s1"], kp["sh1"] = fold_bn(raw["b1"], raw["g1"], raw["beta1"],
                                  raw["m1"], raw["v1"], cout_p)
    kp["s2"], kp["sh2"] = fold_bn(raw["b2"], raw["g2"], raw["beta2"],
                                  raw["m2"], raw["v2"], cout_p)
    if "wsc" in raw:
        kp["wsc"] = w_taps(raw["wsc"], cin_p, cout_p)[0]            # (Cin_p, Cout_p)
        kp["ssc"], kp["shsc"] = fold_bn(raw["bsc"], raw["gsc"], raw["betasc"],
                                        raw["msc"], raw["vsc"], cout_p)
    return kp


# ----------------------------- forward wrapper ----------------------------- #

def residual_block_forward(x_nchw, kp, stride, ksize):
    """Input/output NCHW (PyTorch convention). Single fused pallas_call."""
    compute_dtype = kp["compute_dtype"]
    cin, cout = kp["cin"], kp["cout"]
    cin_p, cout_p = kp["cin_p"], kp["cout_p"]
    pad = ksize // 2
    has_proj = "wsc" in kp

    x = jnp.transpose(x_nchw, (0, 2, 3, 1))                 # NCHW -> NHWC
    B, H, W, _ = x.shape
    Hp, Wp = H + 2 * pad, W + 2 * pad
    Ho = (H + 2 * pad - ksize) // stride + 1
    Wo = (W + 2 * pad - ksize) // stride + 1
    k2 = ksize * ksize

    # Zero-pad spatially (conv1 padding) and channels (lane-dense 128 alignment).
    x_pad = jnp.pad(x, ((0, 0), (pad, pad), (pad, pad), (0, cin_p - cin)))
    x_pad = x_pad.astype(compute_dtype)

    kernel = functools.partial(_resblock_kernel, ksize=ksize, stride=stride,
                               pad=pad, Ho=Ho, Wo=Wo, has_proj=has_proj)

    in_specs = [
        pl.BlockSpec((None, Hp, Wp, cin_p), lambda b: (b, 0, 0, 0)),       # x (streamed)
        pl.BlockSpec((k2, cin_p, cout_p), lambda b: (0, 0, 0)),            # w1 (resident)
        pl.BlockSpec((1, cout_p), lambda b: (0, 0)),                       # bn1 scale
        pl.BlockSpec((1, cout_p), lambda b: (0, 0)),                       # bn1 shift
        pl.BlockSpec((k2, cout_p, cout_p), lambda b: (0, 0, 0)),           # w2 (resident)
        pl.BlockSpec((1, cout_p), lambda b: (0, 0)),                       # bn2 scale
        pl.BlockSpec((1, cout_p), lambda b: (0, 0)),                       # bn2 shift
    ]
    args = [x_pad, kp["w1"], kp["s1"], kp["sh1"], kp["w2"], kp["s2"], kp["sh2"]]
    if has_proj:
        in_specs += [
            pl.BlockSpec((cin_p, cout_p), lambda b: (0, 0)),               # wsc
            pl.BlockSpec((1, cout_p), lambda b: (0, 0)),                   # bn_sc scale
            pl.BlockSpec((1, cout_p), lambda b: (0, 0)),                   # bn_sc shift
        ]
        args += [kp["wsc"], kp["ssc"], kp["shsc"]]

    # Explicit VMEM budget (double-buffered inputs/outputs + resident weights + scratch).
    itm = jnp.dtype(compute_dtype).itemsize
    est = 2 * (Hp * Wp * cin_p * itm
               + k2 * cin_p * cout_p * itm
               + k2 * cout_p * cout_p * itm
               + (cin_p * cout_p * itm if has_proj else 0)
               + 8 * cout_p * 4
               + Ho * Wo * cout_p * 4)
    est += (Ho + 2 * pad) * (Wo + 2 * pad) * cout_p * itm
    vmem_limit = int(max(32 * 1024 * 1024, 2 * est))
    # TODO(synk): for ResNet-scale images on v7x (64 MiB VMEM) add a spatial row-tile
    #             grid axis with halo rows instead of whole-image blocks (also gives
    #             more parallel grid steps for the 2 TensorCores).

    out = pl.pallas_call(
        kernel,
        out_shape=jax.ShapeDtypeStruct((B, Ho, Wo, cout_p), jnp.float32),
        grid=(B,),
        in_specs=in_specs,
        out_specs=pl.BlockSpec((None, Ho, Wo, cout_p), lambda b: (b, 0, 0, 0)),
        scratch_shapes=[pltpu.VMEM((Ho + 2 * pad, Wo + 2 * pad, cout_p), compute_dtype)],
        compiler_params=pltpu.CompilerParams(
            dimension_semantics=("parallel",),
            vmem_limit_bytes=vmem_limit),
    )(*args)

    out = out[..., :cout]                                   # drop channel padding
    return jnp.transpose(out, (0, 3, 1, 2))                 # NHWC -> NCHW


# ----------------------------- pure-JAX reference -------------------------- #

def ref_forward(x, raw, stride, ksize, eps=1e-5):
    pad = ksize // 2

    def conv(z, w, b, s, p):
        y = jax.lax.conv_general_dilated(
            z, w, window_strides=(s, s), padding=[(p, p), (p, p)],
            dimension_numbers=("NCHW", "OIHW", "NCHW"),
            precision=jax.lax.Precision.HIGHEST)
        return y + b[None, :, None, None]

    def bn(y, g, beta, m, v):
        return ((y - m[None, :, None, None])
                * (g / jnp.sqrt(v + eps))[None, :, None, None]
                + beta[None, :, None, None])

    out = jax.nn.relu(bn(conv(x, raw["w1"], raw["b1"], stride, pad),
                         raw["g1"], raw["beta1"], raw["m1"], raw["v1"]))
    out = bn(conv(out, raw["w2"], raw["b2"], 1, pad),
             raw["g2"], raw["beta2"], raw["m2"], raw["v2"])
    if "wsc" in raw:
        sc = bn(conv(x, raw["wsc"], raw["bsc"], stride, 0),
                raw["gsc"], raw["betasc"], raw["msc"], raw["vsc"])
    else:
        sc = x
    return jax.nn.relu(out + sc)


# ----------------------------- main ---------------------------------------- #

def _check(out, ref, tag):
    assert out.shape == ref.shape, (out.shape, ref.shape)
    max_err = float(jnp.max(jnp.abs(out - ref)))
    if not bool(jnp.allclose(out, ref, atol=1e-2, rtol=1e-2)):
        raise AssertionError(f"{tag}: Pallas output mismatch vs reference, "
                             f"max abs err={max_err}")


if __name__ == "__main__":
    key = jax.random.PRNGKey(0)
    kx1, kp1, kx2, kp2 = jax.random.split(key, 4)

    # Test 1: projection shortcut (Cin != Cout), stride 1.
    B, Cin, H, W = 2, 4, 16, 16
    Cout, stride, ksize = 8, 1, 3
    x = jax.random.normal(kx1, (B, Cin, H, W), jnp.float32)
    raw = init_params(kp1, Cin, Cout, stride, ksize)
    kparams = prepare_kernel_params(raw)          # compute_dtype=jnp.bfloat16 on v6e/v7x
    fwd = jax.jit(lambda xx: residual_block_forward(xx, kparams, stride, ksize))
    out = jax.block_until_ready(fwd(x))
    assert out.shape == (B, Cout, H, W)
    _check(out, ref_forward(x, raw, stride, ksize), "projection-shortcut")

    # Test 2: identity shortcut (Cin == Cout, stride 1) -> exercises the VPU-add path.
    raw2 = init_params(kp2, Cout, Cout, 1, ksize)
    kparams2 = prepare_kernel_params(raw2)
    x2 = jax.random.normal(kx2, (B, Cout, H, W), jnp.float32)
    fwd2 = jax.jit(lambda xx: residual_block_forward(xx, kparams2, 1, ksize))
    out2 = jax.block_until_ready(fwd2(x2))
    _check(out2, ref_forward(x2, raw2, 1, ksize), "identity-shortcut")

    print("KERNEL_OK")
</pallas_src>

<mosaic_0001>
module attributes {stable_mosaic.version = 11 : i64} {
  func.func @_resblock_kernel(%arg0: i32, %arg1: memref<1x18x18x128xf32, #tpu.memory_space<vmem>>, %arg2: memref<9x128x128xf32, #tpu.memory_space<vmem>>, %arg3: memref<1x128xf32, #tpu.memory_space<vmem>>, %arg4: memref<1x128xf32, #tpu.memory_space<vmem>>, %arg5: memref<9x128x128xf32, #tpu.memory_space<vmem>>, %arg6: memref<1x128xf32, #tpu.memory_space<vmem>>, %arg7: memref<1x128xf32, #tpu.memory_space<vmem>>, %arg8: memref<128x128xf32, #tpu.memory_space<vmem>>, %arg9: memref<1x128xf32, #tpu.memory_space<vmem>>, %arg10: memref<1x128xf32, #tpu.memory_space<vmem>>, %arg11: memref<1x16x16x128xf32, #tpu.memory_space<vmem>>, %arg12: memref<18x18x128xf32, #tpu.memory_space<vmem>>) attributes {dimension_semantics = [#tpu.dimension_semantics<parallel>], iteration_bounds = array<i64: 2>, scalar_prefetch = 0 : i64, scratch_operands = 1 : i64, tpu.core_type = #tpu.core_type<tc>, window_params = [{transform_indices = @transform_0, window_bounds = array<i64: 1, 18, 18, 128>}, {pipeline_mode = #tpu.pipeline_mode<synchronous>, transform_indices = @transform_1, window_bounds = array<i64: 9, 128, 128>}, {pipeline_mode = #tpu.pipeline_mode<synchronous>, transform_indices = @transform_2, window_bounds = array<i64: 1, 128>}, {pipeline_mode = #tpu.pipeline_mode<synchronous>, transform_indices = @transform_3, window_bounds = array<i64: 1, 128>}, {pipeline_mode = #tpu.pipeline_mode<synchronous>, transform_indices = @transform_4, window_bounds = array<i64: 9, 128, 128>}, {pipeline_mode = #tpu.pipeline_mode<synchronous>, transform_indices = @transform_5, window_bounds = array<i64: 1, 128>}, {pipeline_mode = #tpu.pipeline_mode<synchronous>, transform_indices = @transform_6, window_bounds = array<i64: 1, 128>}, {pipeline_mode = #tpu.pipeline_mode<synchronous>, transform_indices = @transform_7, window_bounds = array<i64: 128, 128>}, {pipeline_mode = #tpu.pipeline_mode<synchronous>, transform_indices = @transform_8, window_bounds = array<i64: 1, 128>}, {pipeline_mode = #tpu.pipeline_mode<synchronous>, transform_indices = @transform_9, window_bounds = array<i64: 1, 128>}, {transform_indices = @transform_10, window_bounds = array<i64: 1, 16, 16, 128>}]} {
    %cst = arith.constant 0.000000e+00 : f32
    %0 = vector.broadcast %cst : f32 to vector<18x18x128xf32>
    %c0 = arith.constant 0 : index
    %c0_0 = arith.constant 0 : index
    %c0_1 = arith.constant 0 : index
    %1 = vector.load %arg12[%c0, %c0_0, %c0_1] : memref<18x18x128xf32, #tpu.memory_space<vmem>>, vector<18x18x128xf32>
    tpu.vector_store %arg12[%c0, %c0_0, %c0_1], %0 {strides = array<i32>} : memref<18x18x128xf32, #tpu.memory_space<vmem>>, vector<18x18x128xf32>,
    %cst_2 = arith.constant 0.000000e+00 : f32
    %2 = vector.broadcast %cst_2 : f32 to vector<256x128xf32>
    %c0_3 = arith.constant 0 : index
    %c0_4 = arith.constant 0 : index
    %c0_5 = arith.constant 0 : index
    %c0_6 = arith.constant 0 : index
    %3 = vector.load %arg1[%c0_3, %c0_4, %c0_5, %c0_6] : memref<1x18x18x128xf32, #tpu.memory_space<vmem>>, vector<1x16x16x128xf32>
    %4 = vector.shape_cast %3 : vector<1x16x16x128xf32> to vector<16x16x128xf32>
    %5 = vector.shape_cast %4 : vector<16x16x128xf32> to vector<256x128xf32>
    %c0_7 = arith.constant 0 : index
    %c0_8 = arith.constant 0 : index
    %c0_9 = arith.constant 0 : index
    %6 = vector.load %arg2[%c0_7, %c0_8, %c0_9] : memref<9x128x128xf32, #tpu.memory_space<vmem>>, vector<1x128x128xf32>
    %7 = vector.shape_cast %6 : vector<1x128x128xf32> to vector<128x128xf32>
    %cst_10 = arith.constant dense<0.000000e+00> : vector<256x128xf32>
    %8 = tpu.matmul %5, %7, %cst_10 {dimension_numbers = #tpu.dot_dimension_numbers<[1], [0], [0], [1], [0, 0, 1, 1], [], []>} : vector<256x128xf32>, vector<128x128xf32>, vector<256x128xf32> -> vector<256x128xf32>
    %9 = arith.addf %2, %8 : vector<256x128xf32>
    %c0_11 = arith.constant 0 : index
    %c0_12 = arith.constant 0 : index
    %c1 = arith.constant 1 : index
    %c0_13 = arith.constant 0 : index
    %10 = vector.load %arg1[%c0_11, %c0_12, %c1, %c0_13] : memref<1x18x18x128xf32, #tpu.memory_space<vmem>>, vector<1x16x16x128xf32>
    %11 = vector.shape_cast %10 : vector<1x16x16x128xf32> to vector<16x16x128xf32>
    %12 = vector.shape_cast %11 : vector<16x16x128xf32> to vector<256x128xf32>
    %c1_14 = arith.constant 1 : index
    %c0_15 = arith.constant 0 : index
    %c0_16 = arith.constant 0 : index
    %13 = vector.load %arg2[%c1_14, %c0_15, %c0_16] : memref<9x128x128xf32, #tpu.memory_space<vmem>>, vector<1x128x128xf32>
    %14 = vector.shape_cast %13 : vector<1x128x128xf32> to vector<128x128xf32>
    %cst_17 = arith.constant dense<0.000000e+00> : vector<256x128xf32>
    %15 = tpu.matmul %12, %14, %cst_17 {dimension_numbers = #tpu.dot_dimension_numbers<[1], [0], [0], [1], [0, 0, 1, 1], [], []>} : vector<256x128xf32>, vector<128x128xf32>, vector<256x128xf32> -> vector<256x128xf32>
    %16 = arith.addf %9, %15 : vector<256x128xf32>
    %c0_18 = arith.constant 0 : index
    %c0_19 = arith.constant 0 : index
    %c2 = arith.constant 2 : index
    %c0_20 = arith.constant 0 : index
    %17 = vector.load %arg1[%c0_18, %c0_19, %c2, %c0_20] : memref<1x18x18x128xf32, #tpu.memory_space<vmem>>, vector<1x16x16x128xf32>
    %18 = vector.shape_cast %17 : vector<1x16x16x128xf32> to vector<16x16x128xf32>
    %19 = vector.shape_cast %18 : vector<16x16x128xf32> to vector<256x128xf32>
    %c2_21 = arith.constant 2 : index
    %c0_22 = arith.constant 0 : index
    %c0_23 = arith.constant 0 : index
    %20 = vector.load %arg2[%c2_21, %c0_22, %c0_23] : memref<9x128x128xf32, #tpu.memory_space<vmem>>, vector<1x128x128xf32>
    %21 = vector.shape_cast %20 : vector<1x128x128xf32> to vector<128x128xf32>
    %cst_24 = arith.constant dense<0.000000e+00> : vector<256x128xf32>
    %22 = tpu.matmul %19, %21, %cst_24 {dimension_numbers = #tpu.dot_dimension_numbers<[1], [0], [0], [1], [0, 0, 1, 1], [], []>} : vector<256x128xf32>, vector<128x128xf32>, vector<256x128xf32> -> vector<256x128xf32>
    %23 = arith.addf %16, %22 : vector<256x128xf32>
    %c0_25 = arith.constant 0 : index
    %c1_26 = arith.constant 1 : index
    %c0_27 = arith.constant 0 : index
    %c0_28 = arith.constant 0 : index
    %24 = vector.load %arg1[%c0_25, %c1_26, %c0_27, %c0_28] : memref<1x18x18x128xf32, #tpu.memory_space<vmem>>, vector<1x16x16x128xf32>
    %25 = vector.shape_cast %24 : vector<1x16x16x128xf32> to vector<16x16x128xf32>
    %26 = vector.shape_cast %25 : vector<16x16x128xf32> to vector<256x128xf32>
    %c3 = arith.constant 3 : index
    %c0_29 = arith.constant 0 : index
    %c0_30 = arith.constant 0 : index
    %27 = vector.load %arg2[%c3, %c0_29, %c0_30] : memref<9x128x128xf32, #tpu.memory_space<vmem>>, vector<1x128x128xf32>
    %28 = vector.shape_cast %27 : vector<1x128x128xf32> to vector<128x128xf32>
    %cst_31 = arith.constant dense<0.000000e+00> : vector<256x128xf32>
    %29 = tpu.matmul %26, %28, %cst_31 {dimension_numbers = #tpu.dot_dimension_numbers<[1], [0], [0], [1], [0, 0, 1, 1], [], []>} : vector<256x128xf32>, vector<128x128xf32>, vector<256x128xf32> -> vector<256x128xf32>
    %30 = arith.addf %23, %29 : vector<256x128xf32>
    %c0_32 = arith.constant 0 : index
    %c1_33 = arith.constant 1 : index
    %c1_34 = arith.constant 1 : index
    %c0_35 = arith.constant 0 : index
    %31 = vector.load %arg1[%c0_32, %c1_33, %c1_34, %c0_35] : memref<1x18x18x128xf32, #tpu.memory_space<vmem>>, vector<1x16x16x128xf32>
    %32 = vector.shape_cast %31 : vector<1x16x16x128xf32> to vector<16x16x128xf32>
    %33 = vector.shape_cast %32 : vector<16x16x128xf32> to vector<256x128xf32>
    %c4 = arith.constant 4 : index
    %c0_36 = arith.constant 0 : index
    %c0_37 = arith.constant 0 : index
    %34 = vector.load %arg2[%c4, %c0_36, %c0_37] : memref<9x128x128xf32, #tpu.memory_space<vmem>>, vector<1x128x128xf32>
    %35 = vector.shape_cast %34 : vector<1x128x128xf32> to vector<128x128xf32>
    %cst_38 = arith.constant dense<0.000000e+00> : vector<256x128xf32>
    %36 = tpu.matmul %33, %35, %cst_38 {dimension_numbers = #tpu.dot_dimension_numbers<[1], [0], [0], [1], [0, 0, 1, 1], [], []>} : vector<256x128xf32>, vector<128x128xf32>, vector<256x128xf32> -> vector<256x128xf32>
    %37 = arith.addf %30, %36 : vector<256x128xf32>
    %c0_39 = arith.constant 0 : index
    %c1_40 = arith.constant 1 : index
    %c2_41 = arith.constant 2 : index
    %c0_42 = arith.constant 0 : index
    %38 = vector.load %arg1[%c0_39, %c1_40, %c2_41, %c0_42] : memref<1x18x18x128xf32, #tpu.memory_space<vmem>>, vector<1x16x16x128xf32>
    %39 = vector.shape_cast %38 : vector<1x16x16x128xf32> to vector<16x16x128xf32>
    %40 = vector.shape_cast %39 : vector<16x16x128xf32> to vector<256x128xf32>
    %c5 = arith.constant 5 : index
    %c0_43 = arith.constant 0 : index
    %c0_44 = arith.constant 0 : index
    %41 = vector.load %arg2[%c5, %c0_43, %c0_44] : memref<9x128x128xf32, #tpu.memory_space<vmem>>, vector<1x128x128xf32>
    %42 = vector.shape_cast %41 : vector<1x128x128xf32> to vector<128x128xf32>
    %cst_45 = arith.constant dense<0.000000e+00> : vector<256x128xf32>
    %43 = tpu.matmul %40, %42, %cst_45 {dimension_numbers = #tpu.dot_dimension_numbers<[1], [0], [0], [1], [0, 0, 1, 1], [], []>} : vector<256x128xf32>, vector<128x128xf32>, vector<256x128xf32> -> vector<256x128xf32>
    %44 = arith.addf %37, %43 : vector<256x128xf32>
    %c0_46 = arith.constant 0 : index
    %c2_47 = arith.constant 2 : index
    %c0_48 = arith.constant 0 : index
    %c0_49 = arith.constant 0 : index
    %45 = vector.load %arg1[%c0_46, %c2_47, %c0_48, %c0_49] : memref<1x18x18x128xf32, #tpu.memory_space<vmem>>, vector<1x16x16x128xf32>
    %46 = vector.shape_cast %45 : vector<1x16x16x128xf32> to vector<16x16x128xf32>
    %47 = vector.shape_cast %46 : vector<16x16x128xf32> to vector<256x128xf32>
    %c6 = arith.constant 6 : index
    %c0_50 = arith.constant 0 : index
    %c0_51 = arith.constant 0 : index
    %48 = vector.load %arg2[%c6, %c0_50, %c0_51] : memref<9x128x128xf32, #tpu.memory_space<vmem>>, vector<1x128x128xf32>
    %49 = vector.shape_cast %48 : vector<1x128x128xf32> to vector<128x128xf32>
    %cst_52 = arith.constant dense<0.000000e+00> : vector<256x128xf32>
    %50 = tpu.matmul %47, %49, %cst_52 {dimension_numbers = #tpu.dot_dimension_numbers<[1], [0], [0], [1], [0, 0, 1, 1], [], []>} : vector<256x128xf32>, vector<128x128xf32>, vector<256x128xf32> -> vector<256x128xf32>
    %51 = arith.addf %44, %50 : vector<256x128xf32>
    %c0_53 = arith.constant 0 : index
    %c2_54 = arith.constant 2 : index
    %c1_55 = arith.constant 1 : index
    %c0_56 = arith.constant 0 : index
    %52 = vector.load %arg1[%c0_53, %c2_54, %c1_55, %c0_56] : memref<1x18x18x128xf32, #tpu.memory_space<vmem>>, vector<1x16x16x128xf32>
    %53 = vector.shape_cast %52 : vector<1x16x16x128xf32> to vector<16x16x128xf32>
    %54 = vector.shape_cast %53 : vector<16x16x128xf32> to vector<256x128xf32>
    %c7 = arith.constant 7 : index
    %c0_57 = arith.constant 0 : index
    %c0_58 = arith.constant 0 : index
    %55 = vector.load %arg2[%c7, %c0_57, %c0_58] : memref<9x128x128xf32, #tpu.memory_space<vmem>>, vector<1x128x128xf32>
    %56 = vector.shape_cast %55 : vector<1x128x128xf32> to vector<128x128xf32>
    %cst_59 = arith.constant dense<0.000000e+00> : vector<256x128xf32>
    %57 = tpu.matmul %54, %56, %cst_59 {dimension_numbers = #tpu.dot_dimension_numbers<[1], [0], [0], [1], [0, 0, 1, 1], [], []>} : vector<256x128xf32>, vector<128x128xf32>, vector<256x128xf32> -> vector<256x128xf32>
    %58 = arith.addf %51, %57 : vector<256x128xf32>
    %c0_60 = arith.constant 0 : index
    %c2_61 = arith.constant 2 : index
    %c2_62 = arith.constant 2 : index
    %c0_63 = arith.constant 0 : index
    %59 = vector.load %arg1[%c0_60, %c2_61, %c2_62, %c0_63] : memref<1x18x18x128xf32, #tpu.memory_space<vmem>>, vector<1x16x16x128xf32>
    %60 = vector.shape_cast %59 : vector<1x16x16x128xf32> to vector<16x16x128xf32>
    %61 = vector.shape_cast %60 : vector<16x16x128xf32> to vector<256x128xf32>
    %c8 = arith.constant 8 : index
    %c0_64 = arith.constant 0 : index
    %c0_65 = arith.constant 0 : index
    %62 = vector.load %arg2[%c8, %c0_64, %c0_65] : memref<9x128x128xf32, #tpu.memory_space<vmem>>, vector<1x128x128xf32>
    %63 = vector.shape_cast %62 : vector<1x128x128xf32> to vector<128x128xf32>
    %cst_66 = arith.constant dense<0.000000e+00> : vector<256x128xf32>
    %64 = tpu.matmul %61, %63, %cst_66 {dimension_numbers = #tpu.dot_dimension_numbers<[1], [0], [0], [1], [0, 0, 1, 1], [], []>} : vector<256x128xf32>, vector<128x128xf32>, vector<256x128xf32> -> vector<256x128xf32>
    %65 = arith.addf %58, %64 : vector<256x128xf32>
    %c0_67 = arith.constant 0 : index
    %c0_68 = arith.constant 0 : index
    %66 = vector.load %arg3[%c0_67, %c0_68] : memref<1x128xf32, #tpu.memory_space<vmem>>, vector<1x128xf32>
    %67 = vector.broadcast %66 : vector<1x128xf32> to vector<256x128xf32>
    %68 = arith.mulf %65, %67 : vector<256x128xf32>
    %c0_69 = arith.constant 0 : index
    %c0_70 = arith.constant 0 : index
    %69 = vector.load %arg4[%c0_69, %c0_70] : memref<1x128xf32, #tpu.memory_space<vmem>>, vector<1x128xf32>
    %70 = vector.broadcast %69 : vector<1x128xf32> to vector<256x128xf32>
    %71 = arith.addf %68, %70 : vector<256x128xf32>
    %cst_71 = arith.constant 0.000000e+00 : f32
    %72 = vector.broadcast %cst_71 : f32 to vector<256x128xf32>
    %73 = arith.maximumf %71, %72 : vector<256x128xf32>
    %74 = vector.shape_cast %73 : vector<256x128xf32> to vector<16x16x128xf32>
    %c1_72 = arith.constant 1 : index
    %c1_73 = arith.constant 1 : index
    %c0_74 = arith.constant 0 : index
    %75 = vector.load %arg12[%c1_72, %c1_73, %c0_74] : memref<18x18x128xf32, #tpu.memory_space<vmem>>, vector<16x16x128xf32>
    tpu.vector_store %arg12[%c1_72, %c1_73, %c0_74], %74 {strides = array<i32>} : memref<18x18x128xf32, #tpu.memory_space<vmem>>, vector<16x16x128xf32>,
    %cst_75 = arith.constant 0.000000e+00 : f32
    %76 = vector.broadcast %cst_75 : f32 to vector<256x128xf32>
    %c0_76 = arith.constant 0 : index
    %c0_77 = arith.constant 0 : index
    %c0_78 = arith.constant 0 : index
    %77 = vector.load %arg12[%c0_76, %c0_77, %c0_78] : memref<18x18x128xf32, #tpu.memory_space<vmem>>, vector<16x16x128xf32>
    %78 = vector.shape_cast %77 : vector<16x16x128xf32> to vector<256x128xf32>
    %c0_79 = arith.constant 0 : index
    %c0_80 = arith.constant 0 : index
    %c0_81 = arith.constant 0 : index
    %79 = vector.load %arg5[%c0_79, %c0_80, %c0_81] : memref<9x128x128xf32, #tpu.memory_space<vmem>>, vector<1x128x128xf32>
    %80 = vector.shape_cast %79 : vector<1x128x128xf32> to vector<128x128xf32>
    %cst_82 = arith.constant dense<0.000000e+00> : vector<256x128xf32>
    %81 = tpu.matmul %78, %80, %cst_82 {dimension_numbers = #tpu.dot_dimension_numbers<[1], [0], [0], [1], [0, 0, 1, 1], [], []>} : vector<256x128xf32>, vector<128x128xf32>, vector<256x128xf32> -> vector<256x128xf32>
    %82 = arith.addf %76, %81 : vector<256x128xf32>
    %c0_83 = arith.constant 0 : index
    %c1_84 = arith.constant 1 : index
    %c0_85 = arith.constant 0 : index
    %83 = vector.load %arg12[%c0_83, %c1_84, %c0_85] : memref<18x18x128xf32, #tpu.memory_space<vmem>>, vector<16x16x128xf32>
    %84 = vector.shape_cast %83 : vector<16x16x128xf32> to vector<256x128xf32>
    %c1_86 = arith.constant 1 : index
    %c0_87 = arith.constant 0 : index
    %c0_88 = arith.constant 0 : index
    %85 = vector.load %arg5[%c1_86, %c0_87, %c0_88] : memref<9x128x128xf32, #tpu.memory_space<vmem>>, vector<1x128x128xf32>
    %86 = vector.shape_cast %85 : vector<1x128x128xf32> to vector<128x128xf32>
    %cst_89 = arith.constant dense<0.000000e+00> : vector<256x128xf32>
    %87 = tpu.matmul %84, %86, %cst_89 {dimension_numbers = #tpu.dot_dimension_numbers<[1], [0], [0], [1], [0, 0, 1, 1], [], []>} : vector<256x128xf32>, vector<128x128xf32>, vector<256x128xf32> -> vector<256x128xf32>
    %88 = arith.addf %82, %87 : vector<256x128xf32>
    %c0_90 = arith.constant 0 : index
    %c2_91 = arith.constant 2 : index
    %c0_92 = arith.constant 0 : index
    %89 = vector.load %arg12[%c0_90, %c2_91, %c0_92] : memref<18x18x128xf32, #tpu.memory_space<vmem>>, vector<16x16x128xf32>
    %90 = vector.shape_cast %89 : vector<16x16x128xf32> to vector<256x128xf32>
    %c2_93 = arith.constant 2 : index
    %c0_94 = arith.constant 0 : index
    %c0_95 = arith.constant 0 : index
    %91 = vector.load %arg5[%c2_93, %c0_94, %c0_95] : memref<9x128x128xf32, #tpu.memory_space<vmem>>, vector<1x128x128xf32>
    %92 = vector.shape_cast %91 : vector<1x128x128xf32> to vector<128x128xf32>
    %cst_96 = arith.constant dense<0.000000e+00> : vector<256x128xf32>
    %93 = tpu.matmul %90, %92, %cst_96 {dimension_numbers = #tpu.dot_dimension_numbers<[1], [0], [0], [1], [0, 0, 1, 1], [], []>} : vector<256x128xf32>, vector<128x128xf32>, vector<256x128xf32> -> vector<256x128xf32>
    %94 = arith.addf %88, %93 : vector<256x128xf32>
    %c1_97 = arith.constant 1 : index
    %c0_98 = arith.constant 0 : index
    %c0_99 = arith.constant 0 : index
    %95 = vector.load %arg12[%c1_97, %c0_98, %c0_99] : memref<18x18x128xf32, #tpu.memory_space<vmem>>, vector<16x16x128xf32>
    %96 = vector.shape_cast %95 : vector<16x16x128xf32> to vector<256x128xf32>
    %c3_100 = arith.constant 3 : index
    %c0_101 = arith.constant 0 : index
    %c0_102 = arith.constant 0 : index
    %97 = vector.load %arg5[%c3_100, %c0_101, %c0_102] : memref<9x128x128xf32, #tpu.memory_space<vmem>>, vector<1x128x128xf32>
    %98 = vector.shape_cast %97 : vector<1x128x128xf32> to vector<128x128xf32>
    %cst_103 = arith.constant dense<0.000000e+00> : vector<256x128xf32>
    %99 = tpu.matmul %96, %98, %cst_103 {dimension_numbers = #tpu.dot_dimension_numbers<[1], [0], [0], [1], [0, 0, 1, 1], [], []>} : vector<256x128xf32>, vector<128x128xf32>, vector<256x128xf32> -> vector<256x128xf32>
    %100 = arith.addf %94, %99 : vector<256x128xf32>
    %c1_104 = arith.constant 1 : index
    %c1_105 = arith.constant 1 : index
    %c0_106 = arith.constant 0 : index
    %101 = vector.load %arg12[%c1_104, %c1_105, %c0_106] : memref<18x18x128xf32, #tpu.memory_space<vmem>>, vector<16x16x128xf32>
    %102 = vector.shape_cast %101 : vector<16x16x128xf32> to vector<256x128xf32>
    %c4_107 = arith.constant 4 : index
    %c0_108 = arith.constant 0 : index
    %c0_109 = arith.constant 0 : index
    %103 = vector.load %arg5[%c4_107, %c0_108, %c0_109] : memref<9x128x128xf32, #tpu.memory_space<vmem>>, vector<1x128x128xf32>
    %104 = vector.shape_cast %103 : vector<1x128x128xf32> to vector<128x128xf32>
    %cst_110 = arith.constant dense<0.000000e+00> : vector<256x128xf32>
    %105 = tpu.matmul %102, %104, %cst_110 {dimension_numbers = #tpu.dot_dimension_numbers<[1], [0], [0], [1], [0, 0, 1, 1], [], []>} : vector<256x128xf32>, vector<128x128xf32>, vector<256x128xf32> -> vector<256x128xf32>
    %106 = arith.addf %100, %105 : vector<256x128xf32>
    %c1_111 = arith.constant 1 : index
    %c2_112 = arith.constant 2 : index
    %c0_113 = arith.constant 0 : index
    %107 = vector.load %arg12[%c1_111, %c2_112, %c0_113] : memref<18x18x128xf32, #tpu.memory_space<vmem>>, vector<16x16x128xf32>
    %108 = vector.shape_cast %107 : vector<16x16x128xf32> to vector<256x128xf32>
    %c5_114 = arith.constant 5 : index
    %c0_115 = arith.constant 0 : index
    %c0_116 = arith.constant 0 : index
    %109 = vector.load %arg5[%c5_114, %c0_115, %c0_116] : memref<9x128x128xf32, #tpu.memory_space<vmem>>, vector<1x128x128xf32>
    %110 = vector.shape_cast %109 : vector<1x128x128xf32> to vector<128x128xf32>
    %cst_117 = arith.constant dense<0.000000e+00> : vector<256x128xf32>
    %111 = tpu.matmul %108, %110, %cst_117 {dimension_numbers = #tpu.dot_dimension_numbers<[1], [0], [0], [1], [0, 0, 1, 1], [], []>} : vector<256x128xf32>, vector<128x128xf32>, vector<256x128xf32> -> vector<256x128xf32>
    %112 = arith.addf %106, %111 : vector<256x128xf32>
    %c2_118 = arith.constant 2 : index
    %c0_119 = arith.constant 0 : index
    %c0_120 = arith.constant 0 : index
    %113 = vector.load %arg12[%c2_118, %c0_119, %c0_120] : memref<18x18x128xf32, #tpu.memory_space<vmem>>, vector<16x16x128xf32>
    %114 = vector.shape_cast %113 : vector<16x16x128xf32> to vector<256x128xf32>
    %c6_121 = arith.constant 6 : index
    %c0_122 = arith.constant 0 : index
    %c0_123 = arith.constant 0 : index
    %115 = vector.load %arg5[%c6_121, %c0_122, %c0_123] : memref<9x128x128xf32, #tpu.memory_space<vmem>>, vector<1x128x128xf32>
    %116 = vector.shape_cast %115 : vector<1x128x128xf32> to vector<128x128xf32>
    %cst_124 = arith.constant dense<0.000000e+00> : vector<256x128xf32>
    %117 = tpu.matmul %114, %116, %cst_124 {dimension_numbers = #tpu.dot_dimension_numbers<[1], [0], [0], [1], [0, 0, 1, 1], [], []>} : vector<256x128xf32>, vector<128x128xf32>, vector<256x128xf32> -> vector<256x128xf32>
    %118 = arith.addf %112, %117 : vector<256x128xf32>
    %c2_125 = arith.constant 2 : index
    %c1_126 = arith.constant 1 : index
    %c0_127 = arith.constant 0 : index
    %119 = vector.load %arg12[%c2_125, %c1_126, %c0_127] : memref<18x18x128xf32, #tpu.memory_space<vmem>>, vector<16x16x128xf32>
    %120 = vector.shape_cast %119 : vector<16x16x128xf32> to vector<256x128xf32>
    %c7_128 = arith.constant 7 : index
    %c0_129 = arith.constant 0 : index
    %c0_130 = arith.constant 0 : index
    %121 = vector.load %arg5[%c7_128, %c0_129, %c0_130] : memref<9x128x128xf32, #tpu.memory_space<vmem>>, vector<1x128x128xf32>
    %122 = vector.shape_cast %121 : vector<1x128x128xf32> to vector<128x128xf32>
    %cst_131 = arith.constant dense<0.000000e+00> : vector<256x128xf32>
    %123 = tpu.matmul %120, %122, %cst_131 {dimension_numbers = #tpu.dot_dimension_numbers<[1], [0], [0], [1], [0, 0, 1, 1], [], []>} : vector<256x128xf32>, vector<128x128xf32>, vector<256x128xf32> -> vector<256x128xf32>
    %124 = arith.addf %118, %123 : vector<256x128xf32>
    %c2_132 = arith.constant 2 : index
    %c2_133 = arith.constant 2 : index
    %c0_134 = arith.constant 0 : index
    %125 = vector.load %arg12[%c2_132, %c2_133, %c0_134] : memref<18x18x128xf32, #tpu.memory_space<vmem>>, vector<16x16x128xf32>
    %126 = vector.shape_cast %125 : vector<16x16x128xf32> to vector<256x128xf32>
    %c8_135 = arith.constant 8 : index
    %c0_136 = arith.constant 0 : index
    %c0_137 = arith.constant 0 : index
    %127 = vector.load %arg5[%c8_135, %c0_136, %c0_137] : memref<9x128x128xf32, #tpu.memory_space<vmem>>, vector<1x128x128xf32>
    %128 = vector.shape_cast %127 : vector<1x128x128xf32> to vector<128x128xf32>
    %cst_138 = arith.constant dense<0.000000e+00> : vector<256x128xf32>
    %129 = tpu.matmul %126, %128, %cst_138 {dimension_numbers = #tpu.dot_dimension_numbers<[1], [0], [0], [1], [0, 0, 1, 1], [], []>} : vector<256x128xf32>, vector<128x128xf32>, vector<256x128xf32> -> vector<256x128xf32>
    %130 = arith.addf %124, %129 : vector<256x128xf32>
    %c0_139 = arith.constant 0 : index
    %c0_140 = arith.constant 0 : index
    %131 = vector.load %arg6[%c0_139, %c0_140] : memref<1x128xf32, #tpu.memory_space<vmem>>, vector<1x128xf32>
    %132 = vector.broadcast %131 : vector<1x128xf32> to vector<256x128xf32>
    %133 = arith.mulf %130, %132 : vector<256x128xf32>
    %c0_141 = arith.constant 0 : index
    %c0_142 = arith.constant 0 : index
    %134 = vector.load %arg7[%c0_141, %c0_142] : memref<1x128xf32, #tpu.memory_space<vmem>>, vector<1x128xf32>
    %135 = vector.broadcast %134 : vector<1x128xf32> to vector<256x128xf32>
    %136 = arith.addf %133, %135 : vector<256x128xf32>
    %c0_143 = arith.constant 0 : index
    %c1_144 = arith.constant 1 : index
    %c1_145 = arith.constant 1 : index
    %c0_146 = arith.constant 0 : index
    %137 = vector.load %arg1[%c0_143, %c1_144, %c1_145, %c0_146] : memref<1x18x18x128xf32, #tpu.memory_space<vmem>>, vector<1x16x16x128xf32>
    %138 = vector.shape_cast %137 : vector<1x16x16x128xf32> to vector<16x16x128xf32>
    %139 = vector.shape_cast %138 : vector<16x16x128xf32> to vector<256x128xf32>
    %c0_147 = arith.constant 0 : index
    %c0_148 = arith.constant 0 : index
    %140 = vector.load %arg8[%c0_147, %c0_148] : memref<128x128xf32, #tpu.memory_space<vmem>>, vector<128x128xf32>
    %cst_149 = arith.constant dense<0.000000e+00> : vector<256x128xf32>
    %141 = tpu.matmul %139, %140, %cst_149 {dimension_numbers = #tpu.dot_dimension_numbers<[1], [0], [0], [1], [0, 0, 1, 1], [], []>} : vector<256x128xf32>, vector<128x128xf32>, vector<256x128xf32> -> vector<256x128xf32>
    %c0_150 = arith.constant 0 : index
    %c0_151 = arith.constant 0 : index
    %142 = vector.load %arg9[%c0_150, %c0_151] : memref<1x128xf32, #tpu.memory_space<vmem>>, vector<1x128xf32>
    %143 = vector.broadcast %142 : vector<1x128xf32> to vector<256x128xf32>
    %144 = arith.mulf %141, %143 : vector<256x128xf32>
    %c0_152 = arith.constant 0 : index
    %c0_153 = arith.constant 0 : index
    %145 = vector.load %arg10[%c0_152, %c0_153] : memref<1x128xf32, #tpu.memory_space<vmem>>, vector<1x128xf32>
    %146 = vector.broadcast %145 : vector<1x128xf32> to vector<256x128xf32>
    %147 = arith.addf %144, %146 : vector<256x128xf32>
    %148 = arith.addf %136, %147 : vector<256x128xf32>
    %cst_154 = arith.constant 0.000000e+00 : f32
    %149 = vector.broadcast %cst_154 : f32 to vector<256x128xf32>
    %150 = arith.maximumf %148, %149 : vector<256x128xf32>
    %151 = vector.shape_cast %150 : vector<256x128xf32> to vector<16x16x128xf32>
    %c0_155 = arith.constant 0 : index
    %c0_156 = arith.constant 0 : index
    %c0_157 = arith.constant 0 : index
    %c0_158 = arith.constant 0 : index
    %152 = vector.load %arg11[%c0_155, %c0_156, %c0_157, %c0_158] : memref<1x16x16x128xf32, #tpu.memory_space<vmem>>, vector<1x16x16x128xf32>
    %153 = vector.shape_cast %152 : vector<1x16x16x128xf32> to vector<16x16x128xf32>
    %154 = vector.shape_cast %151 : vector<16x16x128xf32> to vector<1x16x16x128xf32>
    tpu.vector_store %arg11[%c0_155, %c0_156, %c0_157, %c0_158], %154 {strides = array<i32>} : memref<1x16x16x128xf32, #tpu.memory_space<vmem>>, vector<1x16x16x128xf32>,
    return
  }
  func.func @transform_0(%arg0: i32) -> (i32, i32, i32, i32) {
    %c0_i32 = arith.constant 0 : i32
    %c0_i32_0 = arith.constant 0 : i32
    %c0_i32_1 = arith.constant 0 : i32
    %c0_i32_2 = arith.constant 0 : i32
    return %arg0, %c0_i32, %c0_i32_0, %c0_i32_1 : i32, i32, i32, i32
  }
  func.func @transform_1(%arg0: i32) -> (i32, i32, i32) {
    %c0_i32 = arith.constant 0 : i32
    %c0_i32_0 = arith.constant 0 : i32
    %c0_i32_1 = arith.constant 0 : i32
    %c0_i32_2 = arith.constant 0 : i32
    return %c0_i32, %c0_i32_0, %c0_i32_1 : i32, i32, i32
  }
  func.func @transform_2(%arg0: i32) -> (i32, i32) {
    %c0_i32 = arith.constant 0 : i32
    %c0_i32_0 = arith.constant 0 : i32
    %c0_i32_1 = arith.constant 0 : i32
    return %c0_i32, %c0_i32_0 : i32, i32
  }
  func.func @transform_3(%arg0: i32) -> (i32, i32) {
    %c0_i32 = arith.constant 0 : i32
    %c0_i32_0 = arith.constant 0 : i32
    %c0_i32_1 = arith.constant 0 : i32
    return %c0_i32, %c0_i32_0 : i32, i32
  }
  func.func @transform_4(%arg0: i32) -> (i32, i32, i32) {
    %c0_i32 = arith.constant 0 : i32
    %c0_i32_0 = arith.constant 0 : i32
    %c0_i32_1 = arith.constant 0 : i32
    %c0_i32_2 = arith.constant 0 : i32
    return %c0_i32, %c0_i32_0, %c0_i32_1 : i32, i32, i32
  }
  func.func @transform_5(%arg0: i32) -> (i32, i32) {
    %c0_i32 = arith.constant 0 : i32
    %c0_i32_0 = arith.constant 0 : i32
    %c0_i32_1 = arith.constant 0 : i32
    return %c0_i32, %c0_i32_0 : i32, i32
  }
  func.func @transform_6(%arg0: i32) -> (i32, i32) {
    %c0_i32 = arith.constant 0 : i32
    %c0_i32_0 = arith.constant 0 : i32
    %c0_i32_1 = arith.constant 0 : i32
    return %c0_i32, %c0_i32_0 : i32, i32
  }
  func.func @transform_7(%arg0: i32) -> (i32, i32) {
    %c0_i32 = arith.constant 0 : i32
    %c0_i32_0 = arith.constant 0 : i32
    %c0_i32_1 = arith.constant 0 : i32
    return %c0_i32, %c0_i32_0 : i32, i32
  }
  func.func @transform_8(%arg0: i32) -> (i32, i32) {
    %c0_i32 = arith.constant 0 : i32
    %c0_i32_0 = arith.constant 0 : i32
    %c0_i32_1 = arith.constant 0 : i32
    return %c0_i32, %c0_i32_0 : i32, i32
  }
  func.func @transform_9(%arg0: i32) -> (i32, i32) {
    %c0_i32 = arith.constant 0 : i32
    %c0_i32_0 = arith.constant 0 : i32
    %c0_i32_1 = arith.constant 0 : i32
    return %c0_i32, %c0_i32_0 : i32, i32
  }
  func.func @transform_10(%arg0: i32) -> (i32, i32, i32, i32) {
    %c0_i32 = arith.constant 0 : i32
    %c0_i32_0 = arith.constant 0 : i32
    %c0_i32_1 = arith.constant 0 : i32
    %c0_i32_2 = arith.constant 0 : i32
    return %arg0, %c0_i32, %c0_i32_0, %c0_i32_1 : i32, i32, i32, i32
  }
}

</mosaic_0001>

<bundles_post_ra>
// kernel: _lambda_.1
= control target key start
LH: loop header
LB: loop body
LE: loop exit
PB: predicated region body
PF: predicated region fallthrough
CT: control target
= control target key end

     0   :  { %15 = vsyncpa [#allocation4], 0  ;;  %s10607_s13 = smov 0   ;;  %s12646_s0 = inlined_call_operand.vmem [shape: f32[2,18,18,128], index: 0, kind: input, shape index: {}]   ;;  %s12647_s1 = inlined_call_operand.hbm [shape: f32[9,128,128], index: 1, kind: input, shape index: {}]   ;;  %s12648_s2 = inlined_call_operand.vmem [shape: f32[1,128], index: 2, kind: input, shape index: {}]   ;;  %s12649_s3 = inlined_call_operand.vmem [shape: f32[1,128], index: 3, kind: input, shape index: {}]   ;;  %s12650_s4 = inlined_call_operand.vmem [shape: f32[9,128,128], index: 4, kind: input, shape index: {}]   ;;  %s12651_s5 = inlined_call_operand.vmem [shape: f32[1,128], index: 5, kind: input, shape index: {}]   ;;  %s12652_s6 = inlined_call_operand.vmem [shape: f32[1,128], index: 6, kind: input, shape index: {}]   ;;  %s12653_s7 = inlined_call_operand.vmem [shape: f32[128,128], index: 7, kind: input, shape index: {}]   ;;  %s12654_s8 = inlined_call_operand.vmem [shape: f32[1,128], index: 8, kind: input, shape index: {}]   ;;  %s12655_s9 = inlined_call_operand.vmem [shape: f32[1,128], index: 9, kind: input, shape index: {}]   ;;  %s12656_s10 = inlined_call_operand.vmem [shape: f32[2,16,16,128], index: 10, kind: output, shape index: {}]  }
   0x1 LB: > { %s10613_s14 = sadd.s32 4294967295, %s10546_s13   ;;  %p6547_p0 = scmp.ge.s32.totalorder %s10546_s13, 1  ;;  %s10546_s13 = sphi %s10607_s13, %s21_s13  }
   0x2   : > { %p267_p1 = scmp.lt.s32.totalorder %s10546_s13, 3  ;;  %s10548_s15 = smov [#allocation3]  }
   0x3   : > { %s279_s16 = sshll.u32 %s10548_s15, 4  ;;  %p12657_p3 = scmp.eq.s32.totalorder %s10613_s14, 0  ;;  %s280_s16 = int_to_ptr.vmem [resolvable:$true] %s279_s16 }
   0x4   : > { %p10617_p2 = pnand %p6547_p0, %p267_p1  ;;  %s10508_s21 = scalar_lea.hbm %s12647_s1, 18432 }
   0x5   : > { %p10509_p6 = scmp.ne.s32.totalorder %s12647_s1, %s10508_s21  ;;  %p10515_p10 = scmp.lt.u32.totalorder %s10508_s21, %s12647_s1 }
   0x6   : > { %s12732_s17 = scalar_select %p10617_p2, 1, 0 }
   0x7   : > { %p10489_p4 = pneg %p10617_p2 }
   0x9   : > { %p10626_p5 = pnand %p12657_p3, %p10489_p4 }
   0xb   : > { %p10510_p7 = pneg %p10626_p5 }
   0xd   : > { %p10511_p8 = pnand %p10510_p7, %p10509_p6 }
   0xf   : > { %p10512_p9 = pneg %p10511_p8 }
  0x11   : > { %p10517_p11 = pnand %p10515_p10, %p10512_p9 }
  0x13   : > { %10520 = shalt.err (!%p10517_p11)
}
  0x14   : > { %s10521_s26 = scalar_lea.vmem %s280_s16, 18432  ;;  %p10529_p1 = scmp.lt.s32.totalorder %s280_s16, %s280_s16 }
  0x15   : > { %p10522_p12 = scmp.ne.s32.totalorder %s280_s16, %s10521_s26  ;;  %p10530_p4 = scmp.lt.s32.totalorder %s10521_s26, %s10521_s26 }
  0x17   : > { %p10524_p13 = pnand %p10522_p12, %p10510_p7  ;;  %p10531_p3 = por %p10530_p4, %p10529_p1 }
  0x19   : > { %p10525_p0 = pneg %p10524_p13 }
  0x1b   : > { %p10532_p2 = pnand %p10531_p3, %p10525_p0 }
  0x1d   : > { %10535 = shalt.err (!%p10532_p2)
}
  0x1e   : > { %s10549_s27 = smov 128   ;;  %s10550_s28 = smov 8  }
  0x1f   : > { %10492 = dma.hbm_to_vmem [thread:$0]  (!%p10626_p5), %s12647_s1, 18432, %s280_s16, [#allocation4], %s10549_s27, %s10549_s27, %s10550_s28  }
  0x20   : > { %p12734_p6 = scmp.ne.s32.totalorder %s12732_s17, 0 }
  0x22   : > { %327 = sbr.rel (%p12734_p6) target bundleno = 1571 (0x623), region = 60 }
  0x29   : > { %p12735_p8 = scmp.eq.s32.totalorder %s10613_s14, 0 }
  0x2b   : > { %10541 = dma.done.wait (%p12735_p8), [#allocation4], 18432   ;;  %p12736_p7 = pmov %p12735_p8 }
  0x2c   : > { %p365_p2 = scmp.lt.s32.totalorder %s10613_s14, 1  ;;  %v510_v0 = vld [vmem:[#allocation3 + $0x80] sm:$0xff]  ;;  %v511_v1 = vld [vmem:[#allocation3 + $0x88] sm:$0xff]  ;;  %v512_v2 = vld [vmem:[#allocation3 + $0x90] sm:$0xff] }
  0x2d   : > { %10543 = vsyncadd (%p12736_p7), [#allocation4], 4294948864  ;;  %v9348_v3 = vpack.c.bf16 %v511_v1, %v510_v0  ;;  %v513_v4 = vld [vmem:[#allocation3 + $0x98] sm:$0xff]  ;;  %v514_v6 = vld [vmem:[#allocation3 + $0xa0] sm:$0xff] }
  0x2e   : > { %s12870_s14 = smov (!%p365_p2, %s10613_s14), 1  ;;  %v9352_v5 = vpack.c.bf16 %v513_v4, %v512_v2  ;;  %v515_v7 = vld [vmem:[#allocation3 + $0xa8] sm:$0xff]  ;;  %v516_v10 = vld [vmem:[#allocation3 + $0xb0] sm:$0xff]  ;;  %v517_v11 = vld [vmem:[#allocation3 + $0xb8] sm:$0xff] }
  0x2f   : > { %s10484_s11 = smul.u32 432, %s12870_s14  ;;  %9349 = vmatprep.subr.bf16.mxu0 %v9348_v3  ;;  %9956 = vmatprep.subr.bf16.mxu1 %v9348_v3  ;;  %v9356_v8 = vpack.c.bf16 %v515_v7, %v514_v6  ;;  %v9360_v12 = vpack.c.bf16 %v517_v11, %v516_v10  ;;  %v518_v13 = vld [vmem:[#allocation3 + $0xc0] sm:$0xff]  ;;  %v519_v14 = vld [vmem:[#allocation3 + $0xc8] sm:$0xff]  ;;  %v520_v16 = vld [vmem:[#allocation3 + $0xd0] sm:$0xff]  ;;  %s6915_s24 = sshll.u32 %s12870_s14, 8 }
  0x30   : > { %9351 = vmatpush3.bf16.msra.mxu0 %v9348_v3  ;;  %9964 = vmatpush3.bf16.msra.mxu1 %v9348_v3  ;;  %v9364_v15 = vpack.c.bf16 %v519_v14, %v518_v13  ;;  %v521_v17 = vld [vmem:[#allocation3 + $0xd8] sm:$0xff]  ;;  %v522_v19 = vld [vmem:[#allocation3 + $0xe0] sm:$0xff]  ;;  %v523_v20 = vld [vmem:[#allocation3 + $0xe8] sm:$0xff]  ;;  %s12468_s27 = scalar_lea.vmem %s12656_s10, %s6915_s24 }
  0x31   : > { %s10660_s16 = scalar_lea.vmem %s12646_s0, %s10484_s11  ;;  %9353 = vmatprep.subr.bf16.mxu0 %v9352_v5  ;;  %9957 = vmatprep.subr.bf16.mxu1 %v9352_v5  ;;  %v9368_v18 = vpack.c.bf16 %v521_v17, %v520_v16  ;;  %v9372_v21 = vpack.c.bf16 %v523_v20, %v522_v19  ;;  %v524_v22 = vld [vmem:[#allocation3 + $0xf0] sm:$0xff]  ;;  %v525_v23 = vld [vmem:[#allocation3 + $0xf8] sm:$0xff]  ;;  %v461_v25 = vld [vmem:[#allocation3] sm:$0xff] }
  0x32   : > { %v477_v9 = vld [vmem:[%s10660_s16 + $0x1] sm:$0xff]  ;;  %v9376_v24 = vpack.c.bf16 %v525_v23, %v524_v22  ;;  %v462_v26 = vld [vmem:[#allocation3 + $0x8] sm:$0xff]  ;;  %v478_v30 = vld [vmem:[%s10660_s16 + $0x9] sm:$0xff] }
  0x33   : > { %7860 = vmatprep.mubr.f32.mxu0 %v477_v9  ;;  %v9380_v27 = vpack.c.bf16 %v462_v26, %v461_v25  ;;  %v463_v28 = vld [vmem:[#allocation3 + $0x10] sm:$0xff]  ;;  %v464_v29 = vld [vmem:[#allocation3 + $0x18] sm:$0xff]  ;;  %v465_v33 = vld [vmem:[#allocation3 + $0x20] sm:$0xff] }
  0x34   : > { %9355 = vmatpush3.bf16.msra.mxu0 %v9352_v5  ;;  %9965 = vmatpush3.bf16.msra.mxu1 %v9352_v5  ;;  %v10665_v31 = vld [vmem:[%s10660_s16 + $0x19] sm:$0xff]  ;;  %v9384_v32 = vpack.c.bf16 %v464_v29, %v463_v28  ;;  %v10669_v35 = vld [vmem:[%s10660_s16 + $0x21] sm:$0xff]  ;;  %v10672_v36 = vld [vmem:[%s10660_s16 + $0x31] sm:$0xff] }
  0x35   : > { %9357 = vmatprep.subr.bf16.mxu0 %v9356_v8  ;;  %9958 = vmatprep.subr.bf16.mxu1 %v9356_v8  ;;  %v466_v34 = vld [vmem:[#allocation3 + $0x28] sm:$0xff]  ;;  %v467_v38 = vld [vmem:[#allocation3 + $0x30] sm:$0xff]  ;;  %v468_v39 = vld [vmem:[#allocation3 + $0x38] sm:$0xff] }
  0x36   : > { %v9388_v37 = vpack.c.bf16 %v466_v34, %v465_v33  ;;  %v10677_v40 = vld [vmem:[%s10660_s16 + $0x39] sm:$0xff]  ;;  %v10680_v41 = vld [vmem:[%s10660_s16 + $0x49] sm:$0xff]  ;;  %v9392_v42 = vpack.c.bf16 %v468_v39, %v467_v38  ;;  %v10685_v45 = vld [vmem:[%s10660_s16 + $0x51] sm:$0xff] }
  0x37   : > { %v469_v43 = vld [vmem:[#allocation3 + $0x40] sm:$0xff]  ;;  %v470_v44 = vld [vmem:[#allocation3 + $0x48] sm:$0xff]  ;;  %v10688_v46 = vld [vmem:[%s10660_s16 + $0x61] sm:$0xff] }
  0x38   : > { %9359 = vmatpush3.bf16.msra.mxu0 %v9356_v8  ;;  %9966 = vmatpush3.bf16.msra.mxu1 %v9356_v8  ;;  %v9396_v47 = vpack.c.bf16 %v470_v44, %v469_v43  ;;  %v471_v48 = vld [vmem:[#allocation3 + $0x50] sm:$0xff]  ;;  %v472_v49 = vld [vmem:[#allocation3 + $0x58] sm:$0xff]  ;;  %v473_v53 = vld [vmem:[#allocation3 + $0x60] sm:$0xff] }
  0x39   : > { %9361 = vmatprep.subr.bf16.mxu0 %v9360_v12  ;;  %9959 = vmatprep.subr.bf16.mxu1 %v9360_v12  ;;  %v10693_v50 = vld [vmem:[%s10660_s16 + $0x69] sm:$0xff]  ;;  %v10696_v51 = vld [vmem:[%s10660_s16 + $0x79] sm:$0xff]  ;;  %v9400_v52 = vpack.c.bf16 %v472_v49, %v471_v48  ;;  %v10701_v55 = vld [vmem:[%s10660_s16 + $0x81] sm:$0xff] }
  0x3a   : > { %v474_v54 = vld [vmem:[#allocation3 + $0x68] sm:$0xff]  ;;  %v475_v58 = vld [vmem:[#allocation3 + $0x70] sm:$0xff]  ;;  %v476_v59 = vld [vmem:[#allocation3 + $0x78] sm:$0xff] }
  0x3b   : > { %v10704_v56 = vld [vmem:[%s10660_s16 + $0x91] sm:$0xff]  ;;  %v9404_v57 = vpack.c.bf16 %v474_v54, %v473_v53  ;;  %v10709_v60 = vld [vmem:[%s10660_s16 + $0x99] sm:$0xff]  ;;  %v10712_v61 = vld [vmem:[%s10660_s16 + $0xa9] sm:$0xff]  ;;  %v9408_v62 = vpack.c.bf16 %v476_v59, %v475_v58 }
  0x3c   : > { %9363 = vmatpush3.bf16.msra.mxu0 %v9360_v12  ;;  %9967 = vmatpush3.bf16.msra.mxu1 %v9360_v12  ;;  %v1009_v63 = vld [vmem:[#allocation3 + $0x100] sm:$0xff]  ;;  %v1010_v0 = vld [vmem:[#allocation3 + $0x108] sm:$0xff]  ;;  %v429_v2 = vld [vmem:[%s10660_s16] sm:$0xff] }
  0x3d   : > { %9365 = vmatprep.subr.bf16.mxu0 %v9364_v15  ;;  %9960 = vmatprep.subr.bf16.mxu1 %v9364_v15  ;;  %v10717_v1 = vld [vmem:[%s10660_s16 + $0xb1] sm:$0xff]  ;;  %v9412_v3 = vpack.c.bf16 %v1010_v0, %v1009_v63  ;;  %v1011_v4 = vld [vmem:[#allocation3 + $0x110] sm:$0xff]  ;;  %v1012_v5 = vld [vmem:[#allocation3 + $0x118] sm:$0xff] }
  0x3e   : > { %v430_v6 = vld [vmem:[%s10660_s16 + $0x8] sm:$0xff]  ;;  %v10723_v7 = vld [vmem:[%s10660_s16 + $0x18] sm:$0xff]  ;;  %v9416_v8 = vpack.c.bf16 %v1012_v5, %v1011_v4  ;;  %v1013_v9 = vld [vmem:[#allocation3 + $0x120] sm:$0xff] }
  0x3f   : > { %v1014_v10 = vld [vmem:[#allocation3 + $0x128] sm:$0xff]  ;;  %v10727_v11 = vld [vmem:[%s10660_s16 + $0x20] sm:$0xff]  ;;  %v10730_v12 = vld [vmem:[%s10660_s16 + $0x30] sm:$0xff] }
  0x40   : > { %9367 = vmatpush3.bf16.msra.mxu0 %v9364_v15  ;;  %9968 = vmatpush3.bf16.msra.mxu1 %v9364_v15  ;;  %v9420_v13 = vpack.c.bf16 %v1014_v10, %v1013_v9  ;;  %v1015_v14 = vld [vmem:[#allocation3 + $0x130] sm:$0xff]  ;;  %v1016_v15 = vld [vmem:[#allocation3 + $0x138] sm:$0xff]  ;;  %v10735_v16 = vld [vmem:[%s10660_s16 + $0x38] sm:$0xff] }
  0x41   : > { %9369 = vmatprep.subr.bf16.mxu0 %v9368_v18  ;;  %9961 = vmatprep.subr.bf16.mxu1 %v9368_v18  ;;  %v10738_v17 = vld [vmem:[%s10660_s16 + $0x48] sm:$0xff]  ;;  %v1017_v19 = vld [vmem:[#allocation3 + $0x140] sm:$0xff]  ;;  %v1018_v20 = vld [vmem:[#allocation3 + $0x148] sm:$0xff] }
  0x42   : > { %v10746_v22 = vld [vmem:[%s10660_s16 + $0x60] sm:$0xff]  ;;  %v9428_v23 = vpack.c.bf16 %v1018_v20, %v1017_v19  ;;  %v1020_v25 = vld [vmem:[#allocation3 + $0x158] sm:$0xff]  ;;  %v1021_v29 = vld [vmem:[#allocation3 + $0x160] sm:$0xff] }
  0x43   : > { %v10751_v26 = vld [vmem:[%s10660_s16 + $0x68] sm:$0xff]  ;;  %v10762_v33 = vld [vmem:[%s10660_s16 + $0x90] sm:$0xff]  ;;  %v10767_v39 = vld [vmem:[%s10660_s16 + $0x98] sm:$0xff] }
  0x44   : > { %9371 = vmatpush3.bf16.msra.mxu0 %v9368_v18  ;;  %9969 = vmatpush3.bf16.msra.mxu1 %v9368_v18  ;;  %v9424_v18 = vpack.c.bf16 %v1016_v15, %v1015_v14  ;;  %v1024_v38 = vld [vmem:[#allocation3 + $0x178] sm:$0xff]  ;;  %v1316_v44 = vld [vmem:[#allocation3 + $0x180] sm:$0xff]  ;;  %v10778_v49 = vld [vmem:[%s10660_s16 + $0xc0] sm:$0xff] }
  0x45   : > { %9373 = vmatprep.subr.bf16.mxu0 %v9372_v21  ;;  %9962 = vmatprep.subr.bf16.mxu1 %v9372_v21  ;;  %v10775_v48 = vld [vmem:[%s10660_s16 + $0xb0] sm:$0xff]  ;;  %v10783_v53 = vld [vmem:[%s10660_s16 + $0xc8] sm:$0xff]  ;;  %v10786_v54 = vld [vmem:[%s10660_s16 + $0xd8] sm:$0xff] }
  0x46   : > { %v10794_v58 = vld [vmem:[%s10660_s16 + $0xf0] sm:$0xff]  ;;  %v10799_v59 = vld [vmem:[%s10660_s16 + $0xf8] sm:$0xff]  ;;  %v10810_v0 = vld [vmem:[%s10660_s16 + $0x120] sm:$0xff] }
  0x47   : > { %v10807_v63 = vld [vmem:[%s10660_s16 + $0x110] sm:$0xff]  ;;  %v10823_v4 = vld [vmem:[%s10660_s16 + $0x140] sm:$0xff]  ;;  %v1319_v14 = vld [vmem:[#allocation3 + $0x198] sm:$0xff] }
  0x48   : > { %9375 = vmatpush3.bf16.msra.mxu0 %v9372_v21  ;;  %9970 = vmatpush3.bf16.msra.mxu1 %v9372_v21  ;;  %v10743_v21 = vld [vmem:[%s10660_s16 + $0x50] sm:$0xff]  ;;  %v976_v10 = vld [vmem:[%s10660_s16 + $0x2] sm:$0xff] }
  0x49   : > { %9377 = vmatprep.subr.bf16.mxu0 %v9376_v24  ;;  %9963 = vmatprep.subr.bf16.mxu1 %v9376_v24  ;;  %v10826_v5 = vld [vmem:[%s10660_s16 + $0x150] sm:$0xff] }
  0x4a   : > { %v10839_v9 = vld [vmem:[%s10660_s16 + $0x170] sm:$0xff] }
  0x4b   : > { %v977_v15 = vld [vmem:[%s10660_s16 + $0xa] sm:$0xff] }
  0x4c   : > { %9379 = vmatpush3.bf16.msra.mxu0 %v9376_v24  ;;  %9971 = vmatpush3.bf16.msra.mxu1 %v9376_v24  ;;  %v1019_v24 = vld [vmem:[#allocation3 + $0x150] sm:$0xff]  ;;  %v1320_v20 = vld [vmem:[#allocation3 + $0x1a0] sm:$0xff] }
  0x4d   : > { %9381 = vmatprep.subr.bf16.mxu0 %v9380_v27  ;;  %v9432_v28 = vpack.c.bf16 %v1020_v25, %v1019_v24  ;;  %v10849_v24 = vld [vmem:[%s10660_s16 + $0x22] sm:$0xff]  ;;  %v10852_v25 = vld [vmem:[%s10660_s16 + $0x32] sm:$0xff] }
  0x4e   : > { %12738 = vst [vmem:[#allocation7_spill] sm:$0xff] %v10849_v24  ;;  %12739 = vst [vmem:[#allocation8_spill] sm:$0xff] %v10852_v25 }
  0x4f   : > { %7861 = vmatmul.mubr.f32.vlgmr.msra.gmra.mrb[0].mxu0 %v478_v30  ;;  %v1022_v30 = vld [vmem:[#allocation3 + $0x168] sm:$0xff] }
  0x50   : > { %9383 = vmatpush3.bf16.msra.mxu0 %v9380_v27  ;;  %7863 = vmatprep.mubr.f32.mxu0 %v10665_v31  ;;  %v10754_v27 = vld [vmem:[%s10660_s16 + $0x78] sm:$0xff]  ;;  %v9436_v34 = vpack.c.bf16 %v1022_v30, %v1021_v29  ;;  %v1322_v29 = vld [vmem:[#allocation3 + $0x1b0] sm:$0xff]  ;;  %v1323_v30 = vld [vmem:[#allocation3 + $0x1b8] sm:$0xff] }
  0x51   : > { %9385 = vmatprep.subr.bf16.mxu0 %v9384_v32 }
  0x53   : > { %7864 = vmatmul.mubr.f32.gmra.mrb[2].mxu0 %v10669_v35 }
  0x54   : > { %9387 = vmatpush3.bf16.msra.mxu0 %v9384_v32  ;;  %7866 = vmatprep.mubr.f32.mxu0 %v10672_v36  ;;  %v10759_v32 = vld [vmem:[%s10660_s16 + $0x80] sm:$0xff] }
  0x55   : > { %9389 = vmatprep.subr.bf16.mxu0 %v9388_v37 }
  0x57   : > { %7867 = vmatmul.mubr.f32.gmra.mrb[4].mxu0 %v10677_v40 }
  0x58   : > { %9391 = vmatpush3.bf16.msra.mxu0 %v9388_v37  ;;  %7869 = vmatprep.mubr.f32.mxu0 %v10680_v41  ;;  %v1023_v37 = vld [vmem:[#allocation3 + $0x170] sm:$0xff] }
  0x59   : > { %9393 = vmatprep.subr.bf16.mxu0 %v9392_v42  ;;  %v9440_v43 = vpack.c.bf16 %v1024_v38, %v1023_v37  ;;  %v10860_v37 = vld [vmem:[%s10660_s16 + $0x4a] sm:$0xff]  ;;  %v9456_v38 = vpack.c.bf16 %v1323_v30, %v1322_v29  ;;  %v10881_v29 = vld [vmem:[%s10660_s16 + $0x82] sm:$0xff]  ;;  %v10884_v30 = vld [vmem:[%s10660_s16 + $0x92] sm:$0xff] }
  0x5a   : > { %12741 = vst [vmem:[#allocation10_spill] sm:$0xff] %v10860_v37  ;;  %12746 = vst [vmem:[#allocation15_spill] sm:$0xff] %v10881_v29 }
  0x5b   : > { %7870 = vmatmul.mubr.f32.gmra.mrb[6].mxu0 %v10685_v45  ;;  %12747 = vst [vmem:[#allocation16_spill] sm:$0xff] %v10884_v30 }
  0x5c   : > { %9395 = vmatpush3.bf16.msra.mxu0 %v9392_v42  ;;  %7872 = vmatprep.mubr.f32.mxu0 %v10688_v46  ;;  %v10770_v42 = vld [vmem:[%s10660_s16 + $0xa8] sm:$0xff] }
  0x5d   : > { %9397 = vmatprep.subr.bf16.mxu0 %v9396_v47 }
  0x5f   : > { %7873 = vmatmul.mubr.f32.gmra.mrb[8].mxu0 %v10693_v50 }
  0x60   : > { %9399 = vmatpush3.bf16.msra.mxu0 %v9396_v47  ;;  %7875 = vmatprep.mubr.f32.mxu0 %v10696_v51  ;;  %v1317_v47 = vld [vmem:[#allocation3 + $0x188] sm:$0xff] }
  0x61   : > { %9401 = vmatprep.subr.bf16.mxu0 %v9400_v52 }
  0x63   : > { %7876 = vmatmul.mubr.f32.gmra.mrb[10].mxu0 %v10701_v55 }
  0x64   : > { %9403 = vmatpush3.bf16.msra.mxu0 %v9400_v52  ;;  %7878 = vmatprep.mubr.f32.mxu0 %v10704_v56  ;;  %v9444_v52 = vpack.c.bf16 %v1317_v47, %v1316_v44  ;;  %v1325_v44 = vld [vmem:[#allocation3 + $0x1c8] sm:$0xff] }
  0x65   : > { %9405 = vmatprep.subr.bf16.mxu0 %v9404_v57  ;;  %v10865_v47 = vld [vmem:[%s10660_s16 + $0x52] sm:$0xff] }
  0x66   : > { %12742 = vst [vmem:[#allocation11_spill] sm:$0xff] %v10865_v47 }
  0x67   : > { %7879 = vmatmul.mubr.f32.gmra.mrb[12].mxu0 %v10709_v60 }
  0x68   : > { %9407 = vmatpush3.bf16.msra.mxu0 %v9404_v57  ;;  %7881 = vmatprep.mubr.f32.mxu0 %v10712_v61  ;;  %v10791_v57 = vld [vmem:[%s10660_s16 + $0xe0] sm:$0xff] }
  0x69   : > { %9409 = vmatprep.subr.bf16.mxu0 %v9408_v62 }
  0x6b   : > { %7882 = vmatmul.mubr.f32.gmra.mrb[14].mxu0 %v10717_v1 }
  0x6c   : > { %9411 = vmatpush3.bf16.msra.mxu0 %v9408_v62  ;;  %7940 = vmatprep.mubr.f32.mxu0 %v429_v2  ;;  %v10802_v62 = vld [vmem:[%s10660_s16 + $0x108] sm:$0xff] }
  0x6d   : > { %9413 = vmatprep.subr.bf16.mxu0 %v9412_v3  ;;  %v10815_v2 = vld [vmem:[%s10660_s16 + $0x128] sm:$0xff] }
  0x6f   : > { %7941 = vmatmul.mubr.f32.vlgmr.msra.gmra.mrb[0].mxu0 %v430_v6  ;;  %v10831_v6 = vld [vmem:[%s10660_s16 + $0x158] sm:$0xff] }
  0x70   : > { %9415 = vmatpush3.bf16.msra.mxu0 %v9412_v3  ;;  %7943 = vmatprep.mubr.f32.mxu0 %v10723_v7  ;;  %v10818_v3 = vld [vmem:[%s10660_s16 + $0x138] sm:$0xff] }
  0x71   : > { %9417 = vmatprep.subr.bf16.mxu0 %v9416_v8 }
  0x73   : > { %7944 = vmatmul.mubr.f32.gmra.mrb[2].mxu0 %v10727_v11 }
  0x74   : > { %7946 = vmatprep.mubr.f32.mxu0 %v10730_v12  ;;  %9419 = vmatpush3.bf16.msra.mxu0 %v9416_v8  ;;  %v10834_v8 = vld [vmem:[%s10660_s16 + $0x168] sm:$0xff] }
  0x75   : > { %9421 = vmatprep.subr.bf16.mxu0 %v9420_v13 }
  0x77   : > { %7947 = vmatmul.mubr.f32.gmra.mrb[4].mxu0 %v10735_v16 }
  0x78   : > { %7949 = vmatprep.mubr.f32.mxu0 %v10738_v17  ;;  %9423 = vmatpush3.bf16.msra.mxu0 %v9420_v13  ;;  %v1318_v13 = vld [vmem:[#allocation3 + $0x190] sm:$0xff] }
  0x79   : > { %9425 = vmatprep.subr.bf16.mxu0 %v9424_v18  ;;  %v9448_v19 = vpack.c.bf16 %v1319_v14, %v1318_v13  ;;  %v1326_v13 = vld [vmem:[#allocation3 + $0x1d0] sm:$0xff]  ;;  %v1327_v14 = vld [vmem:[#allocation3 + $0x1d8] sm:$0xff] }
  0x7b   : > { %7950 = vmatmul.mubr.f32.gmra.mrb[6].mxu0 %v10743_v21 }
  0x7c   : > { %7952 = vmatprep.mubr.f32.mxu0 %v10746_v22  ;;  %9427 = vmatpush3.bf16.msra.mxu0 %v9424_v18  ;;  %v10845_v18 = vld [vmem:[%s10660_s16 + $0x1a] sm:$0xff] }
  0x7d   : > { %9429 = vmatprep.subr.bf16.mxu0 %v9428_v23  ;;  %12737 = vst [vmem:[#allocation6_spill] sm:$0xff] %v10845_v18 }
  0x7f   : > { %7953 = vmatmul.mubr.f32.gmra.mrb[8].mxu0 %v10751_v26 }
  0x80   : > { %7955 = vmatprep.mubr.f32.mxu0 %v10754_v27  ;;  %9431 = vmatpush3.bf16.msra.mxu0 %v9428_v23  ;;  %v1321_v23 = vld [vmem:[#allocation3 + $0x1a8] sm:$0xff] }
  0x81   : > { %9433 = vmatprep.subr.bf16.mxu0 %v9432_v28 }
  0x83   : > { %7956 = vmatmul.mubr.f32.gmra.mrb[10].mxu0 %v10759_v32 }
  0x84   : > { %7958 = vmatprep.mubr.f32.mxu0 %v10762_v33  ;;  %9435 = vmatpush3.bf16.msra.mxu0 %v9432_v28  ;;  %v9452_v28 = vpack.c.bf16 %v1321_v23, %v1320_v20  ;;  %v9464_v20 = vpack.c.bf16 %v1327_v14, %v1326_v13  ;;  %v1328_v23 = vld [vmem:[#allocation3 + $0x1e0] sm:$0xff]  ;;  %v10889_v13 = vld [vmem:[%s10660_s16 + $0x9a] sm:$0xff] }
  0x85   : > { %9437 = vmatprep.subr.bf16.mxu0 %v9436_v34  ;;  %12748 = vst [vmem:[#allocation17_spill] sm:$0xff] %v10889_v13  ;;  %v10892_v14 = vld [vmem:[%s10660_s16 + $0xaa] sm:$0xff] }
  0x86   : > { %12749 = vst [vmem:[#allocation18_spill] sm:$0xff] %v10892_v14 }
  0x87   : > { %7959 = vmatmul.mubr.f32.gmra.mrb[12].mxu0 %v10767_v39 }
  0x88   : > { %7961 = vmatprep.mubr.f32.mxu0 %v10770_v42  ;;  %9439 = vmatpush3.bf16.msra.mxu0 %v9436_v34  ;;  %v10857_v34 = vld [vmem:[%s10660_s16 + $0x3a] sm:$0xff] }
  0x89   : > { %9441 = vmatprep.subr.bf16.mxu0 %v9440_v43  ;;  %12740 = vst [vmem:[#allocation9_spill] sm:$0xff] %v10857_v34 }
  0x8b   : > { %7962 = vmatmul.mubr.f32.gmra.mrb[14].mxu0 %v10775_v48 }
  0x8c   : > { %7964 = vmatprep.mubr.f32.mxu0 %v10778_v49  ;;  %9443 = vmatpush3.bf16.msra.mxu0 %v9440_v43  ;;  %v1324_v43 = vld [vmem:[#allocation3 + $0x1c0] sm:$0xff] }
  0x8d   : > { %9445 = vmatprep.subr.bf16.mxu0 %v9444_v52 }
  0x8f   : > { %7965 = vmatmul.mubr.f32.gmra.mrb[16].mxu0 %v10783_v53 }
  0x90   : > { %7967 = vmatprep.mubr.f32.mxu0 %v10786_v54 }
  0x93   : > { %7968 = vmatmul.mubr.f32.gmra.mrb[18].mxu0 %v10791_v57 }
  0x94   : > { %7970 = vmatprep.mubr.f32.mxu0 %v10794_v58 }
  0x97   : > { %7971 = vmatmul.mubr.f32.gmra.mrb[20].mxu0 %v10799_v59 }
  0x98   : > { %7973 = vmatprep.mubr.f32.mxu0 %v10802_v62 }
  0x9b   : > { %7974 = vmatmul.mubr.f32.gmra.mrb[22].mxu0 %v10807_v63 }
  0x9c   : > { %7976 = vmatprep.mubr.f32.mxu0 %v10810_v0 }
  0x9f   : > { %7977 = vmatmul.mubr.f32.gmra.mrb[24].mxu0 %v10815_v2 }
  0xa0   : > { %7979 = vmatprep.mubr.f32.mxu0 %v10818_v3 }
  0xa3   : > { %7980 = vmatmul.mubr.f32.gmra.mrb[26].mxu0 %v10823_v4 }
  0xa4   : > { %7982 = vmatprep.mubr.f32.mxu0 %v10826_v5 }
  0xa7   : > { %7983 = vmatmul.mubr.f32.gmra.mrb[28].mxu0 %v10831_v6 }
  0xa8   : > { %7985 = vmatprep.mubr.f32.mxu0 %v10834_v8 }
  0xab   : > { %7986 = vmatmul.mubr.f32.gmra.mrb[30].mxu0 %v10839_v9 }
  0xac   : > { %8020 = vmatprep.mubr.f32.mxu0 %v976_v10  ;;  %v9460_v10 = vpack.c.bf16 %v1325_v44, %v1324_v43  ;;  %v1330_v43 = vld [vmem:[#allocation3 + $0x1f0] sm:$0xff]  ;;  %v1331_v44 = vld [vmem:[#allocation3 + $0x1f8] sm:$0xff] }
  0xaf   : > { %8021 = vmatmul.mubr.f32.vlgmr.msra.gmra.mrb[0].mxu0 %v977_v15  ;;  %v10873_v15 = vld [vmem:[%s10660_s16 + $0x6a] sm:$0xff] }
  0xb0   : > { %9447 = vmatpush3.bf16.msra.mxu0 %v9444_v52  ;;  %8023 = vmatprep.mubr.f32.mxu0 %v10845_v18  ;;  %v10868_v52 = vld [vmem:[%s10660_s16 + $0x62] sm:$0xff]  ;;  %12744 = vst [vmem:[#allocation13_spill] sm:$0xff] %v10873_v15 }
  0xb1   : > { %9449 = vmatprep.subr.bf16.mxu0 %v9448_v19  ;;  %12743 = vst [vmem:[#allocation12_spill] sm:$0xff] %v10868_v52  ;;  %v11011_v18 = vld [vmem:[%s10660_s16 + $0x169] sm:$0xff] }
  0xb2   : > { %12768 = vst [vmem:[#allocation37_spill] sm:$0xff] %v11011_v18 }
  0xb3   : > { %8024 = vmatmul.mubr.f32.gmra.mrb[2].mxu0 %v10849_v24  ;;  %v11006_v24 = vld [vmem:[%s10660_s16 + $0x159] sm:$0xff] }
  0xb4   : > { %8026 = vmatprep.mubr.f32.mxu0 %v10852_v25  ;;  %9451 = vmatpush3.bf16.msra.mxu0 %v9448_v19  ;;  %v10876_v19 = vld [vmem:[%s10660_s16 + $0x7a] sm:$0xff]  ;;  %v11003_v25 = vld [vmem:[%s10660_s16 + $0x152] sm:$0xff]  ;;  %12767 = vst [vmem:[#allocation36_spill] sm:$0xff] %v11006_v24 }
  0xb5   : > { %9453 = vmatprep.subr.bf16.mxu0 %v9452_v28  ;;  %12745 = vst [vmem:[#allocation14_spill] sm:$0xff] %v10876_v19  ;;  %12766 = vst [vmem:[#allocation35_spill] sm:$0xff] %v11003_v25 }
  0xb7   : > { %8027 = vmatmul.mubr.f32.gmra.mrb[4].mxu0 %v10857_v34  ;;  %v10990_v34 = vld [vmem:[%s10660_s16 + $0x141] sm:$0xff] }
  0xb8   : > { %8029 = vmatprep.mubr.f32.mxu0 %v10860_v37  ;;  %9455 = vmatpush3.bf16.msra.mxu0 %v9452_v28  ;;  %v1329_v28 = vld [vmem:[#allocation3 + $0x1e8] sm:$0xff]  ;;  %12763 = vst [vmem:[#allocation32_spill] sm:$0xff] %v10990_v34 }
  0xb9   : > { %9457 = vmatprep.subr.bf16.mxu0 %v9456_v38  ;;  %v10987_v37 = vld [vmem:[%s10660_s16 + $0x13a] sm:$0xff] }
  0xba   : > { %12762 = vst [vmem:[#allocation31_spill] sm:$0xff] %v10987_v37 }
  0xbb   : > { %8030 = vmatmul.mubr.f32.gmra.mrb[6].mxu0 %v10865_v47  ;;  %v10974_v47 = vld [vmem:[%s10660_s16 + $0x129] sm:$0xff] }
  0xbc   : > { %8032 = vmatprep.mubr.f32.mxu0 %v10868_v52  ;;  %9459 = vmatpush3.bf16.msra.mxu0 %v9456_v38  ;;  %v9468_v38 = vpack.c.bf16 %v1329_v28, %v1328_v23  ;;  %v10897_v23 = vld [vmem:[%s10660_s16 + $0xb2] sm:$0xff]  ;;  %v10900_v28 = vld [vmem:[%s10660_s16 + $0xc1] sm:$0xff] }
  0xbd   : > { %9461 = vmatprep.subr.bf16.mxu0 %v9460_v10  ;;  %12750 = vst [vmem:[#allocation19_spill] sm:$0xff] %v10897_v23  ;;  %7884 = vmatprep.mubr.f32.mxu1 %v10900_v28  ;;  %v10971_v52 = vld [vmem:[%s10660_s16 + $0x122] sm:$0xff] }
  0xbe   : > { %12759 = vst [vmem:[#allocation28_spill] sm:$0xff] %v10971_v52 }
  0xbf   : > { %8033 = vmatmul.mubr.f32.gmra.mrb[8].mxu0 %v10873_v15  ;;  %v1623_v15 = vld [vmem:[#allocation3 + $0x208] sm:$0xff] }
  0xc0   : > { %8035 = vmatprep.mubr.f32.mxu0 %v10876_v19  ;;  %9463 = vmatpush3.bf16.msra.mxu0 %v9460_v10  ;;  %v9472_v10 = vpack.c.bf16 %v1331_v44, %v1330_v43  ;;  %v1622_v19 = vld [vmem:[#allocation3 + $0x200] sm:$0xff] }
  0xc1   : > { %9465 = vmatprep.subr.bf16.mxu0 %v9464_v20  ;;  %v10905_v43 = vpack.c.bf16 %v1623_v15, %v1622_v19  ;;  %v10908_v44 = vld [vmem:[%s10660_s16 + $0xc9] sm:$0xff]  ;;  %v10921_v15 = vld [vmem:[%s10660_s16 + $0xda] sm:$0xff] }
  0xc2   : > { %7885 = vmatmul.mubr.f32.vlgmr.msra.gmra.mrb[0].mxu1 %v10908_v44  ;;  %12753 = vst [vmem:[#allocation22_spill] sm:$0xff] %v10921_v15  ;;  %v10925_v19 = vld [vmem:[%s10660_s16 + $0xe1] sm:$0xff] }
  0xc3   : > { %8036 = vmatmul.mubr.f32.gmra.mrb[10].mxu0 %v10881_v29  ;;  %v10958_v29 = vld [vmem:[%s10660_s16 + $0x111] sm:$0xff] }
  0xc4   : > { %8038 = vmatprep.mubr.f32.mxu0 %v10884_v30  ;;  %9467 = vmatpush3.bf16.msra.mxu0 %v9464_v20  ;;  %v10903_v20 = vld [vmem:[%s10660_s16 + $0xc2] sm:$0xff]  ;;  %v10955_v30 = vld [vmem:[%s10660_s16 + $0x10a] sm:$0xff] }
  0xc5   : > { %9469 = vmatprep.subr.bf16.mxu0 %v9468_v38  ;;  %12751 = vst [vmem:[#allocation20_spill] sm:$0xff] %v10903_v20  ;;  %12757 = vst [vmem:[#allocation26_spill] sm:$0xff] %v10955_v30 }
  0xc7   : > { %8039 = vmatmul.mubr.f32.gmra.mrb[12].mxu0 %v10889_v13  ;;  %v10942_v13 = vld [vmem:[%s10660_s16 + $0xf9] sm:$0xff] }
  0xc8   : > { %8041 = vmatprep.mubr.f32.mxu0 %v10892_v14  ;;  %9471 = vmatpush3.bf16.msra.mxu0 %v9468_v38  ;;  %v10915_v38 = vld [vmem:[%s10660_s16 + $0xca] sm:$0xff]  ;;  %v10918_v14 = vld [vmem:[%s10660_s16 + $0xd9] sm:$0xff] }
  0xc9   : > { %9473 = vmatprep.subr.bf16.mxu0 %v9472_v10  ;;  %12752 = vst [vmem:[#allocation21_spill] sm:$0xff] %v10915_v38  ;;  %7887 = vmatprep.mubr.f32.mxu1 %v10918_v14 }
  0xca   : > { %7888 = vmatmul.mubr.f32.gmra.mrb[2].mxu1 %v10925_v19 }
  0xcb   : > { %8042 = vmatmul.mubr.f32.gmra.mrb[14].mxu0 %v10897_v23  ;;  %v10939_v23 = vld [vmem:[%s10660_s16 + $0xf2] sm:$0xff] }
  0xcc   : > { %8044 = vmatprep.mubr.f32.mxu0 %v10903_v20  ;;  %9475 = vmatpush3.bf16.msra.mxu0 %v9472_v10  ;;  %v10931_v20 = vld [vmem:[%s10660_s16 + $0xf1] sm:$0xff]  ;;  %v10935_v10 = vld [vmem:[%s10660_s16 + $0xe2] sm:$0xff]  ;;  %12755 = vst [vmem:[#allocation24_spill] sm:$0xff] %v10939_v23 }
  0xcd   : > { %9477 = vmatprep.subr.bf16.mxu0 %v10905_v43  ;;  %12754 = vst [vmem:[#allocation23_spill] sm:$0xff] %v10935_v10  ;;  %7890 = vmatprep.mubr.f32.mxu1 %v10931_v20 }
  0xce   : > { %7891 = vmatmul.mubr.f32.gmra.mrb[4].mxu1 %v10942_v13 }
  0xcf   : > { %8045 = vmatmul.mubr.f32.gmra.mrb[16].mxu0 %v10915_v38  ;;  %v10947_v38 = vld [vmem:[%s10660_s16 + $0x109] sm:$0xff] }
  0xd0   : > { %8047 = vmatprep.mubr.f32.mxu0 %v10921_v15  ;;  %v10951_v15 = vld [vmem:[%s10660_s16 + $0xfa] sm:$0xff]  ;;  %7893 = vmatprep.mubr.f32.mxu1 %v10947_v38 }
  0xd1   : > { %12756 = vst [vmem:[#allocation25_spill] sm:$0xff] %v10951_v15 }
  0xd2   : > { %7894 = vmatmul.mubr.f32.gmra.mrb[6].mxu1 %v10958_v29 }
  0xd3   : > { %8048 = vmatmul.mubr.f32.gmra.mrb[18].mxu0 %v10935_v10  ;;  %v10963_v10 = vld [vmem:[%s10660_s16 + $0x121] sm:$0xff] }
  0xd4   : > { %8050 = vmatprep.mubr.f32.mxu0 %v10939_v23  ;;  %v10967_v23 = vld [vmem:[%s10660_s16 + $0x112] sm:$0xff]  ;;  %7896 = vmatprep.mubr.f32.mxu1 %v10963_v10 }
  0xd5   : > { %12758 = vst [vmem:[#allocation27_spill] sm:$0xff] %v10967_v23 }
  0xd6   : > { %7897 = vmatmul.mubr.f32.gmra.mrb[8].mxu1 %v10974_v47 }
  0xd7   : > { %8051 = vmatmul.mubr.f32.gmra.mrb[20].mxu0 %v10951_v15  ;;  %v10979_v15 = vld [vmem:[%s10660_s16 + $0x139] sm:$0xff] }
  0xd8   : > { %8053 = vmatprep.mubr.f32.mxu0 %v10955_v30  ;;  %12760 = vst [vmem:[#allocation29_spill] sm:$0xff] %v10979_v15  ;;  %v10983_v30 = vld [vmem:[%s10660_s16 + $0x12a] sm:$0xff]  ;;  %7899 = vmatprep.mubr.f32.mxu1 %v10979_v15  ;;  %v1627_v15 = vld [vmem:[#allocation3 + $0x228] sm:$0xff] }
  0xd9   : > { %12761 = vst [vmem:[#allocation30_spill] sm:$0xff] %v10983_v30 }
  0xda   : > { %7900 = vmatmul.mubr.f32.gmra.mrb[10].mxu1 %v10990_v34  ;;  %v11022_v34 = vld [vmem:[%s10660_s16 + $0x171] sm:$0xff] }
  0xdb   : > { %8054 = vmatmul.mubr.f32.gmra.mrb[22].mxu0 %v10967_v23  ;;  %v10995_v23 = vld [vmem:[%s10660_s16 + $0x151] sm:$0xff]  ;;  %12771 = vst [vmem:[#allocation40_spill] sm:$0xff] %v11022_v34 }
  0xdc   : > { %8056 = vmatprep.mubr.f32.mxu0 %v10971_v52  ;;  %12764 = vst [vmem:[#allocation33_spill] sm:$0xff] %v10995_v23  ;;  %v10999_v52 = vld [vmem:[%s10660_s16 + $0x142] sm:$0xff]  ;;  %7902 = vmatprep.mubr.f32.mxu1 %v10995_v23 }
  0xdd   : > { %12765 = vst [vmem:[#allocation34_spill] sm:$0xff] %v10999_v52  ;;  %v1625_v23 = vld [vmem:[#allocation3 + $0x218] sm:$0xff] }
  0xde   : > { %7903 = vmatmul.mubr.f32.gmra.mrb[12].mxu1 %v11006_v24  ;;  %v11028_v24 = vld [vmem:[%s10660_s16 + $0x172] sm:$0xff] }
  0xdf   : > { %8057 = vmatmul.mubr.f32.gmra.mrb[24].mxu0 %v10983_v30  ;;  %v11015_v30 = vld [vmem:[%s10660_s16 + $0x15a] sm:$0xff]  ;;  %7905 = vmatprep.mubr.f32.mxu1 %v11011_v18  ;;  %v1626_v18 = vld [vmem:[#allocation3 + $0x220] sm:$0xff] }
  0xe0   : > { %8059 = vmatprep.mubr.f32.mxu0 %v10987_v37  ;;  %12769 = vst [vmem:[#allocation38_spill] sm:$0xff] %v11015_v30  ;;  %v11019_v37 = vld [vmem:[%s10660_s16 + $0x16a] sm:$0xff] }
  0xe1   : > { %12770 = vst [vmem:[#allocation39_spill] sm:$0xff] %v11019_v37 }
  0xe2   : > { %7906 = vmatmul.mubr.f32.gmra.mrb[14].mxu1 %v11022_v34  ;;  %v1629_v34 = vld [vmem:[#allocation3 + $0x238] sm:$0xff] }
  0xe3   : > { %8060 = vmatmul.mubr.f32.gmra.mrb[26].mxu0 %v10999_v52  ;;  %v1624_v52 = vld [vmem:[#allocation3 + $0x210] sm:$0xff] }
  0xe4   : > { %8062 = vmatprep.mubr.f32.mxu0 %v11003_v25  ;;  %v9480_v25 = vpack.c.bf16 %v1625_v23, %v1624_v52  ;;  %v1630_v52 = vld [vmem:[#allocation3 + $0x240] sm:$0xff]  ;;  %v1631_v23 = vld [vmem:[#allocation3 + $0x248] sm:$0xff] }
  0xe7   : > { %8063 = vmatmul.mubr.f32.gmra.mrb[28].mxu0 %v11015_v30  ;;  %v9484_v30 = vpack.c.bf16 %v1627_v15, %v1626_v18  ;;  %v1633_v18 = vld [vmem:[#allocation3 + $0x258] sm:$0xff]  ;;  %v1634_v15 = vld [vmem:[#allocation3 + $0x260] sm:$0xff] }
  0xe8   : > { %8065 = vmatprep.mubr.f32.mxu0 %v11019_v37  ;;  %v1628_v37 = vld [vmem:[#allocation3 + $0x230] sm:$0xff] }
  0xeb   : > { %8066 = vmatmul.mubr.f32.gmra.mrb[30].mxu0 %v11028_v24 }
  0xec   : > { %8100 = vmatprep.mubr.f32.mxu0 %v10723_v7  ;;  %v9488_v7 = vpack.c.bf16 %v1629_v34, %v1628_v37  ;;  %v1635_v34 = vld [vmem:[#allocation3 + $0x268] sm:$0xff] }
  0xed   : > { %v9500_v37 = vpack.c.bf16 %v1635_v34, %v1634_v15  ;;  %v1930_v15 = vld [vmem:[#allocation3 + $0x290] sm:$0xff]  ;;  %v1931_v34 = vld [vmem:[#allocation3 + $0x298] sm:$0xff] }
  0xef   : > { %8101 = vmatmul.mubr.f32.vlgmr.msra.gmra.mrb[0].mxu0 %v10727_v11  ;;  %v9492_v11 = vpack.c.bf16 %v1631_v23, %v1630_v52  ;;  %v1637_v52 = vld [vmem:[#allocation3 + $0x278] sm:$0xff]  ;;  %v1928_v23 = vld [vmem:[#allocation3 + $0x280] sm:$0xff] }
  0xf0   : > { %9479 = vmatpush3.bf16.msra.mxu0 %v10905_v43  ;;  %8103 = vmatprep.mubr.f32.mxu0 %v10730_v12  ;;  %v1632_v43 = vld [vmem:[#allocation3 + $0x250] sm:$0xff] }
  0xf1   : > { %9481 = vmatprep.subr.bf16.mxu0 %v9480_v25 }
  0xf3   : > { %8104 = vmatmul.mubr.f32.gmra.mrb[2].mxu0 %v10735_v16 }
  0xf4   : > { %8106 = vmatprep.mubr.f32.mxu0 %v10738_v17  ;;  %9483 = vmatpush3.bf16.msra.mxu0 %v9480_v25  ;;  %v9496_v25 = vpack.c.bf16 %v1633_v18, %v1632_v43  ;;  %v1929_v43 = vld [vmem:[#allocation3 + $0x288] sm:$0xff]  ;;  %v11062_v18 = vld [vmem:[%s10660_s16 + $0x180] sm:$0xff] }
  0xf5   : > { %9485 = vmatprep.subr.bf16.mxu0 %v9484_v30 }
  0xf7   : > { %8107 = vmatmul.mubr.f32.gmra.mrb[4].mxu0 %v10743_v21 }
  0xf8   : > { %8109 = vmatprep.mubr.f32.mxu0 %v10746_v22  ;;  %9487 = vmatpush3.bf16.msra.mxu0 %v9484_v30  ;;  %v1636_v30 = vld [vmem:[#allocation3 + $0x270] sm:$0xff] }
  0xf9   : > { %9489 = vmatprep.subr.bf16.mxu0 %v9488_v7 }
  0xfb   : > { %8110 = vmatmul.mubr.f32.gmra.mrb[6].mxu0 %v10751_v26 }
  0xfc   : > { %8112 = vmatprep.mubr.f32.mxu0 %v10754_v27  ;;  %9491 = vmatpush3.bf16.msra.mxu0 %v9488_v7  ;;  %v9504_v7 = vpack.c.bf16 %v1637_v52, %v1636_v30  ;;  %v1932_v30 = vld [vmem:[#allocation3 + $0x2a0] sm:$0xff]  ;;  %v1933_v52 = vld [vmem:[#allocation3 + $0x2a8] sm:$0xff] }
  0xfd   : > { %9493 = vmatprep.subr.bf16.mxu0 %v9492_v11 }
  0xff   : > { %8113 = vmatmul.mubr.f32.gmra.mrb[8].mxu0 %v10759_v32 }
 0x100   : > { %8115 = vmatprep.mubr.f32.mxu0 %v10762_v33  ;;  %9495 = vmatpush3.bf16.msra.mxu0 %v9492_v11  ;;  %v9508_v11 = vpack.c.bf16 %v1929_v43, %v1928_v23  ;;  %v1934_v23 = vld [vmem:[#allocation3 + $0x2b0] sm:$0xff]  ;;  %v1935_v43 = vld [vmem:[#allocation3 + $0x2b8] sm:$0xff] }
 0x101   : > { %9497 = vmatprep.subr.bf16.mxu0 %v9496_v25 }
 0x103   : > { %8116 = vmatmul.mubr.f32.gmra.mrb[10].mxu0 %v10767_v39 }
 0x104   : > { %8118 = vmatprep.mubr.f32.mxu0 %v10770_v42  ;;  %9499 = vmatpush3.bf16.msra.mxu0 %v9496_v25  ;;  %v11067_v25 = vld [vmem:[%s10660_s16 + $0x188] sm:$0xff] }
 0x105   : > { %9501 = vmatprep.subr.bf16.mxu0 %v9500_v37  ;;  %12772 = vst [vmem:[#allocation41_spill] sm:$0xff] %v11067_v25 }
 0x107   : > { %8119 = vmatmul.mubr.f32.gmra.mrb[12].mxu0 %v10775_v48 }
 0x108   : > { %8121 = vmatprep.mubr.f32.mxu0 %v10778_v49  ;;  %9503 = vmatpush3.bf16.msra.mxu0 %v9500_v37  ;;  %v9512_v37 = vpack.c.bf16 %v1931_v34, %v1930_v15  ;;  %v1937_v15 = vld [vmem:[#allocation3 + $0x2c8] sm:$0xff] }
 0x109   : > { %9505 = vmatprep.subr.bf16.mxu0 %v9504_v7  ;;  %v1941_v34 = vld [vmem:[#allocation3 + $0x2e8] sm:$0xff] }
 0x10b   : > { %8122 = vmatmul.mubr.f32.gmra.mrb[14].mxu0 %v10783_v53 }
 0x10c   : > { %8124 = vmatprep.mubr.f32.mxu0 %v10786_v54  ;;  %9507 = vmatpush3.bf16.msra.mxu0 %v9504_v7  ;;  %v9516_v7 = vpack.c.bf16 %v1933_v52, %v1932_v30  ;;  %v12777_v30 = vld [vmem:[#allocation37_spill] sm:$0xff] }
 0x10d   : > { %9509 = vmatprep.subr.bf16.mxu0 %v9508_v11  ;;  %v11100_v52 = vld [vmem:[%s10660_s16 + $0x181] sm:$0xff] }
 0x10f   : > { %8125 = vmatmul.mubr.f32.gmra.mrb[16].mxu0 %v10791_v57 }
 0x110   : > { %8127 = vmatprep.mubr.f32.mxu0 %v10794_v58 }
 0x113   : > { %8128 = vmatmul.mubr.f32.gmra.mrb[18].mxu0 %v10799_v59 }
 0x114   : > { %8130 = vmatprep.mubr.f32.mxu0 %v10802_v62 }
 0x117   : > { %8131 = vmatmul.mubr.f32.gmra.mrb[20].mxu0 %v10807_v63 }
 0x118   : > { %8133 = vmatprep.mubr.f32.mxu0 %v10810_v0 }
 0x11b   : > { %8134 = vmatmul.mubr.f32.gmra.mrb[22].mxu0 %v10815_v2 }
 0x11c   : > { %8136 = vmatprep.mubr.f32.mxu0 %v10818_v3 }
 0x11f   : > { %8137 = vmatmul.mubr.f32.gmra.mrb[24].mxu0 %v10823_v4 }
 0x120   : > { %8139 = vmatprep.mubr.f32.mxu0 %v10826_v5 }
 0x123   : > { %8140 = vmatmul.mubr.f32.gmra.mrb[26].mxu0 %v10831_v6 }
 0x124   : > { %8142 = vmatprep.mubr.f32.mxu0 %v10834_v8 }
 0x127   : > { %8143 = vmatmul.mubr.f32.gmra.mrb[28].mxu0 %v10839_v9 }
 0x128   : > { %8145 = vmatprep.mubr.f32.mxu0 %v11062_v18 }
 0x12b   : > { %8146 = vmatmul.mubr.f32.gmra.mrb[30].mxu0 %v11067_v25  ;;  %v9520_v25 = vpack.c.bf16 %v1935_v43, %v1934_v23  ;;  %v11105_v23 = vld [vmem:[%s10660_s16 + $0x189] sm:$0xff]  ;;  %v2237_v43 = vld [vmem:[#allocation3 + $0x310] sm:$0xff] }
 0x12c   : > { %8180 = vmatprep.mubr.f32.mxu0 %v10665_v31  ;;  %v1936_v31 = vld [vmem:[#allocation3 + $0x2c0] sm:$0xff] }
 0x12f   : > { %8181 = vmatmul.mubr.f32.vlgmr.msra.gmra.mrb[0].mxu0 %v10669_v35  ;;  %v9524_v35 = vpack.c.bf16 %v1937_v15, %v1936_v31  ;;  %v2238_v31 = vld [vmem:[#allocation3 + $0x318] sm:$0xff]  ;;  %v12779_v15 = vld [vmem:[#allocation6_spill] sm:$0xff] }
 0x130   : > { %9511 = vmatpush3.bf16.msra.mxu0 %v9508_v11  ;;  %8183 = vmatprep.mubr.f32.mxu0 %v10672_v36  ;;  %v1938_v36 = vld [vmem:[#allocation3 + $0x2d0] sm:$0xff]  ;;  %v1939_v11 = vld [vmem:[#allocation3 + $0x2d8] sm:$0xff] }
 0x131   : > { %9513 = vmatprep.subr.bf16.mxu0 %v9512_v37 }
 0x133   : > { %8184 = vmatmul.mubr.f32.gmra.mrb[2].mxu0 %v10677_v40  ;;  %v9528_v40 = vpack.c.bf16 %v1939_v11, %v1938_v36  ;;  %v2239_v36 = vld [vmem:[#allocation3 + $0x320] sm:$0xff]  ;;  %v2240_v11 = vld [vmem:[#allocation3 + $0x328] sm:$0xff] }
 0x134   : > { %8186 = vmatprep.mubr.f32.mxu0 %v10680_v41  ;;  %9515 = vmatpush3.bf16.msra.mxu0 %v9512_v37  ;;  %v1940_v41 = vld [vmem:[#allocation3 + $0x2e0] sm:$0xff]  ;;  %v1943_v37 = vld [vmem:[#allocation3 + $0x2f8] sm:$0xff] }
 0x135   : > { %9517 = vmatprep.subr.bf16.mxu0 %v9516_v7 }
 0x137   : > { %8187 = vmatmul.mubr.f32.gmra.mrb[4].mxu0 %v10685_v45  ;;  %v9532_v45 = vpack.c.bf16 %v1941_v34, %v1940_v41  ;;  %v12781_v41 = vld [vmem:[#allocation8_spill] sm:$0xff]  ;;  %v9548_v34 = vpack.c.bf16 %v2240_v11, %v2239_v36  ;;  %v2246_v36 = vld [vmem:[#allocation3 + $0x358] sm:$0xff] }
 0x138   : > { %8189 = vmatprep.mubr.f32.mxu0 %v10688_v46  ;;  %9519 = vmatpush3.bf16.msra.mxu0 %v9516_v7  ;;  %v1942_v46 = vld [vmem:[#allocation3 + $0x2f0] sm:$0xff]  ;;  %v12786_v11 = vld [vmem:[#allocation13_spill] sm:$0xff] }
 0x139   : > { %9521 = vmatprep.subr.bf16.mxu0 %v9520_v25  ;;  %v12778_v7 = vld [vmem:[#allocation40_spill] sm:$0xff] }
 0x13b   : > { %8190 = vmatmul.mubr.f32.gmra.mrb[6].mxu0 %v10693_v50  ;;  %v9536_v50 = vpack.c.bf16 %v1943_v37, %v1942_v46  ;;  %v2242_v46 = vld [vmem:[#allocation3 + $0x338] sm:$0xff] }
 0x13c   : > { %8192 = vmatprep.mubr.f32.mxu0 %v10696_v51  ;;  %9523 = vmatpush3.bf16.msra.mxu0 %v9520_v25  ;;  %v2235_v51 = vld [vmem:[#allocation3 + $0x300] sm:$0xff]  ;;  %v2236_v25 = vld [vmem:[#allocation3 + $0x308] sm:$0xff]  ;;  %v12782_v37 = vld [vmem:[#allocation9_spill] sm:$0xff] }
 0x13d   : > { %9525 = vmatprep.subr.bf16.mxu0 %v9524_v35 }
 0x13f   : > { %8193 = vmatmul.mubr.f32.gmra.mrb[8].mxu0 %v10701_v55  ;;  %v9540_v55 = vpack.c.bf16 %v2236_v25, %v2235_v51  ;;  %v2243_v25 = vld [vmem:[#allocation3 + $0x340] sm:$0xff] }
 0x140   : > { %8195 = vmatprep.mubr.f32.mxu0 %v10704_v56  ;;  %9527 = vmatpush3.bf16.msra.mxu0 %v9524_v35  ;;  %v12773_v56 = vld [vmem:[#allocation29_spill] sm:$0xff]  ;;  %v9544_v35 = vpack.c.bf16 %v2238_v31, %v2237_v43  ;;  %v2244_v43 = vld [vmem:[#allocation3 + $0x348] sm:$0xff] }
 0x141   : > { %9529 = vmatprep.subr.bf16.mxu0 %v9528_v40  ;;  %v12784_v31 = vld [vmem:[#allocation11_spill] sm:$0xff] }
 0x143   : > { %8196 = vmatmul.mubr.f32.gmra.mrb[10].mxu0 %v10709_v60  ;;  %v12774_v60 = vld [vmem:[#allocation32_spill] sm:$0xff] }
 0x144   : > { %8198 = vmatprep.mubr.f32.mxu0 %v10712_v61  ;;  %9531 = vmatpush3.bf16.msra.mxu0 %v9528_v40  ;;  %v12775_v61 = vld [vmem:[#allocation33_spill] sm:$0xff]  ;;  %v12780_v40 = vld [vmem:[#allocation7_spill] sm:$0xff] }
 0x145   : > { %9533 = vmatprep.subr.bf16.mxu0 %v9532_v45 }
 0x147   : > { %8199 = vmatmul.mubr.f32.gmra.mrb[12].mxu0 %v10717_v1  ;;  %v12776_v1 = vld [vmem:[#allocation36_spill] sm:$0xff] }
 0x148   : > { %8201 = vmatprep.mubr.f32.mxu0 %v10900_v28  ;;  %9535 = vmatpush3.bf16.msra.mxu0 %v9532_v45  ;;  %v2241_v45 = vld [vmem:[#allocation3 + $0x330] sm:$0xff] }
 0x149   : > { %9537 = vmatprep.subr.bf16.mxu0 %v9536_v50  ;;  %v9552_v51 = vpack.c.bf16 %v2242_v46, %v2241_v45  ;;  %v2248_v45 = vld [vmem:[#allocation3 + $0x368] sm:$0xff] }
 0x14a   : > { %v12788_v46 = vld [vmem:[#allocation15_spill] sm:$0xff] }
 0x14b   : > { %8202 = vmatmul.mubr.f32.gmra.mrb[14].mxu0 %v10908_v44 }
 0x14c   : > { %8204 = vmatprep.mubr.f32.mxu0 %v10918_v14  ;;  %9539 = vmatpush3.bf16.msra.mxu0 %v9536_v50  ;;  %v12783_v50 = vld [vmem:[#allocation10_spill] sm:$0xff] }
 0x14d   : > { %9541 = vmatprep.subr.bf16.mxu0 %v9540_v55 }
 0x14f   : > { %8205 = vmatmul.mubr.f32.gmra.mrb[16].mxu0 %v10925_v19 }
 0x150   : > { %8207 = vmatprep.mubr.f32.mxu0 %v10931_v20 }
 0x153   : > { %8208 = vmatmul.mubr.f32.gmra.mrb[18].mxu0 %v10942_v13 }
 0x154   : > { %8210 = vmatprep.mubr.f32.mxu0 %v10947_v38 }
 0x157   : > { %8211 = vmatmul.mubr.f32.gmra.mrb[20].mxu0 %v10958_v29 }
 0x158   : > { %8213 = vmatprep.mubr.f32.mxu0 %v10963_v10 }
 0x15b   : > { %8214 = vmatmul.mubr.f32.gmra.mrb[22].mxu0 %v10974_v47 }
 0x15c   : > { %8216 = vmatprep.mubr.f32.mxu0 %v12773_v56 }
 0x15f   : > { %8217 = vmatmul.mubr.f32.gmra.mrb[24].mxu0 %v12774_v60 }
 0x160   : > { %8219 = vmatprep.mubr.f32.mxu0 %v12775_v61 }
 0x163   : > { %8220 = vmatmul.mubr.f32.gmra.mrb[26].mxu0 %v12776_v1 }
 0x164   : > { %8222 = vmatprep.mubr.f32.mxu0 %v12777_v30 }
 0x167   : > { %8223 = vmatmul.mubr.f32.gmra.mrb[28].mxu0 %v12778_v7 }
 0x168   : > { %8225 = vmatprep.mubr.f32.mxu0 %v11100_v52 }
 0x16b   : > { %8226 = vmatmul.mubr.f32.gmra.mrb[30].mxu0 %v11105_v23 }
 0x16c   : > { %8260 = vmatprep.mubr.f32.mxu0 %v12779_v15  ;;  %v12785_v15 = vld [vmem:[#allocation12_spill] sm:$0xff] }
 0x16f   : > { %8261 = vmatmul.mubr.f32.vlgmr.msra.gmra.mrb[0].mxu0 %v12780_v40  ;;  %v2245_v40 = vld [vmem:[#allocation3 + $0x350] sm:$0xff] }
 0x170   : > { %9543 = vmatpush3.bf16.msra.mxu0 %v9540_v55  ;;  %8263 = vmatprep.mubr.f32.mxu0 %v12781_v41  ;;  %v9556_v55 = vpack.c.bf16 %v2244_v43, %v2243_v25  ;;  %v12787_v41 = vld [vmem:[#allocation14_spill] sm:$0xff]  ;;  %v2250_v25 = vld [vmem:[#allocation3 + $0x378] sm:$0xff] }
 0x171   : > { %9545 = vmatprep.subr.bf16.mxu0 %v9544_v35  ;;  %v12790_v43 = vld [vmem:[#allocation17_spill] sm:$0xff] }
 0x173   : > { %8264 = vmatmul.mubr.f32.gmra.mrb[2].mxu0 %v12782_v37  ;;  %v2247_v37 = vld [vmem:[#allocation3 + $0x360] sm:$0xff] }
 0x174   : > { %8266 = vmatprep.mubr.f32.mxu0 %v12783_v50  ;;  %9547 = vmatpush3.bf16.msra.mxu0 %v9544_v35  ;;  %v9560_v35 = vpack.c.bf16 %v2246_v36, %v2245_v40  ;;  %v12789_v50 = vld [vmem:[#allocation16_spill] sm:$0xff]  ;;  %v2542_v40 = vld [vmem:[#allocation3 + $0x388] sm:$0xff] }
 0x175   : > { %9549 = vmatprep.subr.bf16.mxu0 %v9548_v34  ;;  %v12792_v36 = vld [vmem:[#allocation19_spill] sm:$0xff] }
 0x177   : > { %8267 = vmatmul.mubr.f32.gmra.mrb[4].mxu0 %v12784_v31  ;;  %v2249_v31 = vld [vmem:[#allocation3 + $0x370] sm:$0xff] }
 0x178   : > { %8269 = vmatprep.mubr.f32.mxu0 %v12785_v15  ;;  %9551 = vmatpush3.bf16.msra.mxu0 %v9548_v34  ;;  %v9564_v34 = vpack.c.bf16 %v2248_v45, %v2247_v37  ;;  %v12791_v15 = vld [vmem:[#allocation18_spill] sm:$0xff]  ;;  %v12796_v45 = vld [vmem:[#allocation23_spill] sm:$0xff] }
 0x179   : > { %9553 = vmatprep.subr.bf16.mxu0 %v9552_v51  ;;  %v12795_v37 = vld [vmem:[#allocation22_spill] sm:$0xff] }
 0x17b   : > { %8270 = vmatmul.mubr.f32.gmra.mrb[6].mxu0 %v12786_v11  ;;  %v2541_v11 = vld [vmem:[#allocation3 + $0x380] sm:$0xff] }
 0x17c   : > { %8272 = vmatprep.mubr.f32.mxu0 %v12787_v41  ;;  %9555 = vmatpush3.bf16.msra.mxu0 %v9552_v51  ;;  %v9568_v51 = vpack.c.bf16 %v2250_v25, %v2249_v31  ;;  %v12793_v41 = vld [vmem:[#allocation20_spill] sm:$0xff]  ;;  %v12799_v31 = vld [vmem:[#allocation26_spill] sm:$0xff]  ;;  %v12800_v25 = vld [vmem:[#allocation27_spill] sm:$0xff] }
 0x17d   : > { %9557 = vmatprep.subr.bf16.mxu0 %v9556_v55 }
 0x17f   : > { %8273 = vmatmul.mubr.f32.gmra.mrb[8].mxu0 %v12788_v46  ;;  %v12794_v46 = vld [vmem:[#allocation21_spill] sm:$0xff] }
 0x180   : > { %8275 = vmatprep.mubr.f32.mxu0 %v12789_v50  ;;  %9559 = vmatpush3.bf16.msra.mxu0 %v9556_v55  ;;  %v9572_v55 = vpack.c.bf16 %v2542_v40, %v2541_v11  ;;  %v12798_v50 = vld [vmem:[#allocation25_spill] sm:$0xff]  ;;  %v12804_v11 = vld [vmem:[#allocation34_spill] sm:$0xff] }
 0x181   : > { %9561 = vmatprep.subr.bf16.mxu0 %v9560_v35  ;;  %v12806_v40 = vld [vmem:[#allocation38_spill] sm:$0xff] }
 0x183   : > { %8276 = vmatmul.mubr.f32.gmra.mrb[10].mxu0 %v12790_v43  ;;  %v12802_v43 = vld [vmem:[#allocation30_spill] sm:$0xff] }
 0x184   : > { %8278 = vmatprep.mubr.f32.mxu0 %v12791_v15  ;;  %9563 = vmatpush3.bf16.msra.mxu0 %v9560_v35  ;;  %v12797_v35 = vld [vmem:[#allocation24_spill] sm:$0xff]  ;;  %v12803_v15 = vld [vmem:[#allocation31_spill] sm:$0xff] }
 0x185   : > { %9565 = vmatprep.subr.bf16.mxu0 %v9564_v34 }
 0x187   : > { %8279 = vmatmul.mubr.f32.gmra.mrb[12].mxu0 %v12792_v36  ;;  %v12807_v36 = vld [vmem:[#allocation39_spill] sm:$0xff] }
 0x188   : > { %8281 = vmatprep.mubr.f32.mxu0 %v12793_v41  ;;  %9567 = vmatpush3.bf16.msra.mxu0 %v9564_v34  ;;  %v12801_v34 = vld [vmem:[#allocation28_spill] sm:$0xff] }
 0x189   : > { %9569 = vmatprep.subr.bf16.mxu0 %v9568_v51  ;;  %v11138_v41 = vld [vmem:[%s10660_s16 + $0x182] sm:$0xff] }
 0x18b   : > { %8282 = vmatmul.mubr.f32.gmra.mrb[14].mxu0 %v12794_v46  ;;  %v11143_v46 = vld [vmem:[%s10660_s16 + $0x18a] sm:$0xff] }
 0x18c   : > { %8284 = vmatprep.mubr.f32.mxu0 %v12795_v37  ;;  %9571 = vmatpush3.bf16.msra.mxu0 %v9568_v51  ;;  %v12805_v51 = vld [vmem:[#allocation35_spill] sm:$0xff]  ;;  %v2543_v37 = vld [vmem:[#allocation3 + $0x390] sm:$0xff] }
 0x18d   : > { %9573 = vmatprep.subr.bf16.mxu0 %v9572_v55 }
 0x18f   : > { %8285 = vmatmul.mubr.f32.gmra.mrb[16].mxu0 %v12796_v45  ;;  %v2544_v45 = vld [vmem:[#allocation3 + $0x398] sm:$0xff] }
 0x190   : > { %8287 = vmatprep.mubr.f32.mxu0 %v12797_v35  ;;  %v9576_v35 = vpack.c.bf16 %v2544_v45, %v2543_v37  ;;  %v6686_v37 = vld [vmem:[%s10660_s16 + $0x51] sm:$0xff]  ;;  %v6687_v45 = vld [vmem:[%s10660_s16 + $0x61] sm:$0xff] }
 0x193   : > { %8288 = vmatmul.mubr.f32.gmra.mrb[18].mxu0 %v12798_v50  ;;  %v2545_v50 = vld [vmem:[#allocation3 + $0x3a0] sm:$0xff] }
 0x194   : > { %8290 = vmatprep.mubr.f32.mxu0 %v12799_v31  ;;  %v2546_v31 = vld [vmem:[#allocation3 + $0x3a8] sm:$0xff] }
 0x197   : > { %8291 = vmatmul.mubr.f32.gmra.mrb[20].mxu0 %v12800_v25  ;;  %v2547_v25 = vld [vmem:[#allocation3 + $0x3b0] sm:$0xff] }
 0x198   : > { %8293 = vmatprep.mubr.f32.mxu0 %v12801_v34  ;;  %v2548_v34 = vld [vmem:[#allocation3 + $0x3b8] sm:$0xff] }
 0x19b   : > { %8294 = vmatmul.mubr.f32.gmra.mrb[22].mxu0 %v12802_v43  ;;  %v9584_v43 = vpack.c.bf16 %v2548_v34, %v2547_v25  ;;  %v6755_v25 = vld [vmem:[%s12650_s4 + $0xb0] sm:$0xff]  ;;  %v6756_v34 = vld [vmem:[%s12650_s4 + $0xb8] sm:$0xff] }
 0x19c   : > { %8296 = vmatprep.mubr.f32.mxu0 %v12803_v15  ;;  %v2550_v15 = vld [vmem:[#allocation3 + $0x3c8] sm:$0xff] }
 0x19f   : > { %8297 = vmatmul.mubr.f32.gmra.mrb[24].mxu0 %v12804_v11  ;;  %v2554_v11 = vld [vmem:[#allocation3 + $0x3e8] sm:$0xff] }
 0x1a0   : > { %8299 = vmatprep.mubr.f32.mxu0 %v12805_v51  ;;  %v2556_v51 = vld [vmem:[#allocation3 + $0x3f8] sm:$0xff] }
 0x1a3   : > { %8300 = vmatmul.mubr.f32.gmra.mrb[26].mxu0 %v12806_v40  ;;  %v2848_v40 = vld [vmem:[#allocation3 + $0x408] sm:$0xff] }
 0x1a4   : > { %8302 = vmatprep.mubr.f32.mxu0 %v12807_v36  ;;  %v6754_v36 = vld [vmem:[%s12650_s4 + $0xa8] sm:$0xff] }
 0x1a7   : > { %8303 = vmatmul.mubr.f32.gmra.mrb[28].mxu0 %v11028_v24  ;;  %v9580_v24 = vpack.c.bf16 %v2546_v31, %v2545_v50  ;;  %v2853_v50 = vld [vmem:[#allocation3 + $0x430] sm:$0xff] }
 0x1a8   : > { %8305 = vmatprep.mubr.f32.mxu0 %v11138_v41 }
 0x1ab   : > { %8306 = vmatmul.mubr.f32.gmra.mrb[30].mxu0 %v11143_v46 }
 0x1ac   : > { %8340 = vmatprep.mubr.f32.mxu0 %v10730_v12  ;;  %v2549_v12 = vld [vmem:[#allocation3 + $0x3c0] sm:$0xff] }
 0x1af   : > { %8341 = vmatmul.mubr.f32.vlgmr.msra.gmra.mrb[0].mxu0 %v10735_v16  ;;  %v9588_v16 = vpack.c.bf16 %v2550_v15, %v2549_v12  ;;  %v6689_v12 = vld [vmem:[%s10660_s16 + $0x79] sm:$0xff] }
 0x1b0   : > { %9575 = vmatpush3.bf16.msra.mxu0 %v9572_v55  ;;  %8343 = vmatprep.mubr.f32.mxu0 %v10738_v17  ;;  %v2551_v17 = vld [vmem:[#allocation3 + $0x3d0] sm:$0xff]  ;;  %v2552_v55 = vld [vmem:[#allocation3 + $0x3d8] sm:$0xff] }
 0x1b1   : > { %9577 = vmatprep.subr.bf16.mxu0 %v9576_v35 }
 0x1b3   : > { %8344 = vmatmul.mubr.f32.gmra.mrb[2].mxu0 %v10743_v21  ;;  %v9592_v21 = vpack.c.bf16 %v2552_v55, %v2551_v17  ;;  %v9648_v17 = vpack.c.bf16 %v6756_v34, %v6755_v25  ;;  %v2856_v55 = vld [vmem:[#allocation3 + $0x448] sm:$0xff]  ;;  %v6763_v34 = vld [vmem:[%s12650_s4 + $0xf0] sm:$0xff] }
 0x1b4   : > { %8346 = vmatprep.mubr.f32.mxu0 %v10746_v22  ;;  %9579 = vmatpush3.bf16.msra.mxu0 %v9576_v35  ;;  %v2553_v22 = vld [vmem:[#allocation3 + $0x3e0] sm:$0xff] }
 0x1b5   : > { %9581 = vmatprep.subr.bf16.mxu0 %v9580_v24 }
 0x1b7   : > { %8347 = vmatmul.mubr.f32.gmra.mrb[4].mxu0 %v10751_v26  ;;  %v9596_v26 = vpack.c.bf16 %v2554_v11, %v2553_v22  ;;  %v6758_v22 = vld [vmem:[%s12650_s4 + $0xc8] sm:$0xff] }
 0x1b8   : > { %8349 = vmatprep.mubr.f32.mxu0 %v10754_v27  ;;  %9583 = vmatpush3.bf16.msra.mxu0 %v9580_v24  ;;  %v2555_v27 = vld [vmem:[#allocation3 + $0x3f0] sm:$0xff]  ;;  %v2854_v24 = vld [vmem:[#allocation3 + $0x438] sm:$0xff] }
 0x1b9   : > { %9585 = vmatprep.subr.bf16.mxu0 %v9584_v43  ;;  %v9616_v15 = vpack.c.bf16 %v2854_v24, %v2853_v50  ;;  %v6690_v11 = vld [vmem:[%s10660_s16 + $0x81] sm:$0xff]  ;;  %v6759_v50 = vld [vmem:[%s12650_s4 + $0xd0] sm:$0xff] }
 0x1bb   : > { %8350 = vmatmul.mubr.f32.gmra.mrb[6].mxu0 %v10759_v32  ;;  %v9600_v32 = vpack.c.bf16 %v2556_v51, %v2555_v27 }
 0x1bc   : > { %8352 = vmatprep.mubr.f32.mxu0 %v10762_v33  ;;  %9587 = vmatpush3.bf16.msra.mxu0 %v9584_v43  ;;  %v2847_v33 = vld [vmem:[#allocation3 + $0x400] sm:$0xff] }
 0x1bd   : > { %9589 = vmatprep.subr.bf16.mxu0 %v9588_v16  ;;  %v6688_v43 = vld [vmem:[%s10660_s16 + $0x69] sm:$0xff] }
 0x1bf   : > { %8353 = vmatmul.mubr.f32.gmra.mrb[8].mxu0 %v10767_v39  ;;  %v11161_v39 = vpack.c.bf16 %v2848_v40, %v2847_v33  ;;  %v2858_v33 = vld [vmem:[#allocation3 + $0x458] sm:$0xff]  ;;  %v6692_v40 = vld [vmem:[%s10660_s16 + $0x99] sm:$0xff] }
 0x1c0   : > { %8355 = vmatprep.mubr.f32.mxu0 %v10770_v42  ;;  %9591 = vmatpush3.bf16.msra.mxu0 %v9588_v16  ;;  %v6681_v42 = vld [vmem:[%s10660_s16 + $0x198] sm:$0xff]  ;;  %v2855_v16 = vld [vmem:[#allocation3 + $0x440] sm:$0xff] }
 0x1c1   : > { %9593 = vmatprep.subr.bf16.mxu0 %v9592_v21  ;;  %v9620_v27 = vpack.c.bf16 %v2856_v55, %v2855_v16  ;;  %v3296_v55 = vld [vmem:[%s12650_s4 + $0x8] sm:$0xff] }
 0x1c3   : > { %8356 = vmatmul.mubr.f32.gmra.mrb[10].mxu0 %v10775_v48  ;;  %v12808_v48 = vld [vmem:[#allocation41_spill] sm:$0xff] }
 0x1c4   : > { %8358 = vmatprep.mubr.f32.mxu0 %v10778_v49  ;;  %9595 = vmatpush3.bf16.msra.mxu0 %v9592_v21  ;;  %v6682_v49 = vld [vmem:[%s10660_s16 + $0x1a0] sm:$0xff] }
 0x1c5   : > { %9597 = vmatprep.subr.bf16.mxu0 %v9596_v26  ;;  %v6757_v21 = vld [vmem:[%s12650_s4 + $0xc0] sm:$0xff] }
 0x1c6   : > { %v9652_v51 = vpack.c.bf16 %v6758_v22, %v6757_v21  ;;  %v3297_v22 = vld [vmem:[%s12650_s4 + $0x10] sm:$0xff] }
 0x1c7   : > { %8359 = vmatmul.mubr.f32.gmra.mrb[12].mxu0 %v10783_v53  ;;  %v6683_v53 = vld [vmem:[%s10660_s16 + $0x31] sm:$0xff] }
 0x1c8   : > { %8361 = vmatprep.mubr.f32.mxu0 %v10786_v54  ;;  %9599 = vmatpush3.bf16.msra.mxu0 %v9596_v26  ;;  %v11182_v54 = vld [vmem:[#allocation3 + $0x410] sm:$0xff]  ;;  %v6691_v26 = vld [vmem:[%s10660_s16 + $0x91] sm:$0xff] }
 0x1c9   : > { %9601 = vmatprep.subr.bf16.mxu0 %v9600_v32 }
 0x1cb   : > { %8362 = vmatmul.mubr.f32.gmra.mrb[14].mxu0 %v10791_v57  ;;  %v11184_v57 = vld [vmem:[#allocation3 + $0x418] sm:$0xff] }
 0x1cc   : > { %8364 = vmatprep.mubr.f32.mxu0 %v10794_v58  ;;  %9603 = vmatpush3.bf16.msra.mxu0 %v9600_v32  ;;  %v6749_v58 = vld [vmem:[%s12650_s4 + $0x80] sm:$0xff] }
 0x1cd   : > { %9605 = vmatprep.subr.bf16.mxu0 %v11161_v39  ;;  %v2857_v32 = vld [vmem:[#allocation3 + $0x450] sm:$0xff] }
 0x1cf   : > { %8365 = vmatmul.mubr.f32.gmra.mrb[16].mxu0 %v10799_v59  ;;  %v6750_v59 = vld [vmem:[%s12650_s4 + $0x88] sm:$0xff] }
 0x1d0   : > { %8367 = vmatprep.mubr.f32.mxu0 %v10802_v62  ;;  %v11195_v62 = vld [vmem:[%s12650_s4 + $0x90] sm:$0xff] }
 0x1d3   : > { %8368 = vmatmul.mubr.f32.gmra.mrb[18].mxu0 %v10807_v63  ;;  %v11198_v63 = vld [vmem:[%s10660_s16 + $0x39] sm:$0xff] }
 0x1d4   : > { %8370 = vmatprep.mubr.f32.mxu0 %v10810_v0  ;;  %v11200_v0 = vpack.c.bf16 %v6750_v59, %v6749_v58  ;;  %v2862_v58 = vld [vmem:[#allocation3 + $0x478] sm:$0xff] }
 0x1d6   : > { %9637 = vmatprep.subr.bf16.mxu1 %v11200_v0 }
 0x1d7   : > { %8371 = vmatmul.mubr.f32.gmra.mrb[20].mxu0 %v10815_v2  ;;  %v6752_v2 = vld [vmem:[%s12650_s4 + $0x98] sm:$0xff]  ;;  %9639 = vmatpush3.bf16.msra.mxu1 %v11200_v0  ;;  %v6733_v0 = vld [vmem:[%s10660_s16 + $0x10a] sm:$0xff] }
 0x1d8   : > { %8373 = vmatprep.mubr.f32.mxu0 %v10818_v3  ;;  %v10551_v3 = vmov 0.0  }
 0x1d9   : > { %379 = vst [vmem:[#allocation2 + $0x20] sm:$0xff] %v10551_v3  ;;  %380 = vst [vmem:[#allocation2 + $0x28] sm:$0x3] %v10551_v3 }
 0x1da   : > { %375 = vst [vmem:[#allocation2] sm:$0xff] %v10551_v3  ;;  %376 = vst [vmem:[#allocation2 + $0x8] sm:$0xff] %v10551_v3 }
 0x1db   : > { %8374 = vmatmul.mubr.f32.gmra.mrb[22].mxu0 %v10823_v4  ;;  %377 = vst [vmem:[#allocation2 + $0x10] sm:$0x3] %v10551_v3  ;;  %378 = vst [vmem:[#allocation2 + $0x18] sm:$0xff] %v10551_v3  ;;  %v6685_v4 = vld [vmem:[%s10660_s16 + $0x49] sm:$0xff] }
 0x1dc   : > { %8376 = vmatprep.mubr.f32.mxu0 %v10826_v5  ;;  %381 = vst [vmem:[#allocation2 + $0x30] sm:$0xff] %v10551_v3  ;;  %382 = vst [vmem:[#allocation2 + $0x38] sm:$0xff] %v10551_v3  ;;  %v9608_v5 = vpack.c.bf16 %v11184_v57, %v11182_v54  ;;  %v2861_v57 = vld [vmem:[#allocation3 + $0x470] sm:$0xff] }
 0x1dd   : > { %383 = vst [vmem:[#allocation2 + $0x40] sm:$0x3] %v10551_v3  ;;  %384 = vst [vmem:[#allocation2 + $0x48] sm:$0xff] %v10551_v3  ;;  %v9632_v59 = vpack.c.bf16 %v2862_v58, %v2861_v57  ;;  %v3301_v57 = vld [vmem:[%s12650_s4 + $0x30] sm:$0xff]  ;;  %v3302_v58 = vld [vmem:[%s12650_s4 + $0x38] sm:$0xff] }
 0x1de   : > { %385 = vst [vmem:[#allocation2 + $0x50] sm:$0xff] %v10551_v3  ;;  %386 = vst [vmem:[#allocation2 + $0x58] sm:$0x3] %v10551_v3 }
 0x1df   : > { %8377 = vmatmul.mubr.f32.gmra.mrb[24].mxu0 %v10831_v6  ;;  %387 = vst [vmem:[#allocation2 + $0x60] sm:$0xff] %v10551_v3  ;;  %388 = vst [vmem:[#allocation2 + $0x68] sm:$0xff] %v10551_v3  ;;  %v2851_v6 = vld [vmem:[#allocation3 + $0x420] sm:$0xff] }
 0x1e0   : > { %8379 = vmatprep.mubr.f32.mxu0 %v10834_v8  ;;  %389 = vst [vmem:[#allocation2 + $0x70] sm:$0x3] %v10551_v3  ;;  %390 = vst [vmem:[#allocation2 + $0x78] sm:$0xff] %v10551_v3  ;;  %v9640_v8 = vpack.c.bf16 %v6752_v2, %v11195_v62  ;;  %v6731_v62 = vld [vmem:[%s10660_s16 + $0xf2] sm:$0xff] }
 0x1e1   : > { %391 = vst [vmem:[#allocation2 + $0x80] sm:$0xff] %v10551_v3  ;;  %392 = vst [vmem:[#allocation2 + $0x88] sm:$0x3] %v10551_v3  ;;  %v6734_v2 = vld [vmem:[%s10660_s16 + $0x112] sm:$0xff] }
 0x1e2   : > { %393 = vst [vmem:[#allocation2 + $0x90] sm:$0xff] %v10551_v3  ;;  %394 = vst [vmem:[#allocation2 + $0x98] sm:$0xff] %v10551_v3  ;;  %9641 = vmatprep.subr.bf16.mxu1 %v9640_v8  ;;  %v3312_v16 = vld [vmem:[#allocation2 + $0x9] sm:$0xff] }
 0x1e3   : > { %8380 = vmatmul.mubr.f32.gmra.mrb[26].mxu0 %v10839_v9  ;;  %395 = vst [vmem:[#allocation2 + $0xa0] sm:$0x3] %v10551_v3  ;;  %396 = vst [vmem:[#allocation2 + $0xa8] sm:$0xff] %v10551_v3  ;;  %v2852_v9 = vld [vmem:[#allocation3 + $0x428] sm:$0xff]  ;;  %9643 = vmatpush3.bf16.msra.mxu1 %v9640_v8  ;;  %v6738_v8 = vld [vmem:[%s10660_s16 + $0x142] sm:$0xff] }
 0x1e4   : > { %8382 = vmatprep.mubr.f32.mxu0 %v11062_v18  ;;  %397 = vst [vmem:[#allocation2 + $0xb0] sm:$0xff] %v10551_v3  ;;  %398 = vst [vmem:[#allocation2 + $0xb8] sm:$0x3] %v10551_v3  ;;  %v6753_v18 = vld [vmem:[%s12650_s4 + $0xa0] sm:$0xff]  ;;  %v9612_v35 = vpack.c.bf16 %v2852_v9, %v2851_v6  ;;  %v6739_v9 = vld [vmem:[%s10660_s16 + $0x152] sm:$0xff] }
 0x1e5   : > { %399 = vst [vmem:[#allocation2 + $0xc0] sm:$0xff] %v10551_v3  ;;  %400 = vst [vmem:[#allocation2 + $0xc8] sm:$0xff] %v10551_v3  ;;  %v9644_v31 = vpack.c.bf16 %v6754_v36, %v6753_v18  ;;  %v6737_v6 = vld [vmem:[%s10660_s16 + $0x13a] sm:$0xff]  ;;  %v6741_v36 = vld [vmem:[%s10660_s16 + $0x16a] sm:$0xff] }
 0x1e6   : > { %401 = vst [vmem:[#allocation2 + $0xd0] sm:$0x3] %v10551_v3  ;;  %402 = vst [vmem:[#allocation2 + $0xd8] sm:$0xff] %v10551_v3  ;;  %v6740_v18 = vld [vmem:[%s10660_s16 + $0x15a] sm:$0xff] }
 0x1e7   : > { %8383 = vmatmul.mubr.f32.gmra.mrb[28].mxu0 %v12808_v48  ;;  %403 = vst [vmem:[#allocation2 + $0xe0] sm:$0xff] %v10551_v3  ;;  %404 = vst [vmem:[#allocation2 + $0xe8] sm:$0x3] %v10551_v3  ;;  %9645 = vmatprep.subr.bf16.mxu1 %v9644_v31  ;;  %v2859_v48 = vld [vmem:[#allocation3 + $0x460] sm:$0xff] }
 0x1e8   : > { %8385 = vmatprep.mubr.f32.mxu0 %v6681_v42  ;;  %405 = vst [vmem:[#allocation2 + $0xf0] sm:$0xff] %v10551_v3  ;;  %406 = vst [vmem:[#allocation2 + $0xf8] sm:$0xff] %v10551_v3  ;;  %9647 = vmatpush3.bf16.msra.mxu1 %v9644_v31  ;;  %v9624_v42 = vpack.c.bf16 %v2858_v33, %v2857_v32  ;;  %v6760_v31 = vld [vmem:[%s12650_s4 + $0xd8] sm:$0xff]  ;;  %v3299_v33 = vld [vmem:[%s12650_s4 + $0x20] sm:$0xff] }
 0x1e9   : > { %407 = vst [vmem:[#allocation2 + $0x100] sm:$0x3] %v10551_v3  ;;  %408 = vst [vmem:[#allocation2 + $0x108] sm:$0xff] %v10551_v3  ;;  %9649 = vmatprep.subr.bf16.mxu1 %v9648_v17  ;;  %v9656_v24 = vpack.c.bf16 %v6760_v31, %v6759_v50 }
 0x1ea   : > { %409 = vst [vmem:[#allocation2 + $0x110] sm:$0xff] %v10551_v3  ;;  %410 = vst [vmem:[#allocation2 + $0x118] sm:$0x3] %v10551_v3 }
 0x1eb   : > { %8386 = vmatmul.mubr.f32.gmra.mrb[30].mxu0 %v6682_v49  ;;  %411 = vst [vmem:[#allocation2 + $0x120] sm:$0xff] %v10551_v3  ;;  %412 = vst [vmem:[#allocation2 + $0x128] sm:$0xff] %v10551_v3  ;;  %v2860_v49 = vld [vmem:[#allocation3 + $0x468] sm:$0xff] }
 0x1ec   : > { %8420 = vmatprep.mubr.f32.mxu0 %v6683_v53  ;;  %413 = vst [vmem:[#allocation2 + $0x130] sm:$0x3] %v10551_v3  ;;  %414 = vst [vmem:[#allocation2 + $0x138] sm:$0xff] %v10551_v3  ;;  %9651 = vmatpush3.bf16.msra.mxu1 %v9648_v17  ;;  %v6694_v53 = vld [vmem:[%s10660_s16 + $0xb1] sm:$0xff]  ;;  %v9628_v54 = vpack.c.bf16 %v2860_v49, %v2859_v48  ;;  %v3295_v17 = vld [vmem:[%s12650_s4] sm:$0xff] }
 0x1ed   : > { %415 = vst [vmem:[#allocation2 + $0x140] sm:$0xff] %v10551_v3  ;;  %416 = vst [vmem:[#allocation2 + $0x148] sm:$0x3] %v10551_v3  ;;  %9653 = vmatprep.subr.bf16.mxu1 %v9652_v51  ;;  %v9668_v21 = vpack.c.bf16 %v3296_v55, %v3295_v17 }
 0x1ee   : > { %417 = vst [vmem:[#allocation2 + $0x150] sm:$0xff] %v10551_v3  ;;  %418 = vst [vmem:[#allocation2 + $0x158] sm:$0xff] %v10551_v3 }
 0x1ef   : > { %419 = vst [vmem:[#allocation2 + $0x160] sm:$0x3] %v10551_v3  ;;  %420 = vst [vmem:[#allocation2 + $0x168] sm:$0xff] %v10551_v3  ;;  %8421 = vmatmul.mubr.f32.vlgmr.msra.gmra.mrb[0].mxu0 %v11198_v63  ;;  %v6732_v63 = vld [vmem:[%s10660_s16 + $0xfa] sm:$0xff] }
 0x1f0   : > { %421 = vst [vmem:[#allocation2 + $0x170] sm:$0xff] %v10551_v3  ;;  %422 = vst [vmem:[#allocation2 + $0x178] sm:$0x3] %v10551_v3  ;;  %9607 = vmatpush3.bf16.msra.mxu0 %v11161_v39  ;;  %8423 = vmatprep.mubr.f32.mxu0 %v6685_v4  ;;  %v6693_v39 = vld [vmem:[%s10660_s16 + $0xa9] sm:$0xff] }
 0x1f1   : > { %423 = vst [vmem:[#allocation2 + $0x180] sm:$0xff] %v10551_v3  ;;  %424 = vst [vmem:[#allocation2 + $0x188] sm:$0xff] %v10551_v3  ;;  %9609 = vmatprep.subr.bf16.mxu0 %v9608_v5  ;;  %9655 = vmatpush3.bf16.msra.mxu1 %v9652_v51  ;;  %v6735_v4 = vld [vmem:[%s10660_s16 + $0x122] sm:$0xff] }
 0x1f2   : > { %425 = vst [vmem:[#allocation2 + $0x190] sm:$0x3] %v10551_v3  ;;  %426 = vst [vmem:[#allocation2 + $0x198] sm:$0xff] %v10551_v3  ;;  %9657 = vmatprep.subr.bf16.mxu1 %v9656_v24 }
 0x1f3   : > { %427 = vst [vmem:[#allocation2 + $0x1a0] sm:$0xff] %v10551_v3  ;;  %428 = vst [vmem:[#allocation2 + $0x1a8] sm:$0x3] %v10551_v3  ;;  %8424 = vmatmul.mubr.f32.gmra.mrb[2].mxu0 %v6686_v37  ;;  %v6742_v37 = vld [vmem:[%s10660_s16 + $0x172] sm:$0xff] }
 0x1f4   : > { %8426 = vmatprep.mubr.f32.mxu0 %v6687_v45  ;;  %9611 = vmatpush3.bf16.msra.mxu0 %v9608_v5  ;;  %v6736_v5 = vld [vmem:[%s10660_s16 + $0x12a] sm:$0xff]  ;;  %v6745_v45 = vld [vmem:[%s10660_s16 + $0x19a] sm:$0xff] }
 0x1f5   : > { %9613 = vmatprep.subr.bf16.mxu0 %v9612_v35  ;;  %9659 = vmatpush3.bf16.msra.mxu1 %v9656_v24 }
 0x1f7   : > { %8427 = vmatmul.mubr.f32.gmra.mrb[4].mxu0 %v6688_v43  ;;  %v6764_v43 = vld [vmem:[%s12650_s4 + $0xf8] sm:$0xff] }
 0x1f8   : > { %8429 = vmatprep.mubr.f32.mxu0 %v6689_v12  ;;  %9615 = vmatpush3.bf16.msra.mxu0 %v9612_v35  ;;  %v6746_v35 = vld [vmem:[%s10660_s16 + $0x1a2] sm:$0xff]  ;;  %v9664_v12 = vpack.c.bf16 %v6764_v43, %v6763_v34 }
 0x1f9   : > { %9617 = vmatprep.subr.bf16.mxu0 %v9616_v15 }
 0x1fb   : > { %8430 = vmatmul.mubr.f32.gmra.mrb[6].mxu0 %v6690_v11  ;;  %v3298_v11 = vld [vmem:[%s12650_s4 + $0x18] sm:$0xff] }
 0x1fc   : > { %8432 = vmatprep.mubr.f32.mxu0 %v6691_v26  ;;  %9619 = vmatpush3.bf16.msra.mxu0 %v9616_v15  ;;  %v3311_v15 = vld [vmem:[#allocation2 + $0x1] sm:$0xff]  ;;  %v9672_v26 = vpack.c.bf16 %v3298_v11, %v3297_v22 }
 0x1fd   : > { %9621 = vmatprep.subr.bf16.mxu0 %v9620_v27  ;;  %8580 = vmatprep.mubr.f32.mxu1 %v3311_v15 }
 0x1ff   : > { %8433 = vmatmul.mubr.f32.gmra.mrb[8].mxu0 %v6692_v40  ;;  %v3300_v40 = vld [vmem:[%s12650_s4 + $0x28] sm:$0xff] }
 0x200   : > { %8435 = vmatprep.mubr.f32.mxu0 %v6693_v39  ;;  %9623 = vmatpush3.bf16.msra.mxu0 %v9620_v27  ;;  %v11376_v27 = vpop.f32.mrb[0].mxu1 }
 0x201   : > { %9625 = vmatprep.subr.bf16.mxu0 %v9624_v42  ;;  %v11378_v51 = vpop.f32.mrb[1].mxu1 }
 0x202   : > { %v11380_v32 = vpop.f32.mrb[2].mxu1 }
 0x203   : > { %8436 = vmatmul.mubr.f32.gmra.mrb[10].mxu0 %v6694_v53  ;;  %v11388_v39 = vpop.f32.mrb[3].mxu1 }
 0x204   : > { %8438 = vmatprep.mubr.f32.mxu0 %v10900_v28  ;;  %9627 = vmatpush3.bf16.msra.mxu0 %v9624_v42  ;;  %v6717_v28 = vld [vmem:[%s10660_s16 + $0x4a] sm:$0xff]  ;;  %v9676_v42 = vpack.c.bf16 %v3300_v40, %v3299_v33  ;;  %v11390_v48 = vpop.f32.mrb[4].mxu1 }
 0x205   : > { %9629 = vmatprep.subr.bf16.mxu0 %v9628_v54  ;;  %v11392_v49 = vpop.f32.mrb[5].mxu1 }
 0x206   : > { %v11394_v53 = vpop.f32.mrb[6].mxu1 }
 0x207   : > { %8439 = vmatmul.mubr.f32.gmra.mrb[12].mxu0 %v10908_v44  ;;  %v6719_v44 = vld [vmem:[%s10660_s16 + $0x62] sm:$0xff] }
 0x208   : > { %8441 = vmatprep.mubr.f32.mxu0 %v10918_v14  ;;  %9631 = vmatpush3.bf16.msra.mxu0 %v9628_v54  ;;  %v6716_v14 = vld [vmem:[%s10660_s16 + $0x3a] sm:$0xff]  ;;  %v11396_v54 = vpop.f32.mrb[7].mxu1 }
 0x209   : > { %9633 = vmatprep.subr.bf16.mxu0 %v9632_v59 }
 0x20b   : > { %8442 = vmatmul.mubr.f32.gmra.mrb[14].mxu0 %v10925_v19  ;;  %v6721_v19 = vld [vmem:[%s10660_s16 + $0x7a] sm:$0xff] }
 0x20c   : > { %8444 = vmatprep.mubr.f32.mxu0 %v10931_v20  ;;  %9635 = vmatpush3.bf16.msra.mxu0 %v9632_v59  ;;  %v6718_v20 = vld [vmem:[%s10660_s16 + $0x52] sm:$0xff]  ;;  %v9680_v59 = vpack.c.bf16 %v3302_v58, %v3301_v57 }
 0x20f   : > { %8445 = vmatmul.mubr.f32.gmra.mrb[16].mxu0 %v10942_v13  ;;  %v6715_v13 = vld [vmem:[%s10660_s16 + $0x32] sm:$0xff] }
 0x210   : > { %8447 = vmatprep.mubr.f32.mxu0 %v10947_v38  ;;  %v6720_v38 = vld [vmem:[%s10660_s16 + $0x6a] sm:$0xff] }
 0x213   : > { %8448 = vmatmul.mubr.f32.gmra.mrb[18].mxu0 %v10958_v29  ;;  %v6713_v29 = vld [vmem:[%s10660_s16 + $0x199] sm:$0xff] }
 0x214   : > { %8450 = vmatprep.mubr.f32.mxu0 %v10963_v10  ;;  %v6722_v10 = vld [vmem:[%s10660_s16 + $0x82] sm:$0xff] }
 0x217   : > { %8451 = vmatmul.mubr.f32.gmra.mrb[20].mxu0 %v10974_v47  ;;  %v6714_v47 = vld [vmem:[%s10660_s16 + $0x1a1] sm:$0xff] }
 0x218   : > { %8453 = vmatprep.mubr.f32.mxu0 %v12773_v56  ;;  %v6723_v56 = vld [vmem:[%s10660_s16 + $0x92] sm:$0xff] }
 0x21b   : > { %8454 = vmatmul.mubr.f32.gmra.mrb[22].mxu0 %v12774_v60  ;;  %v6724_v60 = vld [vmem:[%s10660_s16 + $0x9a] sm:$0xff] }
 0x21c   : > { %8456 = vmatprep.mubr.f32.mxu0 %v12775_v61  ;;  %v6725_v61 = vld [vmem:[%s10660_s16 + $0xaa] sm:$0xff] }
 0x21f   : > { %8457 = vmatmul.mubr.f32.gmra.mrb[24].mxu0 %v12776_v1  ;;  %v6726_v1 = vld [vmem:[%s10660_s16 + $0xb2] sm:$0xff] }
 0x220   : > { %8459 = vmatprep.mubr.f32.mxu0 %v12777_v30  ;;  %v6727_v30 = vld [vmem:[%s10660_s16 + $0xc2] sm:$0xff] }
 0x223   : > { %8460 = vmatmul.mubr.f32.gmra.mrb[26].mxu0 %v12778_v7  ;;  %v6729_v7 = vld [vmem:[%s10660_s16 + $0xda] sm:$0xff] }
 0x224   : > { %8462 = vmatprep.mubr.f32.mxu0 %v11100_v52  ;;  %v6728_v52 = vld [vmem:[%s10660_s16 + $0xca] sm:$0xff] }
 0x227   : > { %8463 = vmatmul.mubr.f32.gmra.mrb[28].mxu0 %v11105_v23  ;;  %v6730_v23 = vld [vmem:[%s10660_s16 + $0xe2] sm:$0xff] }
 0x228   : > { %8465 = vmatprep.mubr.f32.mxu0 %v6713_v29  ;;  %v11404_v29 = vpop.f32.mrb[8].mxu1 }
 0x22b   : > { %8466 = vmatmul.mubr.f32.gmra.mrb[30].mxu0 %v6714_v47  ;;  %v11406_v47 = vpop.f32.mrb[9].mxu1 }
 0x22c   : > { %8500 = vmatprep.mubr.f32.mxu0 %v6715_v13  ;;  %v11408_v13 = vpop.f32.mrb[10].mxu1 }
 0x22f   : > { %8501 = vmatmul.mubr.f32.vlgmr.msra.gmra.mrb[0].mxu0 %v6716_v14  ;;  %v3303_v14 = vld [vmem:[%s12650_s4 + $0x40] sm:$0xff] }
 0x230   : > { %8503 = vmatprep.mubr.f32.mxu0 %v6717_v28  ;;  %v3304_v28 = vld [vmem:[%s12650_s4 + $0x48] sm:$0xff] }
 0x233   : > { %8504 = vmatmul.mubr.f32.gmra.mrb[2].mxu0 %v6718_v20  ;;  %v11416_v20 = vpop.f32.mrb[11].mxu1 }
 0x234   : > { %8506 = vmatprep.mubr.f32.mxu0 %v6719_v44  ;;  %v9684_v44 = vpack.c.bf16 %v3304_v28, %v3303_v14 }
 0x237   : > { %8507 = vmatmul.mubr.f32.gmra.mrb[4].mxu0 %v6720_v38  ;;  %v11418_v38 = vpop.f32.mrb[12].mxu1 }
 0x238   : > { %8509 = vmatprep.mubr.f32.mxu0 %v6721_v19  ;;  %v3305_v19 = vld [vmem:[%s12650_s4 + $0x50] sm:$0xff] }
 0x23b   : > { %8510 = vmatmul.mubr.f32.gmra.mrb[6].mxu0 %v6722_v10  ;;  %v3306_v10 = vld [vmem:[%s12650_s4 + $0x58] sm:$0xff] }
 0x23c   : > { %8512 = vmatprep.mubr.f32.mxu0 %v6723_v56  ;;  %v11426_v56 = vpop.f32.mrb[13].mxu1 }
 0x23f   : > { %8513 = vmatmul.mubr.f32.gmra.mrb[8].mxu0 %v6724_v60  ;;  %v9688_v60 = vpack.c.bf16 %v3306_v10, %v3305_v19 }
 0x240   : > { %8515 = vmatprep.mubr.f32.mxu0 %v6725_v61  ;;  %v11428_v61 = vpop.f32.mrb[14].mxu1 }
 0x243   : > { %8516 = vmatmul.mubr.f32.gmra.mrb[10].mxu0 %v6726_v1  ;;  %v3307_v1 = vld [vmem:[%s12650_s4 + $0x60] sm:$0xff] }
 0x244   : > { %8518 = vmatprep.mubr.f32.mxu0 %v6727_v30  ;;  %v3308_v30 = vld [vmem:[%s12650_s4 + $0x68] sm:$0xff] }
 0x247   : > { %8519 = vmatmul.mubr.f32.gmra.mrb[12].mxu0 %v6728_v52  ;;  %v11436_v52 = vpop.f32.mrb[15].mxu1 }
 0x248   : > { %8521 = vmatprep.mubr.f32.mxu0 %v6729_v7  ;;  %v9692_v7 = vpack.c.bf16 %v3308_v30, %v3307_v1 }
 0x24b   : > { %8522 = vmatmul.mubr.f32.gmra.mrb[14].mxu0 %v6730_v23  ;;  %v3309_v23 = vld [vmem:[%s12650_s4 + $0x70] sm:$0xff] }
 0x24c   : > { %8524 = vmatprep.mubr.f32.mxu0 %v6731_v62  ;;  %v3310_v62 = vld [vmem:[%s12650_s4 + $0x78] sm:$0xff] }
 0x24f   : > { %8525 = vmatmul.mubr.f32.gmra.mrb[16].mxu0 %v6732_v63  ;;  %v9696_v63 = vpack.c.bf16 %v3310_v62, %v3309_v23 }
 0x250   : > { %8527 = vmatprep.mubr.f32.mxu0 %v6733_v0  ;;  %v6765_v0 = vld [vmem:[%s12650_s4 + $0x100] sm:$0xff] }
 0x253   : > { %8528 = vmatmul.mubr.f32.gmra.mrb[18].mxu0 %v6734_v2  ;;  %v6766_v2 = vld [vmem:[%s12650_s4 + $0x108] sm:$0xff] }
 0x254   : > { %8530 = vmatprep.mubr.f32.mxu0 %v6735_v4  ;;  %v11450_v4 = vpack.c.bf16 %v6766_v2, %v6765_v0 }
 0x257   : > { %8531 = vmatmul.mubr.f32.gmra.mrb[20].mxu0 %v6736_v5  ;;  %v11456_v5 = vld [vmem:[%s12648_s2] ss:$0 sm:$0xff] }
 0x258   : > { %8533 = vmatprep.mubr.f32.mxu0 %v6737_v6 }
 0x25b   : > { %8534 = vmatmul.mubr.f32.gmra.mrb[22].mxu0 %v6738_v8  ;;  %v11461_v8 = vld [vmem:[%s12649_s3] ss:$0 sm:$0xff] }
 0x25c   : > { %8536 = vmatprep.mubr.f32.mxu0 %v6739_v9 }
 0x25f   : > { %8537 = vmatmul.mubr.f32.gmra.mrb[24].mxu0 %v6740_v18 }
 0x260   : > { %8539 = vmatprep.mubr.f32.mxu0 %v6741_v36 }
 0x263   : > { %8540 = vmatmul.mubr.f32.gmra.mrb[26].mxu0 %v6742_v37 }
 0x264   : > { %8542 = vmatprep.mubr.f32.mxu0 %v11138_v41  ;;  %v6761_v41 = vld [vmem:[%s12650_s4 + $0xe0] sm:$0xff] }
 0x267   : > { %8543 = vmatmul.mubr.f32.gmra.mrb[28].mxu0 %v11143_v46  ;;  %v6762_v46 = vld [vmem:[%s12650_s4 + $0xe8] sm:$0xff] }
 0x268   : > { %8545 = vmatprep.mubr.f32.mxu0 %v6745_v45  ;;  %v9660_v25 = vpack.c.bf16 %v6762_v46, %v6761_v41 }
 0x26a   : > { %9661 = vmatprep.subr.bf16.mxu1 %v9660_v25 }
 0x26b   : > { %8546 = vmatmul.mubr.f32.gmra.mrb[30].mxu0 %v6746_v35  ;;  %9663 = vmatpush3.bf16.msra.mxu1 %v9660_v25 }
 0x26c   : > { %9665 = vmatprep.subr.bf16.mxu1 %v9664_v12 }
 0x26f   : > { %9667 = vmatpush3.bf16.msra.mxu1 %v9664_v12 }
 0x270   : > { %9669 = vmatprep.subr.bf16.mxu1 %v9668_v21 }
 0x272   : > { %8581 = vmatmul.mubr.f32.vlgmr.msra.gmra.mrb[16].mxu1 %v3312_v16 }
 0x273   : > { %9671 = vmatpush3.bf16.msra.mxu1 %v9668_v21 }
 0x274   : > { %9673 = vmatprep.subr.bf16.mxu1 %v9672_v26 }
 0x277   : > { %9675 = vmatpush3.bf16.msra.mxu1 %v9672_v26 }
 0x278   : > { %9677 = vmatprep.subr.bf16.mxu1 %v9676_v42 }
 0x27b   : > { %9679 = vmatpush3.bf16.msra.mxu1 %v9676_v42 }
 0x27c   : > { %9681 = vmatprep.subr.bf16.mxu1 %v9680_v59 }
 0x27f   : > { %9683 = vmatpush3.bf16.msra.mxu1 %v9680_v59 }
 0x280   : > { %9685 = vmatprep.subr.bf16.mxu1 %v9684_v44 }
 0x283   : > { %9687 = vmatpush3.bf16.msra.mxu1 %v9684_v44 }
 0x284   : > { %9689 = vmatprep.subr.bf16.mxu1 %v9688_v60 }
 0x287   : > { %9691 = vmatpush3.bf16.msra.mxu1 %v9688_v60 }
 0x288   : > { %9693 = vmatprep.subr.bf16.mxu1 %v9692_v7 }
 0x28b   : > { %9695 = vmatpush3.bf16.msra.mxu1 %v9692_v7 }
 0x28c   : > { %9697 = vmatprep.subr.bf16.mxu1 %v9696_v63 }
 0x28f   : > { %9699 = vmatpush3.bf16.msra.mxu1 %v9696_v63 }
 0x290   : > { %9701 = vmatprep.subr.bf16.mxu1 %v11450_v4 }
 0x302   : > { %v8502_v6 = vpop.f32.mrb[0].mxu0 }
 0x303   : > { %v3128_v9 = vmul.f32 %v8502_v6, %v11456_v5  ;;  %v2929_v18 = vpop.f32.mrb[1].mxu0 }
 0x304   : > { %v3127_v36 = vmul.f32 %v11456_v5, %v2929_v18 }
 0x305   : > { %v3167_v37 = vadd.f32 %v11461_v8, %v3128_v9 }
 0x306   : > { %v3166_v45 = vadd.f32 %v11461_v8, %v3127_v36  ;;  %v8505_v35 = vpop.f32.mrb[2].mxu0 }
 0x307   : > { %v3199_v50 = vmax.f32 %v3167_v37, 0.0  ;;  %v3130_v31 = vmul.f32 %v8505_v35, %v11456_v5  ;;  %v2939_v24 = vpop.f32.mrb[3].mxu0 }
 0x308   : > { %v3198_v41 = vmax.f32 %v3166_v45, 0.0  ;;  %v3129_v46 = vmul.f32 %v11456_v5, %v2939_v24 }
 0x309   : > { %3232 = vst [vmem:[#allocation2 + $0x21] sm:$0xff] %v3199_v50  ;;  %v3169_v25 = vadd.f32 %v11461_v8, %v3130_v31 }
 0x30a   : > { %3231 = vst [vmem:[#allocation2 + $0x19] sm:$0xff] %v3198_v41  ;;  %v3168_v34 = vadd.f32 %v11461_v8, %v3129_v46  ;;  %v8508_v43 = vpop.f32.mrb[4].mxu0  ;;  %8583 = vmatprep.mubr.f32.mxu1 %v3198_v41 }
 0x30b   : > { %v3201_v12 = vmax.f32 %v3169_v25, 0.0  ;;  %v3132_v15 = vmul.f32 %v8508_v43, %v11456_v5  ;;  %v2949_v16 = vpop.f32.mrb[5].mxu0  ;;  %8584 = vmatmul.mubr.f32.gmra.mrb[18].mxu1 %v3199_v50 }
 0x30c   : > { %v3200_v17 = vmax.f32 %v3168_v34, 0.0  ;;  %v3131_v55 = vmul.f32 %v11456_v5, %v2949_v16 }
 0x30d   : > { %3234 = vst [vmem:[#allocation2 + $0x39] sm:$0xff] %v3201_v12  ;;  %v3171_v21 = vadd.f32 %v11461_v8, %v3132_v15 }
 0x30e   : > { %3233 = vst [vmem:[#allocation2 + $0x31] sm:$0xff] %v3200_v17  ;;  %v3170_v22 = vadd.f32 %v11461_v8, %v3131_v55  ;;  %v8511_v11 = vpop.f32.mrb[6].mxu0  ;;  %8586 = vmatprep.mubr.f32.mxu1 %v3200_v17 }
 0x30f   : > { %v3203_v26 = vmax.f32 %v3171_v21, 0.0  ;;  %v3134_v33 = vmul.f32 %v8511_v11, %v11456_v5  ;;  %v2959_v40 = vpop.f32.mrb[7].mxu0  ;;  %8587 = vmatmul.mubr.f32.gmra.mrb[20].mxu1 %v3201_v12 }
 0x310   : > { %v3202_v42 = vmax.f32 %v3170_v22, 0.0  ;;  %v3133_v57 = vmul.f32 %v11456_v5, %v2959_v40 }
 0x311   : > { %3236 = vst [vmem:[#allocation2 + $0x51] sm:$0xff] %v3203_v26  ;;  %v3173_v58 = vadd.f32 %v11461_v8, %v3134_v33 }
 0x312   : > { %3235 = vst [vmem:[#allocation2 + $0x49] sm:$0xff] %v3202_v42  ;;  %v3172_v59 = vadd.f32 %v11461_v8, %v3133_v57  ;;  %v8514_v14 = vpop.f32.mrb[8].mxu0  ;;  %8589 = vmatprep.mubr.f32.mxu1 %v3202_v42 }
 0x313   : > { %v3205_v28 = vmax.f32 %v3173_v58, 0.0  ;;  %v3136_v44 = vmul.f32 %v8514_v14, %v11456_v5  ;;  %v2969_v19 = vpop.f32.mrb[9].mxu0  ;;  %8590 = vmatmul.mubr.f32.gmra.mrb[22].mxu1 %v3203_v26 }
 0x314   : > { %v3204_v10 = vmax.f32 %v3172_v59, 0.0  ;;  %v3135_v60 = vmul.f32 %v11456_v5, %v2969_v19 }
 0x315   : > { %3238 = vst [vmem:[#allocation2 + $0x69] sm:$0xff] %v3205_v28  ;;  %v3175_v1 = vadd.f32 %v11461_v8, %v3136_v44 }
 0x316   : > { %3237 = vst [vmem:[#allocation2 + $0x61] sm:$0xff] %v3204_v10  ;;  %v3174_v30 = vadd.f32 %v11461_v8, %v3135_v60  ;;  %v8517_v7 = vpop.f32.mrb[10].mxu0  ;;  %8592 = vmatprep.mubr.f32.mxu1 %v3204_v10 }
 0x317   : > { %v3207_v23 = vmax.f32 %v3175_v1, 0.0  ;;  %v3138_v62 = vmul.f32 %v8517_v7, %v11456_v5  ;;  %v2979_v63 = vpop.f32.mrb[11].mxu0  ;;  %8593 = vmatmul.mubr.f32.gmra.mrb[24].mxu1 %v3205_v28 }
 0x318   : > { %v3206_v0 = vmax.f32 %v3174_v30, 0.0  ;;  %v3137_v2 = vmul.f32 %v11456_v5, %v2979_v63 }
 0x319   : > { %3240 = vst [vmem:[#allocation2 + $0x81] sm:$0xff] %v3207_v23  ;;  %v3177_v6 = vadd.f32 %v11461_v8, %v3138_v62 }
 0x31a   : > { %3239 = vst [vmem:[#allocation2 + $0x79] sm:$0xff] %v3206_v0  ;;  %v3176_v9 = vadd.f32 %v11461_v8, %v3137_v2  ;;  %v8520_v18 = vpop.f32.mrb[12].mxu0  ;;  %8595 = vmatprep.mubr.f32.mxu1 %v3206_v0 }
 0x31b   : > { %v3209_v36 = vmax.f32 %v3177_v6, 0.0  ;;  %v3140_v37 = vmul.f32 %v8520_v18, %v11456_v5  ;;  %v2989_v45 = vpop.f32.mrb[13].mxu0  ;;  %8596 = vmatmul.mubr.f32.gmra.mrb[26].mxu1 %v3207_v23 }
 0x31c   : > { %v3208_v35 = vmax.f32 %v3176_v9, 0.0  ;;  %v3139_v50 = vmul.f32 %v11456_v5, %v2989_v45 }
 0x31d   : > { %3242 = vst [vmem:[#allocation2 + $0x99] sm:$0xff] %v3209_v36  ;;  %v3179_v31 = vadd.f32 %v11461_v8, %v3140_v37 }
 0x31e   : > { %3241 = vst [vmem:[#allocation2 + $0x91] sm:$0xff] %v3208_v35  ;;  %v3178_v24 = vadd.f32 %v11461_v8, %v3139_v50  ;;  %v8523_v41 = vpop.f32.mrb[14].mxu0  ;;  %8598 = vmatprep.mubr.f32.mxu1 %v3208_v35 }
 0x31f   : > { %v3211_v46 = vmax.f32 %v3179_v31, 0.0  ;;  %v3142_v25 = vmul.f32 %v8523_v41, %v11456_v5  ;;  %v2999_v34 = vpop.f32.mrb[15].mxu0  ;;  %8599 = vmatmul.mubr.f32.gmra.mrb[28].mxu1 %v3209_v36 }
 0x320   : > { %v3210_v43 = vmax.f32 %v3178_v24, 0.0  ;;  %v3141_v12 = vmul.f32 %v11456_v5, %v2999_v34 }
 0x321   : > { %3244 = vst [vmem:[#allocation2 + $0xb1] sm:$0xff] %v3211_v46  ;;  %v3181_v15 = vadd.f32 %v11461_v8, %v3142_v25 }
 0x322   : > { %3243 = vst [vmem:[#allocation2 + $0xa9] sm:$0xff] %v3210_v43  ;;  %v3180_v16 = vadd.f32 %v11461_v8, %v3141_v12  ;;  %v8526_v17 = vpop.f32.mrb[16].mxu0  ;;  %8601 = vmatprep.mubr.f32.mxu1 %v3210_v43 }
 0x323   : > { %v3213_v55 = vmax.f32 %v3181_v15, 0.0  ;;  %v9972_v21 = vadd.f32 %v8526_v17, %v11376_v27  ;;  %v3009_v22 = vpop.f32.mrb[17].mxu0  ;;  %8602 = vmatmul.mubr.f32.gmra.mrb[30].mxu1 %v3211_v46 }
 0x324   : > { %v3212_v11 = vmax.f32 %v3180_v16, 0.0  ;;  %v9973_v26 = vadd.f32 %v3009_v22, %v11378_v51 }
 0x325   : > { %3246 = vst [vmem:[#allocation2 + $0xc9] sm:$0xff] %v3213_v55  ;;  %v3144_v33 = vmul.f32 %v9972_v21, %v11456_v5 }
 0x326   : > { %3245 = vst [vmem:[#allocation2 + $0xc1] sm:$0xff] %v3212_v11  ;;  %v3143_v40 = vmul.f32 %v9973_v26, %v11456_v5  ;;  %v8529_v42 = vpop.f32.mrb[18].mxu0  ;;  %8604 = vmatprep.mubr.f32.mxu1 %v3212_v11 }
 0x327   : > { %v3183_v57 = vadd.f32 %v11461_v8, %v3144_v33  ;;  %v9974_v58 = vadd.f32 %v8529_v42, %v11380_v32  ;;  %v3019_v59 = vpop.f32.mrb[19].mxu0  ;;  %8605 = vmatmul.mubr.f32.gmra.mrb[32].mxu1 %v3213_v55 }
 0x328   : > { %v3182_v27 = vadd.f32 %v11461_v8, %v3143_v40  ;;  %v9975_v14 = vadd.f32 %v3019_v59, %v11388_v39 }
 0x329   : > { %v3215_v28 = vmax.f32 %v3183_v57, 0.0  ;;  %v3146_v51 = vmul.f32 %v9974_v58, %v11456_v5 }
 0x32a   : > { %v3214_v44 = vmax.f32 %v3182_v27, 0.0  ;;  %v3145_v19 = vmul.f32 %v9975_v14, %v11456_v5  ;;  %v8532_v10 = vpop.f32.mrb[20].mxu0 }
 0x32b   : > { %3248 = vst [vmem:[#allocation2 + $0xe1] sm:$0xff] %v3215_v28  ;;  %v3185_v60 = vadd.f32 %v11461_v8, %v3146_v51  ;;  %v9976_v1 = vadd.f32 %v8532_v10, %v11390_v48  ;;  %v3029_v30 = vpop.f32.mrb[21].mxu0 }
 0x32c   : > { %3247 = vst [vmem:[#allocation2 + $0xd9] sm:$0xff] %v3214_v44  ;;  %v3184_v32 = vadd.f32 %v11461_v8, %v3145_v19  ;;  %v9977_v7 = vadd.f32 %v3029_v30, %v11392_v49  ;;  %8607 = vmatprep.mubr.f32.mxu1 %v3214_v44 }
 0x32d   : > { %v3217_v39 = vmax.f32 %v3185_v60, 0.0  ;;  %v3148_v23 = vmul.f32 %v9976_v1, %v11456_v5  ;;  %8608 = vmatmul.mubr.f32.gmra.mrb[34].mxu1 %v3215_v28  ;;  %v6767_v1 = vld [vmem:[%s12650_s4 + $0x110] sm:$0xff] }
 0x32e   : > { %v3216_v62 = vmax.f32 %v3184_v32, 0.0  ;;  %v3147_v63 = vmul.f32 %v9977_v7, %v11456_v5  ;;  %v8535_v0 = vpop.f32.mrb[22].mxu0  ;;  %v6769_v7 = vld [vmem:[%s12650_s4 + $0x120] sm:$0xff] }
 0x32f   : > { %3250 = vst [vmem:[#allocation2 + $0xf9] sm:$0xff] %v3217_v39  ;;  %v3187_v2 = vadd.f32 %v11461_v8, %v3148_v23  ;;  %v9978_v48 = vadd.f32 %v8535_v0, %v11394_v53  ;;  %v3039_v6 = vpop.f32.mrb[23].mxu0  ;;  %v11603_v23 = vld [vmem:[#allocation2 + $0x18] sm:$0xff]  ;;  %v6771_v0 = vld [vmem:[%s12650_s4 + $0x130] sm:$0xff] }
 0x330   : > { %3249 = vst [vmem:[#allocation2 + $0xf1] sm:$0xff] %v3216_v62  ;;  %v3186_v9 = vadd.f32 %v11461_v8, %v3147_v63  ;;  %v9979_v49 = vadd.f32 %v3039_v6, %v11396_v54  ;;  %8610 = vmatprep.mubr.f32.mxu1 %v3216_v62  ;;  %v11607_v63 = vld [vmem:[#allocation2 + $0x20] sm:$0xff] }
 0x331   : > { %v3219_v18 = vmax.f32 %v3187_v2, 0.0  ;;  %v3150_v36 = vmul.f32 %v9978_v48, %v11456_v5  ;;  %8611 = vmatmul.mubr.f32.gmra.mrb[36].mxu1 %v3217_v39  ;;  %v6770_v39 = vld [vmem:[%s12650_s4 + $0x128] sm:$0xff]  ;;  %v6772_v2 = vld [vmem:[%s12650_s4 + $0x138] sm:$0xff]  ;;  %v6773_v6 = vld [vmem:[%s12650_s4 + $0x140] sm:$0xff] }
 0x332   : > { %v11516_v37 = vmax.f32 %v3186_v9, 0.0  ;;  %v3149_v45 = vmul.f32 %v9979_v49, %v11456_v5  ;;  %v8538_v35 = vpop.f32.mrb[24].mxu0  ;;  %v9708_v62 = vpack.c.bf16 %v6770_v39, %v6769_v7  ;;  %v11619_v48 = vld [vmem:[#allocation2 + $0x38] sm:$0xff]  ;;  %v6774_v9 = vld [vmem:[%s12650_s4 + $0x148] sm:$0xff]  ;;  %v6783_v39 = vld [vmem:[%s12650_s4 + $0x190] sm:$0xff] }
 0x333   : > { %3252 = vst [vmem:[#allocation2 + $0x111] sm:$0xff] %v3219_v18  ;;  %v3189_v50 = vadd.f32 %v11461_v8, %v3150_v36  ;;  %v9980_v53 = vadd.f32 %v8538_v35, %v11404_v29  ;;  %v3049_v31 = vpop.f32.mrb[25].mxu0  ;;  %v11628_v49 = vld [vmem:[#allocation2 + $0x48] sm:$0xff]  ;;  %v11631_v36 = vld [vmem:[#allocation2 + $0x50] sm:$0xff]  ;;  %v6776_v35 = vld [vmem:[%s12650_s4 + $0x158] sm:$0xff] }
 0x334   : > { %3251 = vst [vmem:[#allocation2 + $0x109] sm:$0xff] %v11516_v37  ;;  %v3188_v54 = vadd.f32 %v11461_v8, %v3149_v45  ;;  %v9981_v24 = vadd.f32 %v3049_v31, %v11406_v47  ;;  %8613 = vmatprep.mubr.f32.mxu1 %v11516_v37  ;;  %v6775_v45 = vld [vmem:[%s12650_s4 + $0x150] sm:$0xff]  ;;  %v11643_v31 = vld [vmem:[#allocation2 + $0x68] sm:$0xff] }
 0x335   : > { %v11525_v41 = vmax.f32 %v3189_v50, 0.0  ;;  %v3152_v46 = vmul.f32 %v9980_v53, %v11456_v5  ;;  %8614 = vmatmul.mubr.f32.gmra.mrb[38].mxu1 %v3219_v18  ;;  %v9716_v18 = vpack.c.bf16 %v6774_v9, %v6773_v6  ;;  %v11640_v50 = vld [vmem:[#allocation2 + $0x60] sm:$0xff]  ;;  %v9720_v53 = vpack.c.bf16 %v6776_v35, %v6775_v45  ;;  %v6786_v6 = vld [vmem:[%s12650_s4 + $0x1a8] sm:$0xff]  ;;  %v6787_v35 = vld [vmem:[%s12650_s4 + $0x1b0] sm:$0xff] }
 0x336   : > { %v11528_v25 = vmax.f32 %v3188_v54, 0.0  ;;  %v3151_v34 = vmul.f32 %v9981_v24, %v11456_v5  ;;  %v8541_v43 = vpop.f32.mrb[26].mxu0  ;;  %v6777_v54 = vld [vmem:[%s12650_s4 + $0x160] sm:$0xff]  ;;  %v6778_v24 = vld [vmem:[%s12650_s4 + $0x168] sm:$0xff] }
 0x337   : > { %3254 = vst [vmem:[#allocation2 + $0x129] sm:$0xff] %v11525_v41  ;;  %v3191_v29 = vadd.f32 %v11461_v8, %v3152_v46  ;;  %v9982_v12 = vadd.f32 %v8541_v43, %v11408_v13  ;;  %v3059_v15 = vpop.f32.mrb[27].mxu0  ;;  %v11652_v46 = vld [vmem:[#allocation2 + $0x78] sm:$0xff]  ;;  %v11655_v43 = vld [vmem:[#allocation2 + $0x80] sm:$0xff] }
 0x338   : > { %3253 = vst [vmem:[#allocation2 + $0x121] sm:$0xff] %v11528_v25  ;;  %v3190_v47 = vadd.f32 %v11461_v8, %v3151_v34  ;;  %v9983_v16 = vadd.f32 %v3059_v15, %v11416_v20  ;;  %8616 = vmatprep.mubr.f32.mxu1 %v11528_v25  ;;  %v9724_v34 = vpack.c.bf16 %v6778_v24, %v6777_v54  ;;  %v11664_v15 = vld [vmem:[#allocation2 + $0x90] sm:$0xff]  ;;  %v11742_v9 = vld [vmem:[#allocation2 + $0x1a] sm:$0xff]  ;;  %v11745_v45 = vld [vmem:[#allocation2 + $0x22] sm:$0xff] }
 0x339   : > { %v11538_v17 = vmax.f32 %v3191_v29, 0.0  ;;  %v3154_v55 = vmul.f32 %v9982_v12, %v11456_v5  ;;  %8617 = vmatmul.mubr.f32.gmra.mrb[40].mxu1 %v11525_v41  ;;  %v6779_v29 = vld [vmem:[%s12650_s4 + $0x170] sm:$0xff]  ;;  %v6780_v12 = vld [vmem:[%s12650_s4 + $0x178] sm:$0xff] }
 0x33a   : > { %v11542_v21 = vmax.f32 %v3190_v47, 0.0  ;;  %v3153_v22 = vmul.f32 %v9983_v16, %v11456_v5  ;;  %v8544_v13 = vpop.f32.mrb[28].mxu0  ;;  %v9728_v47 = vpack.c.bf16 %v6780_v12, %v6779_v29  ;;  %v11667_v16 = vld [vmem:[#allocation2 + $0x98] sm:$0xff]  ;;  %v6789_v29 = vld [vmem:[%s12650_s4 + $0x1c0] sm:$0xff]  ;;  %v6790_v12 = vld [vmem:[%s12650_s4 + $0x1c8] sm:$0xff] }
 0x33b   : > { %3256 = vst [vmem:[#allocation2 + $0x141] sm:$0xff] %v11538_v17  ;;  %v3193_v11 = vadd.f32 %v11461_v8, %v3154_v55  ;;  %v9984_v26 = vadd.f32 %v8544_v13, %v11418_v38  ;;  %v3069_v20 = vpop.f32.mrb[29].mxu0  ;;  %v6781_v55 = vld [vmem:[%s12650_s4 + $0x180] sm:$0xff]  ;;  %v11676_v13 = vld [vmem:[#allocation2 + $0xa8] sm:$0xff]  ;;  %v11754_v54 = vld [vmem:[#allocation2 + $0x32] sm:$0xff] }
 0x33c   : > { %3255 = vst [vmem:[#allocation2 + $0x139] sm:$0xff] %v11542_v21  ;;  %v3192_v33 = vadd.f32 %v11461_v8, %v3153_v22  ;;  %v9985_v40 = vadd.f32 %v3069_v20, %v11426_v56  ;;  %8619 = vmatprep.mubr.f32.mxu1 %v11542_v21  ;;  %v6782_v22 = vld [vmem:[%s12650_s4 + $0x188] sm:$0xff]  ;;  %v11682_v20 = vld [vmem:[#allocation2 + $0xc0] sm:$0xff] }
 0x33d   : > { %v11552_v42 = vmax.f32 %v3193_v11, 0.0  ;;  %v3156_v57 = vmul.f32 %v9984_v26, %v11456_v5  ;;  %8620 = vmatmul.mubr.f32.gmra.mrb[42].mxu1 %v11538_v17  ;;  %v9732_v11 = vpack.c.bf16 %v6782_v22, %v6781_v55  ;;  %v11679_v26 = vld [vmem:[#allocation2 + $0xb0] sm:$0xff]  ;;  %v9748_v55 = vpack.c.bf16 %v6790_v12, %v6789_v29 }
 0x33e   : > { %v11556_v58 = vmax.f32 %v3192_v33, 0.0  ;;  %v3155_v59 = vmul.f32 %v9985_v40, %v11456_v5  ;;  %v8547_v38 = vpop.f32.mrb[30].mxu0  ;;  %v11685_v33 = vld [vmem:[#allocation2 + $0xc8] sm:$0xff]  ;;  %v11688_v40 = vld [vmem:[#allocation2 + $0xd8] sm:$0xff] }
 0x33f   : > { %3258 = vst [vmem:[#allocation2 + $0x159] sm:$0xff] %v11552_v42  ;;  %v3195_v27 = vadd.f32 %v11461_v8, %v3156_v57  ;;  %v9986_v14 = vadd.f32 %v8547_v38, %v11428_v61  ;;  %v3079_v56 = vpop.f32.mrb[31].mxu0  ;;  %v11691_v57 = vld [vmem:[#allocation2 + $0xe0] sm:$0xff]  ;;  %v11697_v38 = vld [vmem:[#allocation2 + $0xf8] sm:$0xff] }
 0x340   : > { %3257 = vst [vmem:[#allocation2 + $0x151] sm:$0xff] %v11556_v58  ;;  %v3194_v28 = vadd.f32 %v11461_v8, %v3155_v59  ;;  %v9987_v51 = vadd.f32 %v3079_v56, %v11436_v52  ;;  %8622 = vmatprep.mubr.f32.mxu1 %v11556_v58  ;;  %v11694_v59 = vld [vmem:[#allocation2 + $0xf0] sm:$0xff]  ;;  %v11706_v56 = vld [vmem:[#allocation2 + $0x120] sm:$0xff] }
 0x341   : > { %v11566_v44 = vmax.f32 %v3195_v27, 0.0  ;;  %v3158_v19 = vmul.f32 %v9986_v14, %v11456_v5  ;;  %8623 = vmatmul.mubr.f32.gmra.mrb[44].mxu1 %v11552_v42  ;;  %v11700_v27 = vld [vmem:[#allocation2 + $0x108] sm:$0xff]  ;;  %v11703_v14 = vld [vmem:[#allocation2 + $0x110] sm:$0xff] }
 0x342   : > { %v11570_v10 = vmax.f32 %v3194_v28, 0.0  ;;  %v3157_v60 = vmul.f32 %v9987_v51, %v11456_v5  ;;  %v6768_v5 = vld [vmem:[%s12650_s4 + $0x118] sm:$0xff]  ;;  %v11709_v28 = vld [vmem:[#allocation2 + $0x128] sm:$0xff] }
 0x343   : > { %3260 = vst [vmem:[#allocation2 + $0x171] sm:$0xff] %v11566_v44  ;;  %v11575_v61 = vadd.f32 %v11461_v8, %v3158_v19  ;;  %v11712_v51 = vld [vmem:[#allocation2 + $0x138] sm:$0xff]  ;;  %v11715_v19 = vld [vmem:[#allocation2 + $0x140] sm:$0xff] }
 0x344   : > { %3259 = vst [vmem:[#allocation2 + $0x169] sm:$0xff] %v11570_v10  ;;  %v11579_v52 = vadd.f32 %v11461_v8, %v3157_v60  ;;  %8625 = vmatprep.mubr.f32.mxu1 %v11570_v10  ;;  %v9704_v8 = vpack.c.bf16 %v6768_v5, %v6767_v1  ;;  %v11769_v22 = vld [vmem:[#allocation2 + $0x52] sm:$0xff] }
 0x345   : > { %v12701_v30 = vmax.f32 %v11575_v61, 0.0  ;;  %8626 = vmatmul.mubr.f32.gmra.mrb[46].mxu1 %v11566_v44  ;;  %v11802_v29 = vld [vmem:[#allocation2 + $0x92] sm:$0xff] }
 0x346   : > { %v12702_v32 = vmax.f32 %v11579_v52, 0.0  ;;  %8660 = vmatprep.mubr.f32.mxu1 %v10551_v3 }
 0x347   : > { %3262 = vst [vmem:[#allocation2 + $0x189] sm:$0xff] %v12701_v30  ;;  %v11718_v60 = vld [vmem:[#allocation2 + $0x150] sm:$0xff]  ;;  %v11721_v1 = vld [vmem:[#allocation2 + $0x158] sm:$0xff] }
 0x348   : > { %3261 = vst [vmem:[#allocation2 + $0x181] sm:$0xff] %v12702_v32  ;;  %v11826_v30 = vld [vmem:[#allocation2 + $0xda] sm:$0xff]  ;;  %v11841_v32 = vld [vmem:[#allocation2 + $0x112] sm:$0xff] }
 0x349   : > { %8661 = vmatmul.mubr.f32.vlgmr.msra.gmra.mrb[16].mxu1 %v10551_v3  ;;  %v11616_v3 = vld [vmem:[#allocation2 + $0x30] sm:$0xff]  ;;  %12812 = vst [vmem:[#allocation36_spill] sm:$0xff] %v11826_v30  ;;  %12817 = vst [vmem:[#allocation8_spill] sm:$0xff] %v11841_v32 }
 0x34a   : > { %8663 = vmatprep.mubr.f32.mxu1 %v11603_v23  ;;  %9703 = vmatpush3.bf16.msra.mxu1 %v11450_v4  ;;  %v9712_v4 = vpack.c.bf16 %v6772_v2, %v6771_v0  ;;  %v3811_v0 = vld [vmem:[#allocation2 + $0xa] sm:$0xff] }
 0x34b   : > { %9705 = vmatprep.subr.bf16.mxu1 %v9704_v8  ;;  %v11724_v5 = vld [vmem:[#allocation2 + $0x168] sm:$0xff]  ;;  %v11727_v7 = vld [vmem:[#allocation2 + $0x170] sm:$0xff] }
 0x34c   : > { %12809 = vst [vmem:[#allocation29_spill] sm:$0xff] %v11724_v5  ;;  %12810 = vst [vmem:[#allocation32_spill] sm:$0xff] %v11727_v7 }
 0x34d   : > { %8664 = vmatmul.mubr.f32.gmra.mrb[18].mxu1 %v11607_v63 }
 0x34e   : > { %8666 = vmatprep.mubr.f32.mxu1 %v11616_v3  ;;  %9707 = vmatpush3.bf16.msra.mxu1 %v9704_v8  ;;  %v3810_v8 = vld [vmem:[#allocation2 + $0x2] sm:$0xff] }
 0x34f   : > { %9709 = vmatprep.subr.bf16.mxu1 %v9708_v62 }
 0x351   : > { %8667 = vmatmul.mubr.f32.gmra.mrb[20].mxu1 %v11619_v48 }
 0x352   : > { %8669 = vmatprep.mubr.f32.mxu1 %v11628_v49  ;;  %9711 = vmatpush3.bf16.msra.mxu1 %v9708_v62  ;;  %v6784_v62 = vld [vmem:[%s12650_s4 + $0x198] sm:$0xff] }
 0x353   : > { %9713 = vmatprep.subr.bf16.mxu1 %v9712_v4  ;;  %v9736_v2 = vpack.c.bf16 %v6784_v62, %v6783_v39  ;;  %v11778_v39 = vld [vmem:[#allocation2 + $0x62] sm:$0xff] }
 0x355   : > { %8670 = vmatmul.mubr.f32.gmra.mrb[22].mxu1 %v11631_v36 }
 0x356   : > { %8672 = vmatprep.mubr.f32.mxu1 %v11640_v50  ;;  %9715 = vmatpush3.bf16.msra.mxu1 %v9712_v4  ;;  %v6785_v4 = vld [vmem:[%s12650_s4 + $0x1a0] sm:$0xff] }
 0x357   : > { %9717 = vmatprep.subr.bf16.mxu1 %v9716_v18 }
 0x359   : > { %8673 = vmatmul.mubr.f32.gmra.mrb[24].mxu1 %v11643_v31 }
 0x35a   : > { %8675 = vmatprep.mubr.f32.mxu1 %v11652_v46  ;;  %9719 = vmatpush3.bf16.msra.mxu1 %v9716_v18  ;;  %v9740_v18 = vpack.c.bf16 %v6786_v6, %v6785_v4  ;;  %v6794_v4 = vld [vmem:[%s12650_s4 + $0x1e8] sm:$0xff]  ;;  %v11790_v6 = vld [vmem:[#allocation2 + $0x7a] sm:$0xff] }
 0x35b   : > { %9721 = vmatprep.subr.bf16.mxu1 %v9720_v53 }
 0x35d   : > { %8676 = vmatmul.mubr.f32.gmra.mrb[26].mxu1 %v11655_v43 }
 0x35e   : > { %8678 = vmatprep.mubr.f32.mxu1 %v11664_v15  ;;  %9723 = vmatpush3.bf16.msra.mxu1 %v9720_v53  ;;  %v6788_v53 = vld [vmem:[%s12650_s4 + $0x1b8] sm:$0xff] }
 0x35f   : > { %9725 = vmatprep.subr.bf16.mxu1 %v9724_v34  ;;  %v9744_v24 = vpack.c.bf16 %v6788_v53, %v6787_v35  ;;  %v11793_v35 = vld [vmem:[#allocation2 + $0x82] sm:$0xff]  ;;  %v6795_v53 = vld [vmem:[%s12650_s4 + $0x1f0] sm:$0xff] }
 0x361   : > { %8679 = vmatmul.mubr.f32.gmra.mrb[28].mxu1 %v11667_v16 }
 0x362   : > { %8681 = vmatprep.mubr.f32.mxu1 %v11676_v13  ;;  %9727 = vmatpush3.bf16.msra.mxu1 %v9724_v34  ;;  %v11757_v34 = vld [vmem:[#allocation2 + $0x3a] sm:$0xff] }
 0x363   : > { %9729 = vmatprep.subr.bf16.mxu1 %v9728_v47 }
 0x365   : > { %8682 = vmatmul.mubr.f32.gmra.mrb[30].mxu1 %v11679_v26 }
 0x366   : > { %8684 = vmatprep.mubr.f32.mxu1 %v11682_v20  ;;  %9731 = vmatpush3.bf16.msra.mxu1 %v9728_v47  ;;  %v11766_v47 = vld [vmem:[#allocation2 + $0x4a] sm:$0xff] }
 0x367   : > { %9733 = vmatprep.subr.bf16.mxu1 %v9732_v11 }
 0x369   : > { %8685 = vmatmul.mubr.f32.gmra.mrb[32].mxu1 %v11685_v33 }
 0x36a   : > { %8687 = vmatprep.mubr.f32.mxu1 %v11688_v40 }
 0x36d   : > { %8688 = vmatmul.mubr.f32.gmra.mrb[34].mxu1 %v11691_v57 }
 0x36e   : > { %8690 = vmatprep.mubr.f32.mxu1 %v11694_v59 }
 0x371   : > { %8691 = vmatmul.mubr.f32.gmra.mrb[36].mxu1 %v11697_v38 }
 0x372   : > { %8693 = vmatprep.mubr.f32.mxu1 %v11700_v27 }
 0x375   : > { %8694 = vmatmul.mubr.f32.gmra.mrb[38].mxu1 %v11703_v14 }
 0x376   : > { %8696 = vmatprep.mubr.f32.mxu1 %v11706_v56 }
 0x379   : > { %8697 = vmatmul.mubr.f32.gmra.mrb[40].mxu1 %v11709_v28 }
 0x37a   : > { %8699 = vmatprep.mubr.f32.mxu1 %v11712_v51 }
 0x37d   : > { %8700 = vmatmul.mubr.f32.gmra.mrb[42].mxu1 %v11715_v19 }
 0x37e   : > { %8702 = vmatprep.mubr.f32.mxu1 %v11718_v60 }
 0x381   : > { %8703 = vmatmul.mubr.f32.gmra.mrb[44].mxu1 %v11721_v1 }
 0x382   : > { %8705 = vmatprep.mubr.f32.mxu1 %v11724_v5 }
 0x385   : > { %8706 = vmatmul.mubr.f32.gmra.mrb[46].mxu1 %v11727_v7 }
 0x386   : > { %8740 = vmatprep.mubr.f32.mxu1 %v3810_v8  ;;  %v6792_v8 = vld [vmem:[%s12650_s4 + $0x1d8] sm:$0xff] }
 0x389   : > { %8741 = vmatmul.mubr.f32.vlgmr.msra.gmra.mrb[16].mxu1 %v3811_v0  ;;  %v11781_v0 = vld [vmem:[#allocation2 + $0x6a] sm:$0xff] }
 0x38a   : > { %8743 = vmatprep.mubr.f32.mxu1 %v11742_v9  ;;  %9735 = vmatpush3.bf16.msra.mxu1 %v9732_v11  ;;  %v6791_v11 = vld [vmem:[%s12650_s4 + $0x1d0] sm:$0xff] }
 0x38b   : > { %9737 = vmatprep.subr.bf16.mxu1 %v9736_v2  ;;  %v9752_v62 = vpack.c.bf16 %v6792_v8, %v6791_v11  ;;  %v6797_v11 = vld [vmem:[%s12650_s4 + $0x200] sm:$0xff]  ;;  %v6798_v8 = vld [vmem:[%s12650_s4 + $0x208] sm:$0xff] }
 0x38d   : > { %8744 = vmatmul.mubr.f32.gmra.mrb[18].mxu1 %v11745_v45 }
 0x38e   : > { %8746 = vmatprep.mubr.f32.mxu1 %v11754_v54  ;;  %9739 = vmatpush3.bf16.msra.mxu1 %v9736_v2  ;;  %v6793_v2 = vld [vmem:[%s12650_s4 + $0x1e0] sm:$0xff] }
 0x38f   : > { %9741 = vmatprep.subr.bf16.mxu1 %v9740_v18 }
 0x391   : > { %8747 = vmatmul.mubr.f32.gmra.mrb[20].mxu1 %v11757_v34 }
 0x392   : > { %8749 = vmatprep.mubr.f32.mxu1 %v11766_v47  ;;  %9743 = vmatpush3.bf16.msra.mxu1 %v9740_v18  ;;  %v9756_v18 = vpack.c.bf16 %v6794_v4, %v6793_v2  ;;  %v11814_v2 = vld [vmem:[#allocation2 + $0xaa] sm:$0xff]  ;;  %v11817_v4 = vld [vmem:[#allocation2 + $0xb2] sm:$0xff] }
 0x393   : > { %9745 = vmatprep.subr.bf16.mxu1 %v9744_v24 }
 0x395   : > { %8750 = vmatmul.mubr.f32.gmra.mrb[22].mxu1 %v11769_v22 }
 0x396   : > { %8752 = vmatprep.mubr.f32.mxu1 %v11778_v39  ;;  %9747 = vmatpush3.bf16.msra.mxu1 %v9744_v24  ;;  %v6796_v24 = vld [vmem:[%s12650_s4 + $0x1f8] sm:$0xff] }
 0x397   : > { %9749 = vmatprep.subr.bf16.mxu1 %v9748_v55  ;;  %v9760_v12 = vpack.c.bf16 %v6796_v24, %v6795_v53  ;;  %v11820_v53 = vld [vmem:[#allocation2 + $0xc2] sm:$0xff]  ;;  %v11823_v24 = vld [vmem:[#allocation2 + $0xca] sm:$0xff] }
 0x398   : > { %12811 = vst [vmem:[#allocation33_spill] sm:$0xff] %v11823_v24 }
 0x399   : > { %8753 = vmatmul.mubr.f32.gmra.mrb[24].mxu1 %v11781_v0 }
 0x39a   : > { %8755 = vmatprep.mubr.f32.mxu1 %v11790_v6  ;;  %9751 = vmatpush3.bf16.msra.mxu1 %v9748_v55  ;;  %v11805_v55 = vld [vmem:[#allocation2 + $0x9a] sm:$0xff] }
 0x39b   : > { %9753 = vmatprep.subr.bf16.mxu1 %v9752_v62 }
 0x39d   : > { %8756 = vmatmul.mubr.f32.gmra.mrb[26].mxu1 %v11793_v35 }
 0x39e   : > { %8758 = vmatprep.mubr.f32.mxu1 %v11802_v29  ;;  %9755 = vmatpush3.bf16.msra.mxu1 %v9752_v62  ;;  %v9764_v62 = vpack.c.bf16 %v6798_v8, %v6797_v11  ;;  %v11832_v11 = vld [vmem:[#allocation2 + $0xf2] sm:$0xff]  ;;  %v11835_v8 = vld [vmem:[#allocation2 + $0xfa] sm:$0xff] }
 0x39f   : > { %9757 = vmatprep.subr.bf16.mxu1 %v9756_v18  ;;  %12814 = vst [vmem:[#allocation40_spill] sm:$0xff] %v11832_v11  ;;  %12815 = vst [vmem:[#allocation6_spill] sm:$0xff] %v11835_v8 }
 0x3a1   : > { %8759 = vmatmul.mubr.f32.gmra.mrb[28].mxu1 %v11805_v55 }
 0x3a2   : > { %8761 = vmatprep.mubr.f32.mxu1 %v11814_v2  ;;  %9759 = vmatpush3.bf16.msra.mxu1 %v9756_v18  ;;  %v11829_v18 = vld [vmem:[#allocation2 + $0xe2] sm:$0xff] }
 0x3a3   : > { %9761 = vmatprep.subr.bf16.mxu1 %v9760_v12  ;;  %12813 = vst [vmem:[#allocation37_spill] sm:$0xff] %v11829_v18 }
 0x3a5   : > { %8762 = vmatmul.mubr.f32.gmra.mrb[30].mxu1 %v11817_v4 }
 0x3a6   : > { %8764 = vmatprep.mubr.f32.mxu1 %v11820_v53  ;;  %9763 = vmatpush3.bf16.msra.mxu1 %v9760_v12  ;;  %v11838_v12 = vld [vmem:[#allocation2 + $0x10a] sm:$0xff] }
 0x3a7   : > { %9765 = vmatprep.subr.bf16.mxu1 %v9764_v62  ;;  %12816 = vst [vmem:[#allocation7_spill] sm:$0xff] %v11838_v12 }
 0x3a9   : > { %8765 = vmatmul.mubr.f32.gmra.mrb[32].mxu1 %v11823_v24 }
 0x3aa   : > { %8767 = vmatprep.mubr.f32.mxu1 %v11826_v30  ;;  %v11844_v30 = vld [vmem:[#allocation2 + $0x122] sm:$0xff] }
 0x3ab   : > { %12818 = vst [vmem:[#allocation9_spill] sm:$0xff] %v11844_v30 }
 0x3ad   : > { %8768 = vmatmul.mubr.f32.gmra.mrb[34].mxu1 %v11829_v18  ;;  %v11847_v18 = vld [vmem:[#allocation2 + $0x12a] sm:$0xff] }
 0x3ae   : > { %8770 = vmatprep.mubr.f32.mxu1 %v11832_v11  ;;  %12819 = vst [vmem:[#allocation10_spill] sm:$0xff] %v11847_v18  ;;  %v11850_v11 = vld [vmem:[#allocation2 + $0x13a] sm:$0xff] }
 0x3af   : > { %12820 = vst [vmem:[#allocation11_spill] sm:$0xff] %v11850_v11 }
 0x3b1   : > { %8771 = vmatmul.mubr.f32.gmra.mrb[36].mxu1 %v11835_v8  ;;  %v11853_v8 = vld [vmem:[#allocation2 + $0x142] sm:$0xff] }
 0x3b2   : > { %8773 = vmatprep.mubr.f32.mxu1 %v11838_v12  ;;  %12821 = vst [vmem:[#allocation12_spill] sm:$0xff] %v11853_v8  ;;  %v11856_v12 = vld [vmem:[#allocation2 + $0x152] sm:$0xff] }
 0x3b3   : > { %12822 = vst [vmem:[#allocation13_spill] sm:$0xff] %v11856_v12 }
 0x3b5   : > { %8774 = vmatmul.mubr.f32.gmra.mrb[38].mxu1 %v11841_v32  ;;  %v11859_v32 = vld [vmem:[#allocation2 + $0x15a] sm:$0xff] }
 0x3b6   : > { %8776 = vmatprep.mubr.f32.mxu1 %v11844_v30  ;;  %12823 = vst [vmem:[#allocation14_spill] sm:$0xff] %v11859_v32  ;;  %v11862_v30 = vld [vmem:[#allocation2 + $0x16a] sm:$0xff] }
 0x3b7   : > { %12824 = vst [vmem:[#allocation15_spill] sm:$0xff] %v11862_v30 }
 0x3b9   : > { %8777 = vmatmul.mubr.f32.gmra.mrb[40].mxu1 %v11847_v18  ;;  %v11865_v18 = vld [vmem:[#allocation2 + $0x172] sm:$0xff] }
 0x3ba   : > { %8779 = vmatprep.mubr.f32.mxu1 %v11850_v11  ;;  %v6799_v11 = vld [vmem:[%s12650_s4 + $0x210] sm:$0xff] }
 0x3bd   : > { %8780 = vmatmul.mubr.f32.gmra.mrb[42].mxu1 %v11853_v8  ;;  %v6800_v8 = vld [vmem:[%s12650_s4 + $0x218] sm:$0xff] }
 0x3be   : > { %8782 = vmatprep.mubr.f32.mxu1 %v11856_v12  ;;  %v9768_v12 = vpack.c.bf16 %v6800_v8, %v6799_v11  ;;  %v6804_v11 = vld [vmem:[%s12650_s4 + $0x238] sm:$0xff]  ;;  %v6807_v8 = vld [vmem:[%s12650_s4 + $0x250] sm:$0xff] }
 0x3c1   : > { %8783 = vmatmul.mubr.f32.gmra.mrb[44].mxu1 %v11859_v32  ;;  %v6801_v32 = vld [vmem:[%s12650_s4 + $0x220] sm:$0xff] }
 0x3c2   : > { %8785 = vmatprep.mubr.f32.mxu1 %v11862_v30  ;;  %v6802_v30 = vld [vmem:[%s12650_s4 + $0x228] sm:$0xff] }
 0x3c3   : > { %v9772_v24 = vpack.c.bf16 %v6802_v30, %v6801_v32  ;;  %v6806_v30 = vld [vmem:[%s12650_s4 + $0x248] sm:$0xff] }
 0x3c5   : > { %8786 = vmatmul.mubr.f32.gmra.mrb[46].mxu1 %v11865_v18 }
 0x3c6   : > { %8820 = vmatprep.mubr.f32.mxu1 %v11603_v23  ;;  %v6803_v23 = vld [vmem:[%s12650_s4 + $0x230] sm:$0xff] }
 0x3c9   : > { %8821 = vmatmul.mubr.f32.vlgmr.msra.gmra.mrb[16].mxu1 %v11607_v63  ;;  %v9776_v63 = vpack.c.bf16 %v6804_v11, %v6803_v23  ;;  %v6810_v11 = vld [vmem:[%s12650_s4 + $0x268] sm:$0xff] }
 0x3ca   : > { %8823 = vmatprep.mubr.f32.mxu1 %v11616_v3  ;;  %9767 = vmatpush3.bf16.msra.mxu1 %v9764_v62  ;;  %v6805_v62 = vld [vmem:[%s12650_s4 + $0x240] sm:$0xff] }
 0x3cb   : > { %9769 = vmatprep.subr.bf16.mxu1 %v9768_v12  ;;  %v9780_v32 = vpack.c.bf16 %v6806_v30, %v6805_v62  ;;  %v6812_v30 = vld [vmem:[%s12650_s4 + $0x278] sm:$0xff] }
 0x3cd   : > { %8824 = vmatmul.mubr.f32.gmra.mrb[18].mxu1 %v11619_v48 }
 0x3ce   : > { %8826 = vmatprep.mubr.f32.mxu1 %v11628_v49  ;;  %9771 = vmatpush3.bf16.msra.mxu1 %v9768_v12  ;;  %v6808_v12 = vld [vmem:[%s12650_s4 + $0x258] sm:$0xff] }
 0x3cf   : > { %9773 = vmatprep.subr.bf16.mxu1 %v9772_v24  ;;  %v9784_v23 = vpack.c.bf16 %v6808_v12, %v6807_v8  ;;  %v6814_v12 = vld [vmem:[%s12650_s4 + $0x288] sm:$0xff] }
 0x3d1   : > { %8827 = vmatmul.mubr.f32.gmra.mrb[20].mxu1 %v11631_v36 }
 0x3d2   : > { %8829 = vmatprep.mubr.f32.mxu1 %v11640_v50  ;;  %9775 = vmatpush3.bf16.msra.mxu1 %v9772_v24  ;;  %v6809_v24 = vld [vmem:[%s12650_s4 + $0x260] sm:$0xff] }
 0x3d3   : > { %9777 = vmatprep.subr.bf16.mxu1 %v9776_v63  ;;  %v9788_v62 = vpack.c.bf16 %v6810_v11, %v6809_v24  ;;  %v11949_v11 = vld [vmem:[#allocation2 + $0x188] sm:$0xff] }
 0x3d4   : > { %12826 = vst [vmem:[#allocation17_spill] sm:$0xff] %v11949_v11 }
 0x3d5   : > { %8830 = vmatmul.mubr.f32.gmra.mrb[22].mxu1 %v11643_v31 }
 0x3d6   : > { %8832 = vmatprep.mubr.f32.mxu1 %v11652_v46  ;;  %9779 = vmatpush3.bf16.msra.mxu1 %v9776_v63  ;;  %v6811_v63 = vld [vmem:[%s12650_s4 + $0x270] sm:$0xff] }
 0x3d7   : > { %9781 = vmatprep.subr.bf16.mxu1 %v9780_v32  ;;  %v9792_v8 = vpack.c.bf16 %v6812_v30, %v6811_v63  ;;  %v6816_v63 = vld [vmem:[%s12650_s4 + $0x298] sm:$0xff] }
 0x3d8   : > { %v4422_v30 = vld [vmem:[#allocation2 + $0x19] sm:$0xff] }
 0x3d9   : > { %8833 = vmatmul.mubr.f32.gmra.mrb[24].mxu1 %v11655_v43 }
 0x3da   : > { %8835 = vmatprep.mubr.f32.mxu1 %v11664_v15  ;;  %9783 = vmatpush3.bf16.msra.mxu1 %v9780_v32  ;;  %v6813_v32 = vld [vmem:[%s12650_s4 + $0x280] sm:$0xff] }
 0x3db   : > { %9785 = vmatprep.subr.bf16.mxu1 %v9784_v23  ;;  %v9796_v24 = vpack.c.bf16 %v6814_v12, %v6813_v32  ;;  %v4423_v32 = vld [vmem:[#allocation2 + $0x21] sm:$0xff] }
 0x3dc   : > { %v6817_v12 = vld [vmem:[%s12650_s4 + $0x2a0] sm:$0xff] }
 0x3dd   : > { %8836 = vmatmul.mubr.f32.gmra.mrb[26].mxu1 %v11667_v16 }
 0x3de   : > { %8838 = vmatprep.mubr.f32.mxu1 %v11676_v13  ;;  %9787 = vmatpush3.bf16.msra.mxu1 %v9784_v23  ;;  %v11946_v23 = vld [vmem:[#allocation2 + $0x180] sm:$0xff] }
 0x3df   : > { %9789 = vmatprep.subr.bf16.mxu1 %v9788_v62  ;;  %12825 = vst [vmem:[#allocation16_spill] sm:$0xff] %v11946_v23 }
 0x3e1   : > { %8839 = vmatmul.mubr.f32.gmra.mrb[28].mxu1 %v11679_v26 }
 0x3e2   : > { %8841 = vmatprep.mubr.f32.mxu1 %v11682_v20  ;;  %9791 = vmatpush3.bf16.msra.mxu1 %v9788_v62  ;;  %v6815_v62 = vld [vmem:[%s12650_s4 + $0x290] sm:$0xff] }
 0x3e3   : > { %9793 = vmatprep.subr.bf16.mxu1 %v9792_v8 }
 0x3e5   : > { %8842 = vmatmul.mubr.f32.gmra.mrb[30].mxu1 %v11685_v33 }
 0x3e6   : > { %8844 = vmatprep.mubr.f32.mxu1 %v11688_v40  ;;  %9795 = vmatpush3.bf16.msra.mxu1 %v9792_v8  ;;  %v9800_v8 = vpack.c.bf16 %v6816_v63, %v6815_v62  ;;  %v6819_v62 = vld [vmem:[%s12650_s4 + $0x2b0] sm:$0xff]  ;;  %v6820_v63 = vld [vmem:[%s12650_s4 + $0x2b8] sm:$0xff] }
 0x3e7   : > { %9797 = vmatprep.subr.bf16.mxu1 %v9796_v24 }
 0x3e9   : > { %8845 = vmatmul.mubr.f32.gmra.mrb[32].mxu1 %v11691_v57 }
 0x3ea   : > { %8847 = vmatprep.mubr.f32.mxu1 %v11694_v59 }
 0x3ed   : > { %8848 = vmatmul.mubr.f32.gmra.mrb[34].mxu1 %v11697_v38 }
 0x3ee   : > { %8850 = vmatprep.mubr.f32.mxu1 %v11700_v27 }
 0x3f1   : > { %8851 = vmatmul.mubr.f32.gmra.mrb[36].mxu1 %v11703_v14 }
 0x3f2   : > { %8853 = vmatprep.mubr.f32.mxu1 %v11706_v56 }
 0x3f5   : > { %8854 = vmatmul.mubr.f32.gmra.mrb[38].mxu1 %v11709_v28 }
 0x3f6   : > { %8856 = vmatprep.mubr.f32.mxu1 %v11712_v51 }
 0x3f9   : > { %8857 = vmatmul.mubr.f32.gmra.mrb[40].mxu1 %v11715_v19 }
 0x3fa   : > { %8859 = vmatprep.mubr.f32.mxu1 %v11718_v60 }
 0x3fd   : > { %8860 = vmatmul.mubr.f32.gmra.mrb[42].mxu1 %v11721_v1 }
 0x3fe   : > { %8862 = vmatprep.mubr.f32.mxu1 %v11724_v5  ;;  %v11967_v5 = vld [vmem:[#allocation2 + $0x39] sm:$0xff] }
 0x3ff   : > { %12827 = vst [vmem:[#allocation18_spill] sm:$0xff] %v11967_v5 }
 0x401   : > { %8863 = vmatmul.mubr.f32.gmra.mrb[44].mxu1 %v11727_v7  ;;  %v11964_v7 = vld [vmem:[#allocation2 + $0x31] sm:$0xff] }
 0x402   : > { %8865 = vmatprep.mubr.f32.mxu1 %v11946_v23  ;;  %v6818_v23 = vld [vmem:[%s12650_s4 + $0x2a8] sm:$0xff] }
 0x405   : > { %8866 = vmatmul.mubr.f32.gmra.mrb[46].mxu1 %v11949_v11  ;;  %v9804_v11 = vpack.c.bf16 %v6818_v23, %v6817_v12  ;;  %v11979_v23 = vld [vmem:[#allocation2 + $0x51] sm:$0xff]  ;;  %v6822_v12 = vld [vmem:[%s12650_s4 + $0x2c8] sm:$0xff] }
 0x406   : > { %8900 = vmatprep.mubr.f32.mxu1 %v4422_v30  ;;  %v11976_v30 = vld [vmem:[#allocation2 + $0x49] sm:$0xff]  ;;  %12829 = vst [vmem:[#allocation20_spill] sm:$0xff] %v11979_v23 }
 0x407   : > { %12828 = vst [vmem:[#allocation19_spill] sm:$0xff] %v11976_v30 }
 0x409   : > { %8901 = vmatmul.mubr.f32.vlgmr.msra.gmra.mrb[16].mxu1 %v4423_v32  ;;  %v6821_v32 = vld [vmem:[%s12650_s4 + $0x2c0] sm:$0xff] }
 0x40a   : > { %8903 = vmatprep.mubr.f32.mxu1 %v11964_v7  ;;  %9799 = vmatpush3.bf16.msra.mxu1 %v9796_v24  ;;  %v9808_v24 = vpack.c.bf16 %v6820_v63, %v6819_v62  ;;  %v11991_v62 = vld [vmem:[#allocation2 + $0x69] sm:$0xff] }
 0x40b   : > { %9801 = vmatprep.subr.bf16.mxu1 %v9800_v8  ;;  %12831 = vst [vmem:[#allocation22_spill] sm:$0xff] %v11991_v62  ;;  %v6823_v63 = vld [vmem:[%s12650_s4 + $0x2d0] sm:$0xff] }
 0x40d   : > { %8904 = vmatmul.mubr.f32.gmra.mrb[18].mxu1 %v11967_v5  ;;  %v11988_v5 = vld [vmem:[#allocation2 + $0x61] sm:$0xff] }
 0x40e   : > { %8906 = vmatprep.mubr.f32.mxu1 %v11976_v30  ;;  %9803 = vmatpush3.bf16.msra.mxu1 %v9800_v8  ;;  %12830 = vst [vmem:[#allocation21_spill] sm:$0xff] %v11988_v5  ;;  %v9812_v8 = vpack.c.bf16 %v6822_v12, %v6821_v32  ;;  %v6824_v30 = vld [vmem:[%s12650_s4 + $0x2d8] sm:$0xff]  ;;  %v12003_v32 = vld [vmem:[#allocation2 + $0x81] sm:$0xff] }
 0x40f   : > { %9805 = vmatprep.subr.bf16.mxu1 %v9804_v11  ;;  %12833 = vst [vmem:[#allocation24_spill] sm:$0xff] %v12003_v32  ;;  %v6825_v12 = vld [vmem:[%s12650_s4 + $0x2e0] sm:$0xff] }
 0x411   : > { %8907 = vmatmul.mubr.f32.gmra.mrb[20].mxu1 %v11979_v23  ;;  %v12000_v23 = vld [vmem:[#allocation2 + $0x79] sm:$0xff] }
 0x412   : > { %8909 = vmatprep.mubr.f32.mxu1 %v11988_v5  ;;  %9807 = vmatpush3.bf16.msra.mxu1 %v9804_v11  ;;  %12832 = vst [vmem:[#allocation23_spill] sm:$0xff] %v12000_v23  ;;  %v9816_v11 = vpack.c.bf16 %v6824_v30, %v6823_v63  ;;  %v6826_v5 = vld [vmem:[%s12650_s4 + $0x2e8] sm:$0xff]  ;;  %v12015_v30 = vld [vmem:[#allocation2 + $0x99] sm:$0xff]  ;;  %v6827_v63 = vld [vmem:[%s12650_s4 + $0x2f0] sm:$0xff] }
 0x413   : > { %9809 = vmatprep.subr.bf16.mxu1 %v9808_v24  ;;  %12835 = vst [vmem:[#allocation26_spill] sm:$0xff] %v12015_v30 }
 0x415   : > { %8910 = vmatmul.mubr.f32.gmra.mrb[22].mxu1 %v11991_v62  ;;  %v12012_v62 = vld [vmem:[#allocation2 + $0x91] sm:$0xff] }
 0x416   : > { %8912 = vmatprep.mubr.f32.mxu1 %v12000_v23  ;;  %9811 = vmatpush3.bf16.msra.mxu1 %v9808_v24  ;;  %12834 = vst [vmem:[#allocation25_spill] sm:$0xff] %v12012_v62  ;;  %v9820_v24 = vpack.c.bf16 %v6826_v5, %v6825_v12  ;;  %v6828_v23 = vld [vmem:[%s12650_s4 + $0x2f8] sm:$0xff]  ;;  %v6829_v12 = vld [vmem:[%s12650_s4 + $0x300] sm:$0xff] }
 0x417   : > { %9813 = vmatprep.subr.bf16.mxu1 %v9812_v8  ;;  %v12027_v5 = vld [vmem:[#allocation2 + $0xb1] sm:$0xff] }
 0x418   : > { %12837 = vst [vmem:[#allocation28_spill] sm:$0xff] %v12027_v5 }
 0x419   : > { %8913 = vmatmul.mubr.f32.gmra.mrb[24].mxu1 %v12003_v32  ;;  %v12024_v32 = vld [vmem:[#allocation2 + $0xa9] sm:$0xff] }
 0x41a   : > { %8915 = vmatprep.mubr.f32.mxu1 %v12012_v62  ;;  %9815 = vmatpush3.bf16.msra.mxu1 %v9812_v8  ;;  %12836 = vst [vmem:[#allocation27_spill] sm:$0xff] %v12024_v32  ;;  %v9824_v8 = vpack.c.bf16 %v6828_v23, %v6827_v63  ;;  %v6830_v62 = vld [vmem:[%s12650_s4 + $0x308] sm:$0xff]  ;;  %v12042_v63 = vld [vmem:[#allocation2 + $0xd9] sm:$0xff] }
 0x41b   : > { %9817 = vmatprep.subr.bf16.mxu1 %v9816_v11  ;;  %v12039_v23 = vld [vmem:[#allocation2 + $0xc9] sm:$0xff] }
 0x41d   : > { %8916 = vmatmul.mubr.f32.gmra.mrb[26].mxu1 %v12015_v30  ;;  %v12036_v30 = vld [vmem:[#allocation2 + $0xc1] sm:$0xff] }
 0x41e   : > { %8918 = vmatprep.mubr.f32.mxu1 %v12024_v32  ;;  %9819 = vmatpush3.bf16.msra.mxu1 %v9816_v11  ;;  %v9828_v11 = vpack.c.bf16 %v6830_v62, %v6829_v12  ;;  %v12045_v32 = vld [vmem:[#allocation2 + $0xe1] sm:$0xff]  ;;  %v12055_v62 = vld [vmem:[#allocation2 + $0x111] sm:$0xff] }
 0x41f   : > { %9821 = vmatprep.subr.bf16.mxu1 %v9820_v24  ;;  %v6838_v12 = vld [vmem:[%s12650_s4 + $0x348] sm:$0xff] }
 0x421   : > { %8919 = vmatmul.mubr.f32.gmra.mrb[28].mxu1 %v12027_v5  ;;  %v12048_v5 = vld [vmem:[#allocation2 + $0xf1] sm:$0xff] }
 0x422   : > { %8921 = vmatprep.mubr.f32.mxu1 %v12036_v30  ;;  %9823 = vmatpush3.bf16.msra.mxu1 %v9820_v24  ;;  %v12051_v24 = vld [vmem:[#allocation2 + $0xf9] sm:$0xff] }
 0x423   : > { %9825 = vmatprep.subr.bf16.mxu1 %v9824_v8 }
 0x425   : > { %8922 = vmatmul.mubr.f32.gmra.mrb[30].mxu1 %v12039_v23 }
 0x426   : > { %8924 = vmatprep.mubr.f32.mxu1 %v12042_v63  ;;  %9827 = vmatpush3.bf16.msra.mxu1 %v9824_v8  ;;  %v6837_v8 = vld [vmem:[%s12650_s4 + $0x340] sm:$0xff] }
 0x427   : > { %9829 = vmatprep.subr.bf16.mxu1 %v9828_v11 }
 0x429   : > { %8925 = vmatmul.mubr.f32.gmra.mrb[32].mxu1 %v12045_v32 }
 0x42a   : > { %8927 = vmatprep.mubr.f32.mxu1 %v12048_v5 }
 0x42d   : > { %8928 = vmatmul.mubr.f32.gmra.mrb[34].mxu1 %v12051_v24 }
 0x42e   : > { %8930 = vmatprep.mubr.f32.mxu1 %v11516_v37  ;;  %v12838_v37 = vmax.f32 %v11579_v52, 0.0 }
 0x431   : > { %8931 = vmatmul.mubr.f32.gmra.mrb[36].mxu1 %v12055_v62 }
 0x432   : > { %8933 = vmatprep.mubr.f32.mxu1 %v11528_v25  ;;  %v6831_v25 = vld [vmem:[%s12650_s4 + $0x310] sm:$0xff] }
 0x435   : > { %8934 = vmatmul.mubr.f32.gmra.mrb[38].mxu1 %v11525_v41  ;;  %v6832_v41 = vld [vmem:[%s12650_s4 + $0x318] sm:$0xff] }
 0x436   : > { %8936 = vmatprep.mubr.f32.mxu1 %v11542_v21  ;;  %v9832_v21 = vpack.c.bf16 %v6832_v41, %v6831_v25  ;;  %v6839_v25 = vld [vmem:[%s12650_s4 + $0x350] sm:$0xff]  ;;  %v6841_v41 = vld [vmem:[%s12650_s4 + $0x360] sm:$0xff] }
 0x439   : > { %8937 = vmatmul.mubr.f32.gmra.mrb[40].mxu1 %v11538_v17  ;;  %v12839_v17 = vmax.f32 %v11575_v61, 0.0 }
 0x43a   : > { %8939 = vmatprep.mubr.f32.mxu1 %v11556_v58  ;;  %v6834_v58 = vld [vmem:[%s12650_s4 + $0x328] sm:$0xff] }
 0x43d   : > { %8940 = vmatmul.mubr.f32.gmra.mrb[42].mxu1 %v11552_v42  ;;  %v6833_v42 = vld [vmem:[%s12650_s4 + $0x320] sm:$0xff] }
 0x43e   : > { %8942 = vmatprep.mubr.f32.mxu1 %v11570_v10  ;;  %v6064_v10 = vld [vmem:[%s12653_s7 + $0x8] sm:$0xff]  ;;  %v9836_v61 = vpack.c.bf16 %v6834_v58, %v6833_v42  ;;  %v6843_v58 = vld [vmem:[%s12650_s4 + $0x370] sm:$0xff] }
 0x441   : > { %8943 = vmatmul.mubr.f32.gmra.mrb[44].mxu1 %v11566_v44  ;;  %v6063_v44 = vld [vmem:[%s12653_s7] sm:$0xff] }
 0x442   : > { %8945 = vmatprep.mubr.f32.mxu1 %v12838_v37  ;;  %v9924_v52 = vpack.c.bf16 %v6064_v10, %v6063_v44  ;;  %v6845_v44 = vld [vmem:[%s12650_s4 + $0x380] sm:$0xff]  ;;  %v6846_v10 = vld [vmem:[%s12650_s4 + $0x388] sm:$0xff] }
 0x444   : > { %9925 = vmatprep.subr.bf16.mxu0 %v9924_v52 }
 0x445   : > { %8946 = vmatmul.mubr.f32.gmra.mrb[46].mxu1 %v12839_v17  ;;  %9927 = vmatpush3.bf16.msra.mxu0 %v9924_v52  ;;  %v6842_v17 = vld [vmem:[%s12650_s4 + $0x368] sm:$0xff] }
 0x446   : > { %8980 = vmatprep.mubr.f32.mxu1 %v11742_v9  ;;  %v6835_v9 = vld [vmem:[%s12650_s4 + $0x330] sm:$0xff] }
 0x449   : > { %8981 = vmatmul.mubr.f32.vlgmr.msra.gmra.mrb[16].mxu1 %v11745_v45  ;;  %v6836_v45 = vld [vmem:[%s12650_s4 + $0x338] sm:$0xff] }
 0x44a   : > { %8983 = vmatprep.mubr.f32.mxu1 %v11754_v54  ;;  %9831 = vmatpush3.bf16.msra.mxu1 %v9828_v11  ;;  %v9840_v54 = vpack.c.bf16 %v6836_v45, %v6835_v9  ;;  %v9844_v11 = vpack.c.bf16 %v6838_v12, %v6837_v8  ;;  %v12840_v9 = vld [vmem:[#allocation33_spill] sm:$0xff]  ;;  %v12841_v45 = vld [vmem:[#allocation36_spill] sm:$0xff] }
 0x44b   : > { %9833 = vmatprep.subr.bf16.mxu1 %v9832_v21  ;;  %v6072_v8 = vld [vmem:[%s12653_s7 + $0x48] sm:$0xff] }
 0x44d   : > { %8984 = vmatmul.mubr.f32.gmra.mrb[18].mxu1 %v11757_v34  ;;  %v6065_v34 = vld [vmem:[%s12653_s7 + $0x10] sm:$0xff] }
 0x44e   : > { %8986 = vmatprep.mubr.f32.mxu1 %v11766_v47  ;;  %9835 = vmatpush3.bf16.msra.mxu1 %v9832_v21  ;;  %v6066_v47 = vld [vmem:[%s12653_s7 + $0x18] sm:$0xff]  ;;  %v9852_v21 = vpack.c.bf16 %v6842_v17, %v6841_v41  ;;  %v12848_v41 = vld [vmem:[#allocation10_spill] sm:$0xff] }
 0x44f   : > { %9837 = vmatprep.subr.bf16.mxu1 %v9836_v61  ;;  %v9928_v37 = vpack.c.bf16 %v6066_v47, %v6065_v34  ;;  %v12844_v34 = vld [vmem:[#allocation6_spill] sm:$0xff]  ;;  %v12845_v47 = vld [vmem:[#allocation7_spill] sm:$0xff] }
 0x450   : > { %v12849_v17 = vld [vmem:[#allocation11_spill] sm:$0xff] }
 0x451   : > { %8987 = vmatmul.mubr.f32.gmra.mrb[20].mxu1 %v11769_v22  ;;  %v6840_v22 = vld [vmem:[%s12650_s4 + $0x358] sm:$0xff]  ;;  %9929 = vmatprep.subr.bf16.mxu0 %v9928_v37 }
 0x452   : > { %8989 = vmatprep.mubr.f32.mxu1 %v11778_v39  ;;  %9839 = vmatpush3.bf16.msra.mxu1 %v9836_v61  ;;  %v9848_v39 = vpack.c.bf16 %v6840_v22, %v6839_v25  ;;  %v9860_v61 = vpack.c.bf16 %v6846_v10, %v6845_v44  ;;  %v12847_v25 = vld [vmem:[#allocation9_spill] sm:$0xff]  ;;  %v6074_v22 = vld [vmem:[%s12653_s7 + $0x58] sm:$0xff]  ;;  %v6077_v10 = vld [vmem:[%s12653_s7 + $0x70] sm:$0xff] }
 0x453   : > { %9841 = vmatprep.subr.bf16.mxu1 %v9840_v54  ;;  %9931 = vmatpush3.bf16.msra.mxu0 %v9928_v37  ;;  %v6073_v37 = vld [vmem:[%s12653_s7 + $0x50] sm:$0xff]  ;;  %v12190_v44 = vld [vmem:[#allocation2 + $0x182] sm:$0xff] }
 0x455   : > { %8990 = vmatmul.mubr.f32.gmra.mrb[22].mxu1 %v11781_v0  ;;  %v6067_v0 = vld [vmem:[%s12653_s7 + $0x20] sm:$0xff] }
 0x456   : > { %8992 = vmatprep.mubr.f32.mxu1 %v11790_v6  ;;  %9843 = vmatpush3.bf16.msra.mxu1 %v9840_v54  ;;  %v6068_v6 = vld [vmem:[%s12653_s7 + $0x28] sm:$0xff]  ;;  %v12843_v54 = vld [vmem:[#allocation40_spill] sm:$0xff] }
 0x457   : > { %9845 = vmatprep.subr.bf16.mxu1 %v9844_v11  ;;  %v9932_v42 = vpack.c.bf16 %v6068_v6, %v6067_v0  ;;  %v12850_v0 = vld [vmem:[#allocation12_spill] sm:$0xff] }
 0x458   : > { %v6075_v6 = vld [vmem:[%s12653_s7 + $0x60] sm:$0xff] }
 0x459   : > { %8993 = vmatmul.mubr.f32.gmra.mrb[24].mxu1 %v11793_v35  ;;  %v6844_v35 = vld [vmem:[%s12650_s4 + $0x378] sm:$0xff]  ;;  %9933 = vmatprep.subr.bf16.mxu0 %v9932_v42 }
 0x45a   : > { %8995 = vmatprep.mubr.f32.mxu1 %v11802_v29  ;;  %9847 = vmatpush3.bf16.msra.mxu1 %v9844_v11  ;;  %v9856_v29 = vpack.c.bf16 %v6844_v35, %v6843_v58  ;;  %v12846_v11 = vld [vmem:[#allocation8_spill] sm:$0xff]  ;;  %v12852_v35 = vld [vmem:[#allocation14_spill] sm:$0xff] }
 0x45b   : > { %9849 = vmatprep.subr.bf16.mxu1 %v9848_v39  ;;  %9935 = vmatpush3.bf16.msra.mxu0 %v9932_v42  ;;  %v6076_v42 = vld [vmem:[%s12653_s7 + $0x68] sm:$0xff] }
 0x45c   : > { %v9948_v58 = vpack.c.bf16 %v6076_v42, %v6075_v6  ;;  %v6860_v42 = vld [vmem:[%s12650_s4 + $0x3f8] sm:$0xff] }
 0x45d   : > { %8996 = vmatmul.mubr.f32.gmra.mrb[26].mxu1 %v11805_v55  ;;  %v6069_v55 = vld [vmem:[%s12653_s7 + $0x30] sm:$0xff] }
 0x45e   : > { %8998 = vmatprep.mubr.f32.mxu1 %v11814_v2  ;;  %9851 = vmatpush3.bf16.msra.mxu1 %v9848_v39  ;;  %v6070_v2 = vld [vmem:[%s12653_s7 + $0x38] sm:$0xff]  ;;  %v9944_v39 = vpack.c.bf16 %v6074_v22, %v6073_v37  ;;  %v6854_v37 = vld [vmem:[%s12650_s4 + $0x3c8] sm:$0xff]  ;;  %v6855_v22 = vld [vmem:[%s12650_s4 + $0x3d0] sm:$0xff] }
 0x45f   : > { %9853 = vmatprep.subr.bf16.mxu1 %v9852_v21  ;;  %v9936_v52 = vpack.c.bf16 %v6070_v2, %v6069_v55  ;;  %v6078_v55 = vld [vmem:[%s12653_s7 + $0x78] sm:$0xff] }
 0x460   : > { %v9952_v2 = vpack.c.bf16 %v6078_v55, %v6077_v10  ;;  %v6894_v55 = vld [vmem:[%s10660_s16 + $0xc9] sm:$0xff] }
 0x461   : > { %8999 = vmatmul.mubr.f32.gmra.mrb[28].mxu1 %v11817_v4  ;;  %9937 = vmatprep.subr.bf16.mxu0 %v9936_v52  ;;  %v12842_v4 = vld [vmem:[#allocation37_spill] sm:$0xff] }
 0x462   : > { %9001 = vmatprep.mubr.f32.mxu1 %v11820_v53  ;;  %9855 = vmatpush3.bf16.msra.mxu1 %v9852_v21  ;;  %v6071_v53 = vld [vmem:[%s12653_s7 + $0x40] sm:$0xff]  ;;  %v12851_v21 = vld [vmem:[#allocation13_spill] sm:$0xff] }
 0x463   : > { %9857 = vmatprep.subr.bf16.mxu1 %v9856_v29  ;;  %9939 = vmatpush3.bf16.msra.mxu0 %v9936_v52  ;;  %v9940_v12 = vpack.c.bf16 %v6072_v8, %v6071_v53  ;;  %v12199_v52 = vld [vmem:[#allocation2 + $0x18a] sm:$0xff]  ;;  %v6849_v53 = vld [vmem:[%s12650_s4 + $0x3a0] sm:$0xff] }
 0x464   : > { %v6880_v8 = vld [vmem:[%s10660_s16 + $0x21] sm:$0xff] }
 0x465   : > { %9002 = vmatmul.mubr.f32.gmra.mrb[30].mxu1 %v12840_v9  ;;  %9941 = vmatprep.subr.bf16.mxu0 %v9940_v12  ;;  %v6848_v9 = vld [vmem:[%s12650_s4 + $0x398] sm:$0xff] }
 0x466   : > { %9004 = vmatprep.mubr.f32.mxu1 %v12841_v45  ;;  %9859 = vmatpush3.bf16.msra.mxu1 %v9856_v29  ;;  %v12853_v29 = vld [vmem:[#allocation15_spill] sm:$0xff] }
 0x467   : > { %9861 = vmatprep.subr.bf16.mxu1 %v9860_v61  ;;  %9943 = vmatpush3.bf16.msra.mxu0 %v9940_v12  ;;  %v6879_v45 = vld [vmem:[%s10660_s16 + $0x19] sm:$0xff] }
 0x468   : > { %9945 = vmatprep.subr.bf16.mxu0 %v9944_v39  ;;  %9300 = vmatprep.mubr.f32.mxu0 %v6879_v45  ;;  %v12856_v45 = vld [vmem:[#allocation16_spill] sm:$0xff] }
 0x469   : > { %9005 = vmatmul.mubr.f32.gmra.mrb[32].mxu1 %v12842_v4 }
 0x46a   : > { %9007 = vmatprep.mubr.f32.mxu1 %v12843_v54  ;;  %v6850_v54 = vld [vmem:[%s12650_s4 + $0x3a8] sm:$0xff] }
 0x46b   : > { %9947 = vmatpush3.bf16.msra.mxu0 %v9944_v39  ;;  %v9868_v12 = vpack.c.bf16 %v6850_v54, %v6849_v53  ;;  %v6856_v39 = vld [vmem:[%s12650_s4 + $0x3d8] sm:$0xff]  ;;  %v6909_v54 = vld [vmem:[%s10660_s16 + $0x181] sm:$0xff] }
 0x46c   : > { %9949 = vmatprep.subr.bf16.mxu0 %v9948_v58  ;;  %v6908_v53 = vld [vmem:[%s10660_s16 + $0x171] sm:$0xff] }
 0x46d   : > { %9008 = vmatmul.mubr.f32.gmra.mrb[34].mxu1 %v12844_v34  ;;  %v6851_v34 = vld [vmem:[%s12650_s4 + $0x3b0] sm:$0xff] }
 0x46e   : > { %9010 = vmatprep.mubr.f32.mxu1 %v12845_v47  ;;  %v6852_v47 = vld [vmem:[%s12650_s4 + $0x3b8] sm:$0xff] }
 0x46f   : > { %9951 = vmatpush3.bf16.msra.mxu0 %v9948_v58 }
 0x470   : > { %9953 = vmatprep.subr.bf16.mxu0 %v9952_v2 }
 0x471   : > { %9011 = vmatmul.mubr.f32.gmra.mrb[36].mxu1 %v12846_v11  ;;  %v6853_v11 = vld [vmem:[%s12650_s4 + $0x3c0] sm:$0xff] }
 0x472   : > { %9013 = vmatprep.mubr.f32.mxu1 %v12847_v25  ;;  %v9876_v25 = vpack.c.bf16 %v6854_v37, %v6853_v11  ;;  %v6868_v37 = vld [vmem:[%s12650_s4 + $0x438] sm:$0xff] }
 0x473   : > { %9955 = vmatpush3.bf16.msra.mxu0 %v9952_v2  ;;  %v6897_v2 = vld [vmem:[%s10660_s16 + $0xf1] sm:$0xff] }
 0x475   : > { %9014 = vmatmul.mubr.f32.gmra.mrb[38].mxu1 %v12848_v41  ;;  %v9880_v41 = vpack.c.bf16 %v6856_v39, %v6855_v22  ;;  %v6869_v22 = vld [vmem:[%s12650_s4 + $0x440] sm:$0xff]  ;;  %v6870_v39 = vld [vmem:[%s12650_s4 + $0x448] sm:$0xff] }
 0x476   : > { %9016 = vmatprep.mubr.f32.mxu1 %v12849_v17  ;;  %9301 = vmatmul.mubr.f32.vlgmr.msra.gmra.mrb[32].mxu0 %v6880_v8  ;;  %v6857_v17 = vld [vmem:[%s12650_s4 + $0x3e0] sm:$0xff]  ;;  %v6863_v8 = vld [vmem:[%s12650_s4 + $0x410] sm:$0xff] }
 0x479   : > { %9017 = vmatmul.mubr.f32.gmra.mrb[40].mxu1 %v12850_v0  ;;  %v6858_v0 = vld [vmem:[%s12650_s4 + $0x3e8] sm:$0xff] }
 0x47a   : > { %9019 = vmatprep.mubr.f32.mxu1 %v12851_v21  ;;  %v9884_v6 = vpack.c.bf16 %v6858_v0, %v6857_v17  ;;  %v6859_v21 = vld [vmem:[%s12650_s4 + $0x3f0] sm:$0xff]  ;;  %v6872_v0 = vld [vmem:[%s12650_s4 + $0x458] sm:$0xff] }
 0x47b   : > { %v9888_v58 = vpack.c.bf16 %v6860_v42, %v6859_v21  ;;  %v6871_v17 = vld [vmem:[%s12650_s4 + $0x450] sm:$0xff]  ;;  %v6873_v21 = vld [vmem:[%s12650_s4 + $0x460] sm:$0xff]  ;;  %v6874_v42 = vld [vmem:[%s12650_s4 + $0x468] sm:$0xff] }
 0x47d   : > { %9020 = vmatmul.mubr.f32.gmra.mrb[42].mxu1 %v12852_v35  ;;  %v6861_v35 = vld [vmem:[%s12650_s4 + $0x400] sm:$0xff] }
 0x47e   : > { %9022 = vmatprep.mubr.f32.mxu1 %v12853_v29  ;;  %v6862_v29 = vld [vmem:[%s12650_s4 + $0x408] sm:$0xff] }
 0x47f   : > { %v12280_v10 = vpack.c.bf16 %v6862_v29, %v6861_v35  ;;  %v6875_v35 = vld [vmem:[%s12650_s4 + $0x470] sm:$0xff]  ;;  %v6876_v29 = vld [vmem:[%s12650_s4 + $0x478] sm:$0xff] }
 0x481   : > { %9023 = vmatmul.mubr.f32.gmra.mrb[44].mxu1 %v11865_v18  ;;  %v6847_v18 = vld [vmem:[%s12650_s4 + $0x390] sm:$0xff] }
 0x482   : > { %9025 = vmatprep.mubr.f32.mxu1 %v12190_v44  ;;  %v9864_v4 = vpack.c.bf16 %v6848_v9, %v6847_v18  ;;  %v12854_v18 = vld [vmem:[#allocation29_spill] sm:$0xff]  ;;  %v12855_v9 = vld [vmem:[#allocation32_spill] sm:$0xff] }
 0x485   : > { %9026 = vmatmul.mubr.f32.gmra.mrb[46].mxu1 %v12199_v52 }
 0x486   : > { %9060 = vmatprep.mubr.f32.mxu1 %v11616_v3  ;;  %v6881_v3 = vld [vmem:[%s10660_s16 + $0x31] sm:$0xff] }
 0x487   : > { %9303 = vmatprep.mubr.f32.mxu0 %v6881_v3  ;;  %v6864_v3 = vld [vmem:[%s12650_s4 + $0x418] sm:$0xff] }
 0x489   : > { %9061 = vmatmul.mubr.f32.vlgmr.msra.gmra.mrb[16].mxu1 %v11619_v48  ;;  %v6882_v48 = vld [vmem:[%s10660_s16 + $0x39] sm:$0xff] }
 0x48a   : > { %9063 = vmatprep.mubr.f32.mxu1 %v11628_v49  ;;  %9863 = vmatpush3.bf16.msra.mxu1 %v9860_v61  ;;  %v6883_v49 = vld [vmem:[%s10660_s16 + $0x49] sm:$0xff]  ;;  %v9872_v61 = vpack.c.bf16 %v6852_v47, %v6851_v34  ;;  %v9896_v34 = vpack.c.bf16 %v6864_v3, %v6863_v8  ;;  %v6865_v47 = vld [vmem:[%s12650_s4 + $0x420] sm:$0xff]  ;;  %v5663_v8 = vld [vmem:[#allocation2 + $0xf2] sm:$0xff] }
 0x48b   : > { %9865 = vmatprep.subr.bf16.mxu1 %v9864_v4  ;;  %9304 = vmatmul.mubr.f32.gmra.mrb[34].mxu0 %v6882_v48  ;;  %v6866_v48 = vld [vmem:[%s12650_s4 + $0x428] sm:$0xff]  ;;  %v5664_v3 = vld [vmem:[#allocation2 + $0xfa] sm:$0xff] }
 0x48c   : > { %9306 = vmatprep.mubr.f32.mxu0 %v6883_v49  ;;  %v12858_v49 = vld [vmem:[#allocation18_spill] sm:$0xff]  ;;  %v9900_v11 = vpack.c.bf16 %v6866_v48, %v6865_v47  ;;  %v5667_v47 = vld [vmem:[#allocation2 + $0x122] sm:$0xff] }
 0x48d   : > { %9064 = vmatmul.mubr.f32.gmra.mrb[18].mxu1 %v11631_v36  ;;  %v6884_v36 = vld [vmem:[%s10660_s16 + $0x51] sm:$0xff] }
 0x48e   : > { %9066 = vmatprep.mubr.f32.mxu1 %v11640_v50  ;;  %9867 = vmatpush3.bf16.msra.mxu1 %v9864_v4  ;;  %v6885_v50 = vld [vmem:[%s10660_s16 + $0x61] sm:$0xff]  ;;  %v5668_v48 = vld [vmem:[#allocation2 + $0x12a] sm:$0xff] }
 0x48f   : > { %9869 = vmatprep.subr.bf16.mxu1 %v9868_v12  ;;  %9307 = vmatmul.mubr.f32.gmra.mrb[36].mxu0 %v6884_v36  ;;  %v12857_v4 = vld [vmem:[#allocation17_spill] sm:$0xff]  ;;  %v12860_v36 = vld [vmem:[#allocation20_spill] sm:$0xff] }
 0x490   : > { %9309 = vmatprep.mubr.f32.mxu0 %v6885_v50  ;;  %v12861_v50 = vld [vmem:[#allocation21_spill] sm:$0xff] }
 0x491   : > { %9067 = vmatmul.mubr.f32.gmra.mrb[20].mxu1 %v11643_v31  ;;  %v6886_v31 = vld [vmem:[%s10660_s16 + $0x69] sm:$0xff] }
 0x492   : > { %9069 = vmatprep.mubr.f32.mxu1 %v11652_v46  ;;  %9871 = vmatpush3.bf16.msra.mxu1 %v9868_v12  ;;  %v6887_v46 = vld [vmem:[%s10660_s16 + $0x79] sm:$0xff]  ;;  %v6910_v12 = vld [vmem:[%s10660_s16 + $0x189] sm:$0xff] }
 0x493   : > { %9873 = vmatprep.subr.bf16.mxu1 %v9872_v61  ;;  %9310 = vmatmul.mubr.f32.gmra.mrb[38].mxu0 %v6886_v31  ;;  %v12862_v31 = vld [vmem:[#allocation22_spill] sm:$0xff] }
 0x494   : > { %9312 = vmatprep.mubr.f32.mxu0 %v6887_v46  ;;  %v12863_v46 = vld [vmem:[#allocation23_spill] sm:$0xff] }
 0x495   : > { %9070 = vmatmul.mubr.f32.gmra.mrb[22].mxu1 %v11655_v43  ;;  %v6888_v43 = vld [vmem:[%s10660_s16 + $0x81] sm:$0xff] }
 0x496   : > { %9072 = vmatprep.mubr.f32.mxu1 %v11664_v15  ;;  %9875 = vmatpush3.bf16.msra.mxu1 %v9872_v61  ;;  %v6889_v15 = vld [vmem:[%s10660_s16 + $0x91] sm:$0xff] }
 0x497   : > { %9877 = vmatprep.subr.bf16.mxu1 %v9876_v25  ;;  %9313 = vmatmul.mubr.f32.gmra.mrb[40].mxu0 %v6888_v43  ;;  %v12859_v61 = vld [vmem:[#allocation19_spill] sm:$0xff]  ;;  %v12864_v43 = vld [vmem:[#allocation24_spill] sm:$0xff] }
 0x498   : > { %9315 = vmatprep.mubr.f32.mxu0 %v6889_v15  ;;  %v12865_v15 = vld [vmem:[#allocation25_spill] sm:$0xff] }
 0x499   : > { %9073 = vmatmul.mubr.f32.gmra.mrb[24].mxu1 %v11667_v16  ;;  %v6890_v16 = vld [vmem:[%s10660_s16 + $0x99] sm:$0xff] }
 0x49a   : > { %9075 = vmatprep.mubr.f32.mxu1 %v11676_v13  ;;  %9879 = vmatpush3.bf16.msra.mxu1 %v9876_v25  ;;  %v6891_v13 = vld [vmem:[%s10660_s16 + $0xa9] sm:$0xff] }
 0x49b   : > { %9881 = vmatprep.subr.bf16.mxu1 %v9880_v41  ;;  %9316 = vmatmul.mubr.f32.gmra.mrb[42].mxu0 %v6890_v16  ;;  %v12866_v16 = vld [vmem:[#allocation26_spill] sm:$0xff] }
 0x49c   : > { %9318 = vmatprep.mubr.f32.mxu0 %v6891_v13  ;;  %v12867_v13 = vld [vmem:[#allocation27_spill] sm:$0xff] }
 0x49d   : > { %9076 = vmatmul.mubr.f32.gmra.mrb[26].mxu1 %v11679_v26  ;;  %v6892_v26 = vld [vmem:[%s10660_s16 + $0xb1] sm:$0xff] }
 0x49e   : > { %9078 = vmatprep.mubr.f32.mxu1 %v11682_v20  ;;  %9883 = vmatpush3.bf16.msra.mxu1 %v9880_v41  ;;  %v6893_v20 = vld [vmem:[%s10660_s16 + $0xc1] sm:$0xff]  ;;  %v9908_v41 = vpack.c.bf16 %v6870_v39, %v6869_v22 }
 0x49f   : > { %9885 = vmatprep.subr.bf16.mxu1 %v9884_v6  ;;  %9319 = vmatmul.mubr.f32.gmra.mrb[44].mxu0 %v6892_v26  ;;  %v12868_v26 = vld [vmem:[#allocation28_spill] sm:$0xff] }
 0x4a0   : > { %9321 = vmatprep.mubr.f32.mxu0 %v6893_v20  ;;  %v9920_v20 = vpack.c.bf16 %v6876_v29, %v6875_v35 }
 0x4a1   : > { %9079 = vmatmul.mubr.f32.gmra.mrb[28].mxu1 %v11685_v33  ;;  %v6895_v33 = vld [vmem:[%s10660_s16 + $0xd9] sm:$0xff] }
 0x4a2   : > { %9081 = vmatprep.mubr.f32.mxu1 %v11688_v40  ;;  %9887 = vmatpush3.bf16.msra.mxu1 %v9884_v6  ;;  %v6896_v40 = vld [vmem:[%s10660_s16 + $0xe1] sm:$0xff]  ;;  %v9912_v6 = vpack.c.bf16 %v6872_v0, %v6871_v17 }
 0x4a3   : > { %9889 = vmatprep.subr.bf16.mxu1 %v9888_v58  ;;  %9322 = vmatmul.mubr.f32.gmra.mrb[46].mxu0 %v6894_v55  ;;  %v5362_v55 = vld [vmem:[#allocation2 + $0x129] sm:$0xff] }
 0x4a4   : > { %9324 = vmatprep.mubr.f32.mxu0 %v6895_v33  ;;  %v5365_v33 = vld [vmem:[#allocation2 + $0x151] sm:$0xff] }
 0x4a5   : > { %9082 = vmatmul.mubr.f32.gmra.mrb[30].mxu1 %v11691_v57  ;;  %v6898_v57 = vld [vmem:[%s10660_s16 + $0xf9] sm:$0xff] }
 0x4a6   : > { %9084 = vmatprep.mubr.f32.mxu1 %v11694_v59  ;;  %9891 = vmatpush3.bf16.msra.mxu1 %v9888_v58  ;;  %v6899_v59 = vld [vmem:[%s10660_s16 + $0x109] sm:$0xff]  ;;  %v9916_v58 = vpack.c.bf16 %v6874_v42, %v6873_v21 }
 0x4a7   : > { %9893 = vmatprep.subr.bf16.mxu1 %v12280_v10  ;;  %9325 = vmatmul.mubr.f32.gmra.mrb[48].mxu0 %v6896_v40  ;;  %v5368_v40 = vld [vmem:[#allocation2 + $0x171] sm:$0xff] }
 0x4a8   : > { %9327 = vmatprep.mubr.f32.mxu0 %v6897_v2  ;;  %v5371_v2 = vld [vmem:[#allocation2 + $0x199] sm:$0xff] }
 0x4a9   : > { %9085 = vmatmul.mubr.f32.gmra.mrb[32].mxu1 %v11697_v38  ;;  %v6900_v38 = vld [vmem:[%s10660_s16 + $0x111] sm:$0xff] }
 0x4aa   : > { %9087 = vmatprep.mubr.f32.mxu1 %v11700_v27  ;;  %v6901_v27 = vld [vmem:[%s10660_s16 + $0x121] sm:$0xff] }
 0x4ab   : > { %9328 = vmatmul.mubr.f32.gmra.mrb[50].mxu0 %v6898_v57  ;;  %v5372_v57 = vld [vmem:[#allocation2 + $0x1a1] sm:$0xff] }
 0x4ac   : > { %9330 = vmatprep.mubr.f32.mxu0 %v6899_v59  ;;  %v5647_v59 = vld [vmem:[#allocation2 + $0x32] sm:$0xff] }
 0x4ad   : > { %9088 = vmatmul.mubr.f32.gmra.mrb[34].mxu1 %v11703_v14  ;;  %v6902_v14 = vld [vmem:[%s10660_s16 + $0x129] sm:$0xff] }
 0x4ae   : > { %9090 = vmatprep.mubr.f32.mxu1 %v11706_v56  ;;  %v6903_v56 = vld [vmem:[%s10660_s16 + $0x139] sm:$0xff] }
 0x4af   : > { %9331 = vmatmul.mubr.f32.gmra.mrb[52].mxu0 %v6900_v38  ;;  %v5648_v38 = vld [vmem:[#allocation2 + $0x3a] sm:$0xff] }
 0x4b0   : > { %9333 = vmatprep.mubr.f32.mxu0 %v6901_v27  ;;  %v5649_v27 = vld [vmem:[#allocation2 + $0x4a] sm:$0xff] }
 0x4b1   : > { %9091 = vmatmul.mubr.f32.gmra.mrb[36].mxu1 %v11709_v28  ;;  %v6904_v28 = vld [vmem:[%s10660_s16 + $0x141] sm:$0xff] }
 0x4b2   : > { %9093 = vmatprep.mubr.f32.mxu1 %v11712_v51  ;;  %v6905_v51 = vld [vmem:[%s10660_s16 + $0x151] sm:$0xff] }
 0x4b3   : > { %9334 = vmatmul.mubr.f32.gmra.mrb[54].mxu0 %v6902_v14  ;;  %v5650_v14 = vld [vmem:[#allocation2 + $0x52] sm:$0xff] }
 0x4b4   : > { %9336 = vmatprep.mubr.f32.mxu0 %v6903_v56  ;;  %v5651_v56 = vld [vmem:[#allocation2 + $0x62] sm:$0xff] }
 0x4b5   : > { %9094 = vmatmul.mubr.f32.gmra.mrb[38].mxu1 %v11715_v19  ;;  %v6906_v19 = vld [vmem:[%s10660_s16 + $0x159] sm:$0xff] }
 0x4b6   : > { %9096 = vmatprep.mubr.f32.mxu1 %v11718_v60  ;;  %v6907_v60 = vld [vmem:[%s10660_s16 + $0x169] sm:$0xff] }
 0x4b7   : > { %9337 = vmatmul.mubr.f32.gmra.mrb[56].mxu0 %v6904_v28  ;;  %v5652_v28 = vld [vmem:[#allocation2 + $0x6a] sm:$0xff] }
 0x4b8   : > { %9339 = vmatprep.mubr.f32.mxu0 %v6905_v51  ;;  %v5654_v51 = vld [vmem:[#allocation2 + $0x82] sm:$0xff] }
 0x4b9   : > { %9097 = vmatmul.mubr.f32.gmra.mrb[40].mxu1 %v11721_v1  ;;  %v10507_v1 = vld [vmem:[#allocation2] sm:$0xff] }
 0x4ba   : > { %9099 = vmatprep.mubr.f32.mxu1 %v12854_v18  ;;  %v5653_v18 = vld [vmem:[#allocation2 + $0x7a] sm:$0xff] }
 0x4bb   : > { %9340 = vmatmul.mubr.f32.gmra.mrb[58].mxu0 %v6906_v19  ;;  %v5656_v19 = vld [vmem:[#allocation2 + $0x9a] sm:$0xff] }
 0x4bc   : > { %9342 = vmatprep.mubr.f32.mxu0 %v6907_v60  ;;  %v5658_v60 = vld [vmem:[#allocation2 + $0xb2] sm:$0xff] }
 0x4bd   : > { %9100 = vmatmul.mubr.f32.gmra.mrb[42].mxu1 %v12855_v9  ;;  %v5655_v9 = vld [vmem:[#allocation2 + $0x92] sm:$0xff] }
 0x4be   : > { %9102 = vmatprep.mubr.f32.mxu1 %v12856_v45  ;;  %v5657_v45 = vld [vmem:[#allocation2 + $0xaa] sm:$0xff] }
 0x4bf   : > { %9343 = vmatmul.mubr.f32.gmra.mrb[60].mxu0 %v6908_v53  ;;  %v5660_v53 = vld [vmem:[#allocation2 + $0xca] sm:$0xff] }
 0x4c0   : > { %9345 = vmatprep.mubr.f32.mxu0 %v6909_v54  ;;  %v5662_v54 = vld [vmem:[#allocation2 + $0xe2] sm:$0xff] }
 0x4c1   : > { %9103 = vmatmul.mubr.f32.gmra.mrb[44].mxu1 %v12857_v4  ;;  %v5659_v4 = vld [vmem:[#allocation2 + $0xc2] sm:$0xff] }
 0x4c2   : > { %9105 = vmatprep.mubr.f32.mxu1 %v10507_v1 }
 0x4c3   : > { %9346 = vmatmul.mubr.f32.gmra.mrb[62].mxu0 %v6910_v12  ;;  %v5665_v12 = vld [vmem:[#allocation2 + $0x10a] sm:$0xff] }
 0x4c5   : > { %9106 = vmatmul.mubr.f32.gmra.mrb[46].mxu1 %v10507_v1  ;;  %v5661_v1 = vld [vmem:[#allocation2 + $0xda] sm:$0xff] }
 0x4c6   : > { %9140 = vmatprep.mubr.f32.mxu1 %v11964_v7  ;;  %v6867_v7 = vld [vmem:[%s12650_s4 + $0x430] sm:$0xff] }
 0x4c7   : > { %v9904_v25 = vpack.c.bf16 %v6868_v37, %v6867_v7  ;;  %v5672_v7 = vld [vmem:[#allocation2 + $0x15a] sm:$0xff]  ;;  %v5673_v37 = vld [vmem:[#allocation2 + $0x16a] sm:$0xff] }
 0x4c9   : > { %9141 = vmatmul.mubr.f32.vlgmr.msra.gmra.mrb[16].mxu1 %v12858_v49  ;;  %v5669_v49 = vld [vmem:[#allocation2 + $0x13a] sm:$0xff] }
 0x4ca   : > { %9143 = vmatprep.mubr.f32.mxu1 %v12859_v61  ;;  %9895 = vmatpush3.bf16.msra.mxu1 %v12280_v10  ;;  %v5359_v10 = vld [vmem:[#allocation2 + $0x109] sm:$0xff] }
 0x4cb   : > { %9897 = vmatprep.subr.bf16.mxu1 %v9896_v34  ;;  %v5670_v61 = vld [vmem:[#allocation2 + $0x142] sm:$0xff] }
 0x4cd   : > { %9144 = vmatmul.mubr.f32.gmra.mrb[18].mxu1 %v12860_v36  ;;  %v5674_v36 = vld [vmem:[#allocation2 + $0x172] sm:$0xff] }
 0x4ce   : > { %9146 = vmatprep.mubr.f32.mxu1 %v12861_v50  ;;  %9899 = vmatpush3.bf16.msra.mxu1 %v9896_v34  ;;  %v5666_v34 = vld [vmem:[#allocation2 + $0x112] sm:$0xff]  ;;  %v5677_v50 = vld [vmem:[#allocation2 + $0x19a] sm:$0xff] }
 0x4cf   : > { %9901 = vmatprep.subr.bf16.mxu1 %v9900_v11 }
 0x4d1   : > { %9147 = vmatmul.mubr.f32.gmra.mrb[20].mxu1 %v12862_v31 }
 0x4d2   : > { %9149 = vmatprep.mubr.f32.mxu1 %v12863_v46  ;;  %9903 = vmatpush3.bf16.msra.mxu1 %v9900_v11  ;;  %v5671_v11 = vld [vmem:[#allocation2 + $0x152] sm:$0xff] }
 0x4d3   : > { %9905 = vmatprep.subr.bf16.mxu1 %v9904_v25 }
 0x4d5   : > { %9150 = vmatmul.mubr.f32.gmra.mrb[22].mxu1 %v12864_v43 }
 0x4d6   : > { %9152 = vmatprep.mubr.f32.mxu1 %v12865_v15  ;;  %9907 = vmatpush3.bf16.msra.mxu1 %v9904_v25  ;;  %v5678_v25 = vld [vmem:[#allocation2 + $0x1a2] sm:$0xff] }
 0x4d7   : > { %9909 = vmatprep.subr.bf16.mxu1 %v9908_v41 }
 0x4d9   : > { %9153 = vmatmul.mubr.f32.gmra.mrb[24].mxu1 %v12866_v16 }
 0x4da   : > { %9155 = vmatprep.mubr.f32.mxu1 %v12867_v13  ;;  %9911 = vmatpush3.bf16.msra.mxu1 %v9908_v41 }
 0x4db   : > { %9913 = vmatprep.subr.bf16.mxu1 %v9912_v6 }
 0x4dd   : > { %9156 = vmatmul.mubr.f32.gmra.mrb[26].mxu1 %v12868_v26 }
 0x4de   : > { %9158 = vmatprep.mubr.f32.mxu1 %v12036_v30  ;;  %9915 = vmatpush3.bf16.msra.mxu1 %v9912_v6  ;;  %v5361_v30 = vld [vmem:[#allocation2 + $0x121] sm:$0xff] }
 0x4df   : > { %9917 = vmatprep.subr.bf16.mxu1 %v9916_v58 }
 0x4e1   : > { %9159 = vmatmul.mubr.f32.gmra.mrb[28].mxu1 %v12039_v23  ;;  %v5363_v23 = vld [vmem:[#allocation2 + $0x139] sm:$0xff] }
 0x4e2   : > { %9161 = vmatprep.mubr.f32.mxu1 %v12042_v63  ;;  %9919 = vmatpush3.bf16.msra.mxu1 %v9916_v58  ;;  %v5364_v63 = vld [vmem:[#allocation2 + $0x141] sm:$0xff] }
 0x4e3   : > { %9921 = vmatprep.subr.bf16.mxu1 %v9920_v20 }
 0x4e5   : > { %9162 = vmatmul.mubr.f32.gmra.mrb[30].mxu1 %v12045_v32  ;;  %v5366_v32 = vld [vmem:[#allocation2 + $0x159] sm:$0xff] }
 0x4e6   : > { %9164 = vmatprep.mubr.f32.mxu1 %v12048_v5  ;;  %9923 = vmatpush3.bf16.msra.mxu1 %v9920_v20  ;;  %v5367_v5 = vld [vmem:[#allocation2 + $0x169] sm:$0xff] }
 0x4e9   : > { %9165 = vmatmul.mubr.f32.gmra.mrb[32].mxu1 %v12051_v24  ;;  %v5369_v24 = vld [vmem:[#allocation2 + $0x181] sm:$0xff] }
 0x4ea   : > { %9167 = vmatprep.mubr.f32.mxu1 %v5359_v10 }
 0x4ed   : > { %9168 = vmatmul.mubr.f32.gmra.mrb[34].mxu1 %v12055_v62  ;;  %v5370_v62 = vld [vmem:[#allocation2 + $0x189] sm:$0xff] }
 0x4ee   : > { %9170 = vmatprep.mubr.f32.mxu1 %v5361_v30 }
 0x4f1   : > { %9171 = vmatmul.mubr.f32.gmra.mrb[36].mxu1 %v5362_v55 }
 0x4f2   : > { %9173 = vmatprep.mubr.f32.mxu1 %v5363_v23 }
 0x4f5   : > { %9174 = vmatmul.mubr.f32.gmra.mrb[38].mxu1 %v5364_v63 }
 0x4f6   : > { %9176 = vmatprep.mubr.f32.mxu1 %v5365_v33 }
 0x4f9   : > { %9177 = vmatmul.mubr.f32.gmra.mrb[40].mxu1 %v5366_v32 }
 0x4fa   : > { %9179 = vmatprep.mubr.f32.mxu1 %v5367_v5 }
 0x4fd   : > { %9180 = vmatmul.mubr.f32.gmra.mrb[42].mxu1 %v5368_v40 }
 0x4fe   : > { %9182 = vmatprep.mubr.f32.mxu1 %v5369_v24 }
 0x501   : > { %9183 = vmatmul.mubr.f32.gmra.mrb[44].mxu1 %v5370_v62  ;;  %v12434_v62 = vld [vmem:[%s12654_s8] ss:$0 sm:$0xff] }
 0x502   : > { %9185 = vmatprep.mubr.f32.mxu1 %v5371_v2 }
 0x505   : > { %9186 = vmatmul.mubr.f32.gmra.mrb[46].mxu1 %v5372_v57 }
 0x506   : > { %9220 = vmatprep.mubr.f32.mxu1 %v5647_v59  ;;  %v12440_v59 = vld [vmem:[%s12651_s5] ss:$0 sm:$0xff] }
 0x509   : > { %9221 = vmatmul.mubr.f32.vlgmr.msra.gmra.mrb[16].mxu1 %v5648_v38  ;;  %v12445_v38 = vld [vmem:[%s12655_s9] ss:$0 sm:$0xff] }
 0x50a   : > { %9223 = vmatprep.mubr.f32.mxu1 %v5649_v27 }
 0x50d   : > { %9224 = vmatmul.mubr.f32.gmra.mrb[18].mxu1 %v5650_v14 }
 0x50e   : > { %9226 = vmatprep.mubr.f32.mxu1 %v5651_v56  ;;  %v12451_v56 = vld [vmem:[%s12652_s6] ss:$0 sm:$0xff] }
 0x511   : > { %9227 = vmatmul.mubr.f32.gmra.mrb[20].mxu1 %v5652_v28 }
 0x512   : > { %9229 = vmatprep.mubr.f32.mxu1 %v5653_v18 }
 0x515   : > { %9230 = vmatmul.mubr.f32.gmra.mrb[22].mxu1 %v5654_v51 }
 0x516   : > { %9232 = vmatprep.mubr.f32.mxu1 %v5655_v9 }
 0x519   : > { %9233 = vmatmul.mubr.f32.gmra.mrb[24].mxu1 %v5656_v19 }
 0x51a   : > { %9235 = vmatprep.mubr.f32.mxu1 %v5657_v45 }
 0x51d   : > { %9236 = vmatmul.mubr.f32.gmra.mrb[26].mxu1 %v5658_v60 }
 0x51e   : > { %9238 = vmatprep.mubr.f32.mxu1 %v5659_v4 }
 0x521   : > { %9239 = vmatmul.mubr.f32.gmra.mrb[28].mxu1 %v5660_v53 }
 0x522   : > { %9241 = vmatprep.mubr.f32.mxu1 %v5661_v1 }
 0x525   : > { %9242 = vmatmul.mubr.f32.gmra.mrb[30].mxu1 %v5662_v54 }
 0x526   : > { %9244 = vmatprep.mubr.f32.mxu1 %v5663_v8 }
 0x529   : > { %9245 = vmatmul.mubr.f32.gmra.mrb[32].mxu1 %v5664_v3 }
 0x52a   : > { %9247 = vmatprep.mubr.f32.mxu1 %v5665_v12 }
 0x52d   : > { %9248 = vmatmul.mubr.f32.gmra.mrb[34].mxu1 %v5666_v34 }
 0x52e   : > { %9250 = vmatprep.mubr.f32.mxu1 %v5667_v47 }
 0x531   : > { %9251 = vmatmul.mubr.f32.gmra.mrb[36].mxu1 %v5668_v48 }
 0x532   : > { %9253 = vmatprep.mubr.f32.mxu1 %v5669_v49 }
 0x535   : > { %9254 = vmatmul.mubr.f32.gmra.mrb[38].mxu1 %v5670_v61 }
 0x536   : > { %9256 = vmatprep.mubr.f32.mxu1 %v5671_v11 }
 0x539   : > { %9257 = vmatmul.mubr.f32.gmra.mrb[40].mxu1 %v5672_v7 }
 0x53a   : > { %9259 = vmatprep.mubr.f32.mxu1 %v5673_v37 }
 0x53d   : > { %9260 = vmatmul.mubr.f32.gmra.mrb[42].mxu1 %v5674_v36 }
 0x53e   : > { %9262 = vmatprep.mubr.f32.mxu1 %v12190_v44 }
 0x541   : > { %9263 = vmatmul.mubr.f32.gmra.mrb[44].mxu1 %v12199_v52 }
 0x542   : > { %9265 = vmatprep.mubr.f32.mxu1 %v5677_v50 }
 0x545   : > { %9266 = vmatmul.mubr.f32.gmra.mrb[46].mxu1 %v5678_v25 }
 0x549   : > { %v9302_v22 = vpop.f32.mrb[32].mxu0 }
 0x54a   : > { %v6145_v39 = vpop.f32.mrb[33].mxu0  ;;  %v6312_v57 = vmul.f32 %v9302_v22, %v12434_v62 }
 0x54b   : > { %v6311_v27 = vmul.f32 %v12434_v62, %v6145_v39 }
 0x54c   : > { %v6351_v18 = vadd.f32 %v12445_v38, %v6312_v57 }
 0x54d   : > { %v6350_v45 = vadd.f32 %v12445_v38, %v6311_v27 }
 0x55e   : > { %v9305_v31 = vpop.f32.mrb[34].mxu0 }
 0x55f   : > { %v6155_v46 = vpop.f32.mrb[35].mxu0  ;;  %v6314_v9 = vmul.f32 %v9305_v31, %v12434_v62 }
 0x560   : > { %v6313_v60 = vmul.f32 %v12434_v62, %v6155_v46 }
 0x561   : > { %v6353_v3 = vadd.f32 %v12445_v38, %v6314_v9 }
 0x562   : > { %v9308_v41 = vpop.f32.mrb[36].mxu0  ;;  %v6352_v49 = vadd.f32 %v12445_v38, %v6313_v60 }
 0x563   : > { %v6165_v17 = vpop.f32.mrb[37].mxu0  ;;  %v6316_v34 = vmul.f32 %v9308_v41, %v12434_v62 }
 0x564   : > { %v6315_v61 = vmul.f32 %v12434_v62, %v6165_v17 }
 0x565   : > { %v6355_v39 = vadd.f32 %v12445_v38, %v6316_v34 }
 0x566   : > { %v12379_v0 = vpop.f32.mrb[38].mxu0  ;;  %v6354_v57 = vadd.f32 %v12445_v38, %v6315_v61 }
 0x567   : > { %v12381_v43 = vpop.f32.mrb[39].mxu0  ;;  %v6318_v46 = vmul.f32 %v12379_v0, %v12434_v62 }
 0x568   : > { %v6317_v27 = vmul.f32 %v12434_v62, %v12381_v43 }
 0x56a   : > { %v12383_v15 = vpop.f32.mrb[40].mxu0 }
 0x56b   : > { %v12385_v6 = vpop.f32.mrb[41].mxu0 }
 0x56e   : > { %v12387_v44 = vpop.f32.mrb[42].mxu0 }
 0x56f   : > { %v12389_v52 = vpop.f32.mrb[43].mxu0 }
 0x572   : > { %v12391_v21 = vpop.f32.mrb[44].mxu0 }
 0x573   : > { %v12393_v42 = vpop.f32.mrb[45].mxu0 }
 0x576   : > { %v12395_v16 = vpop.f32.mrb[46].mxu0 }
 0x577   : > { %v12397_v13 = vpop.f32.mrb[47].mxu0 }
 0x57a   : > { %v12399_v58 = vpop.f32.mrb[48].mxu0 }
 0x57b   : > { %v12401_v35 = vpop.f32.mrb[49].mxu0 }
 0x57e   : > { %v12403_v29 = vpop.f32.mrb[50].mxu0 }
 0x57f   : > { %v12405_v26 = vpop.f32.mrb[51].mxu0 }
 0x582   : > { %v12407_v20 = vpop.f32.mrb[52].mxu0 }
 0x583   : > { %v12409_v10 = vpop.f32.mrb[53].mxu0 }
 0x586   : > { %v12411_v30 = vpop.f32.mrb[54].mxu0 }
 0x587   : > { %v12413_v55 = vpop.f32.mrb[55].mxu0 }
 0x58a   : > { %v12415_v23 = vpop.f32.mrb[56].mxu0 }
 0x58b   : > { %v12417_v63 = vpop.f32.mrb[57].mxu0 }
 0x58e   : > { %v12419_v33 = vpop.f32.mrb[58].mxu0 }
 0x58f   : > { %v12421_v32 = vpop.f32.mrb[59].mxu0 }
 0x592   : > { %v12423_v5 = vpop.f32.mrb[60].mxu0 }
 0x593   : > { %v12425_v40 = vpop.f32.mrb[61].mxu0 }
 0x596   : > { %v12427_v24 = vpop.f32.mrb[62].mxu0 }
 0x597   : > { %v12429_v2 = vpop.f32.mrb[63].mxu0 }
 0x5dc   : > { %v9222_v14 = vpop.f32.mrb[16].mxu1 }
 0x5dd   : > { %v5961_v28 = vmul.f32 %v9222_v14, %v12440_v59  ;;  %v5762_v51 = vpop.f32.mrb[17].mxu1 }
 0x5de   : > { %v5960_v19 = vmul.f32 %v12440_v59, %v5762_v51 }
 0x5df   : > { %v6000_v4 = vadd.f32 %v12451_v56, %v5961_v28 }
 0x5e0   : > { %v5999_v53 = vadd.f32 %v12451_v56, %v5960_v19  ;;  %v9225_v1 = vpop.f32.mrb[18].mxu1 }
 0x5e1   : > { %v6383_v54 = vadd.f32 %v6351_v18, %v6000_v4  ;;  %v5963_v8 = vmul.f32 %v9225_v1, %v12440_v59  ;;  %v5772_v12 = vpop.f32.mrb[19].mxu1  ;;  %v6320_v4 = vmul.f32 %v12383_v15, %v12434_v62  ;;  %v6356_v1 = vadd.f32 %v12445_v38, %v6317_v27 }
 0x5e2   : > { %v6382_v47 = vadd.f32 %v6350_v45, %v5999_v53  ;;  %v5962_v48 = vmul.f32 %v12440_v59, %v5772_v12  ;;  %v6357_v45 = vadd.f32 %v12445_v38, %v6318_v46 }
 0x5e3   : > { %v6415_v11 = vmax.f32 %v6383_v54, 0.0  ;;  %v6002_v7 = vadd.f32 %v12451_v56, %v5963_v8  ;;  %v6319_v54 = vmul.f32 %v12434_v62, %v12385_v6 }
 0x5e4   : > { %v6414_v37 = vmax.f32 %v6382_v47, 0.0  ;;  %v6001_v36 = vadd.f32 %v12451_v56, %v5962_v48  ;;  %v9228_v50 = vpop.f32.mrb[20].mxu1 }
 0x5e5   : > { %6447 = vst [vmem:[%s12468_s27 + $0x8] sm:$0xff] %v6415_v11  ;;  %v6385_v25 = vadd.f32 %v6353_v3, %v6002_v7  ;;  %v5965_v22 = vmul.f32 %v9228_v50, %v12440_v59  ;;  %v5782_v31 = vpop.f32.mrb[21].mxu1  ;;  %v6322_v11 = vmul.f32 %v12387_v44, %v12434_v62 }
 0x5e6   : > { %6446 = vst [vmem:[%s12468_s27] sm:$0xff] %v6414_v37  ;;  %v6384_v41 = vadd.f32 %v6352_v49, %v6001_v36  ;;  %v5964_v17 = vmul.f32 %v12440_v59, %v5782_v31  ;;  %v6359_v49 = vadd.f32 %v12445_v38, %v6320_v4  ;;  %v6358_v37 = vadd.f32 %v12445_v38, %v6319_v54 }
 0x5e7   : > { %v6417_v14 = vmax.f32 %v6385_v25, 0.0  ;;  %v6004_v28 = vadd.f32 %v12451_v56, %v5965_v22  ;;  %v6321_v36 = vmul.f32 %v12434_v62, %v12389_v52  ;;  %v6325_v54 = vmul.f32 %v12434_v62, %v12397_v13 }
 0x5e8   : > { %v6416_v18 = vmax.f32 %v6384_v41, 0.0  ;;  %v6003_v51 = vadd.f32 %v12451_v56, %v5964_v17  ;;  %v9231_v9 = vpop.f32.mrb[22].mxu1  ;;  %v6361_v41 = vadd.f32 %v12445_v38, %v6322_v11 }
 0x5e9   : > { %6449 = vst [vmem:[%s12468_s27 + $0x18] sm:$0xff] %v6417_v14  ;;  %v6387_v0 = vadd.f32 %v6355_v39, %v6004_v28  ;;  %v5967_v19 = vmul.f32 %v9231_v9, %v12440_v59  ;;  %v5792_v60 = vpop.f32.mrb[23].mxu1  ;;  %v6360_v14 = vadd.f32 %v12445_v38, %v6321_v36  ;;  %v6323_v28 = vmul.f32 %v12434_v62, %v12393_v42 }
 0x5ea   : > { %6448 = vst [vmem:[%s12468_s27 + $0x10] sm:$0xff] %v6416_v18  ;;  %v6386_v43 = vadd.f32 %v6354_v57, %v6003_v51  ;;  %v5966_v53 = vmul.f32 %v12440_v59, %v5792_v60  ;;  %v6324_v57 = vmul.f32 %v12391_v21, %v12434_v62 }
 0x5eb   : > { %v6419_v8 = vmax.f32 %v6387_v0, 0.0  ;;  %v6006_v3 = vadd.f32 %v12451_v56, %v5967_v19 }
 0x5ec   : > { %v6418_v12 = vmax.f32 %v6386_v43, 0.0  ;;  %v6005_v34 = vadd.f32 %v12451_v56, %v5966_v53  ;;  %v9234_v47 = vpop.f32.mrb[24].mxu1  ;;  %v6363_v60 = vadd.f32 %v12445_v38, %v6324_v57  ;;  %v6326_v43 = vmul.f32 %v12395_v16, %v12434_v62 }
 0x5ed   : > { %6451 = vst [vmem:[%s12468_s27 + $0x28] sm:$0xff] %v6419_v8  ;;  %v6389_v15 = vadd.f32 %v6357_v45, %v6006_v3  ;;  %v5969_v48 = vmul.f32 %v9234_v47, %v12440_v59  ;;  %v5802_v61 = vpop.f32.mrb[25].mxu1  ;;  %v6329_v57 = vmul.f32 %v12434_v62, %v12405_v26 }
 0x5ee   : > { %6450 = vst [vmem:[%s12468_s27 + $0x20] sm:$0xff] %v6418_v12  ;;  %v6388_v6 = vadd.f32 %v6356_v1, %v6005_v34  ;;  %v5968_v7 = vmul.f32 %v12440_v59, %v5802_v61  ;;  %v6362_v1 = vadd.f32 %v12445_v38, %v6323_v28  ;;  %v6328_v61 = vmul.f32 %v12399_v58, %v12434_v62 }
 0x5ef   : > { %v6421_v50 = vmax.f32 %v6389_v15, 0.0  ;;  %v6008_v25 = vadd.f32 %v12451_v56, %v5969_v48  ;;  %v6365_v48 = vadd.f32 %v12445_v38, %v6326_v43 }
 0x5f0   : > { %v6420_v22 = vmax.f32 %v6388_v6, 0.0  ;;  %v6007_v39 = vadd.f32 %v12451_v56, %v5968_v7  ;;  %v9237_v31 = vpop.f32.mrb[26].mxu1  ;;  %v6364_v6 = vadd.f32 %v12445_v38, %v6325_v54  ;;  %v6327_v7 = vmul.f32 %v12434_v62, %v12401_v35 }
 0x5f1   : > { %6453 = vst [vmem:[%s12468_s27 + $0x38] sm:$0xff] %v6421_v50  ;;  %v6391_v44 = vadd.f32 %v6359_v49, %v6008_v25  ;;  %v5971_v46 = vmul.f32 %v9237_v31, %v12440_v59  ;;  %v5812_v17 = vpop.f32.mrb[27].mxu1  ;;  %v6367_v31 = vadd.f32 %v12445_v38, %v6328_v61 }
 0x5f2   : > { %6452 = vst [vmem:[%s12468_s27 + $0x30] sm:$0xff] %v6420_v22  ;;  %v6390_v52 = vadd.f32 %v6358_v37, %v6007_v39  ;;  %v5970_v27 = vmul.f32 %v12440_v59, %v5812_v17  ;;  %v6366_v17 = vadd.f32 %v12445_v38, %v6327_v7 }
 0x5f3   : > { %v6423_v18 = vmax.f32 %v6391_v44, 0.0  ;;  %v6010_v51 = vadd.f32 %v12451_v56, %v5971_v46  ;;  %v6330_v46 = vmul.f32 %v12403_v29, %v12434_v62 }
 0x5f4   : > { %v6422_v9 = vmax.f32 %v6390_v52, 0.0  ;;  %v6009_v0 = vadd.f32 %v12451_v56, %v5970_v27  ;;  %v9240_v19 = vpop.f32.mrb[28].mxu1 }
 0x5f5   : > { %6455 = vst [vmem:[%s12468_s27 + $0x48] sm:$0xff] %v6423_v18  ;;  %v6393_v21 = vadd.f32 %v6361_v41, %v6010_v51  ;;  %v5973_v45 = vmul.f32 %v9240_v19, %v12440_v59  ;;  %v5822_v4 = vpop.f32.mrb[29].mxu1  ;;  %v6332_v19 = vmul.f32 %v12407_v20, %v12434_v62 }
 0x5f6   : > { %6454 = vst [vmem:[%s12468_s27 + $0x40] sm:$0xff] %v6422_v9  ;;  %v6392_v42 = vadd.f32 %v6360_v14, %v6009_v0  ;;  %v5972_v53 = vmul.f32 %v12440_v59, %v5822_v4  ;;  %v6369_v9 = vadd.f32 %v12445_v38, %v6330_v46 }
 0x5f7   : > { %v6425_v8 = vmax.f32 %v6393_v21, 0.0  ;;  %v6012_v3 = vadd.f32 %v12451_v56, %v5973_v45  ;;  %v6368_v45 = vadd.f32 %v12445_v38, %v6329_v57 }
 0x5f8   : > { %v6424_v12 = vmax.f32 %v6392_v42, 0.0  ;;  %v6011_v34 = vadd.f32 %v12451_v56, %v5972_v53  ;;  %v9243_v47 = vpop.f32.mrb[30].mxu1 }
 0x5f9   : > { %6457 = vst [vmem:[%s12468_s27 + $0x58] sm:$0xff] %v6425_v8  ;;  %v6395_v16 = vadd.f32 %v6363_v60, %v6012_v3  ;;  %v5975_v15 = vmul.f32 %v9243_v47, %v12440_v59  ;;  %v5832_v49 = vpop.f32.mrb[31].mxu1  ;;  %v6331_v60 = vmul.f32 %v12434_v62, %v12409_v10  ;;  %v6371_v8 = vadd.f32 %v12445_v38, %v6332_v19 }
 0x5fa   : > { %6456 = vst [vmem:[%s12468_s27 + $0x50] sm:$0xff] %v6424_v12  ;;  %v6394_v13 = vadd.f32 %v6362_v1, %v6011_v34  ;;  %v5974_v11 = vmul.f32 %v12440_v59, %v5832_v49  ;;  %v6334_v12 = vmul.f32 %v12411_v30, %v12434_v62 }
 0x5fb   : > { %v6427_v37 = vmax.f32 %v6395_v16, 0.0  ;;  %v6014_v36 = vadd.f32 %v12451_v56, %v5975_v15  ;;  %v6370_v47 = vadd.f32 %v12445_v38, %v6331_v60  ;;  %v6333_v16 = vmul.f32 %v12434_v62, %v12413_v55 }
 0x5fc   : > { %v6426_v50 = vmax.f32 %v6394_v13, 0.0  ;;  %v6013_v25 = vadd.f32 %v12451_v56, %v5974_v11  ;;  %v9246_v22 = vpop.f32.mrb[32].mxu1  ;;  %v6339_v60 = vmul.f32 %v12434_v62, %v12425_v40 }
 0x5fd   : > { %6459 = vst [vmem:[%s12468_s27 + $0x68] sm:$0xff] %v6427_v37  ;;  %v6397_v58 = vadd.f32 %v6365_v48, %v6014_v36  ;;  %v5977_v39 = vmul.f32 %v9246_v22, %v12440_v59  ;;  %v5842_v44 = vpop.f32.mrb[33].mxu1  ;;  %v6336_v37 = vmul.f32 %v12415_v23, %v12434_v62 }
 0x5fe   : > { %6458 = vst [vmem:[%s12468_s27 + $0x60] sm:$0xff] %v6426_v50  ;;  %v6396_v35 = vadd.f32 %v6364_v6, %v6013_v25  ;;  %v5976_v41 = vmul.f32 %v12440_v59, %v5842_v44  ;;  %v6373_v6 = vadd.f32 %v12445_v38, %v6334_v12  ;;  %v6372_v50 = vadd.f32 %v12445_v38, %v6333_v16 }
 0x5ff   : > { %v6429_v52 = vmax.f32 %v6397_v58, 0.0  ;;  %v6016_v27 = vadd.f32 %v12451_v56, %v5977_v39  ;;  %v6335_v25 = vmul.f32 %v12434_v62, %v12417_v63 }
 0x600   : > { %v6428_v14 = vmax.f32 %v6396_v35, 0.0  ;;  %v6015_v28 = vadd.f32 %v12451_v56, %v5976_v41  ;;  %v9249_v18 = vpop.f32.mrb[34].mxu1  ;;  %v6375_v35 = vadd.f32 %v12445_v38, %v6336_v37 }
 0x601   : > { %6461 = vst [vmem:[%s12468_s27 + $0x78] sm:$0xff] %v6429_v52  ;;  %v6399_v29 = vadd.f32 %v6367_v31, %v6016_v27  ;;  %v5979_v51 = vmul.f32 %v9249_v18, %v12440_v59  ;;  %v5852_v0 = vpop.f32.mrb[35].mxu1  ;;  %v6374_v52 = vadd.f32 %v12445_v38, %v6335_v25  ;;  %v6337_v27 = vmul.f32 %v12434_v62, %v12421_v32 }
 0x602   : > { %6460 = vst [vmem:[%s12468_s27 + $0x70] sm:$0xff] %v6428_v14  ;;  %v6398_v26 = vadd.f32 %v6366_v17, %v6015_v28  ;;  %v5978_v21 = vmul.f32 %v12440_v59, %v5852_v0  ;;  %v6338_v17 = vmul.f32 %v12419_v33, %v12434_v62 }
 0x603   : > { %v6431_v4 = vmax.f32 %v6399_v29, 0.0  ;;  %v6018_v43 = vadd.f32 %v12451_v56, %v5979_v51 }
 0x604   : > { %v6430_v42 = vmax.f32 %v6398_v26, 0.0  ;;  %v6017_v53 = vadd.f32 %v12451_v56, %v5978_v21  ;;  %v9252_v1 = vpop.f32.mrb[36].mxu1  ;;  %v6377_v0 = vadd.f32 %v12445_v38, %v6338_v17  ;;  %v6340_v26 = vmul.f32 %v12423_v5, %v12434_v62 }
 0x605   : > { %6463 = vst [vmem:[%s12468_s27 + $0x88] sm:$0xff] %v6431_v4  ;;  %v6401_v20 = vadd.f32 %v6369_v9, %v6018_v43  ;;  %v5981_v54 = vmul.f32 %v9252_v1, %v12440_v59  ;;  %v5862_v3 = vpop.f32.mrb[37].mxu1 }
 0x606   : > { %6462 = vst [vmem:[%s12468_s27 + $0x80] sm:$0xff] %v6430_v42  ;;  %v6400_v10 = vadd.f32 %v6368_v45, %v6017_v53  ;;  %v5980_v34 = vmul.f32 %v12440_v59, %v5862_v3  ;;  %v6376_v45 = vadd.f32 %v12445_v38, %v6337_v27  ;;  %v6342_v3 = vmul.f32 %v12427_v24, %v12434_v62 }
 0x607   : > { %v6433_v15 = vmax.f32 %v6401_v20, 0.0  ;;  %v6020_v48 = vadd.f32 %v12451_v56, %v5981_v54  ;;  %v6379_v54 = vadd.f32 %v12445_v38, %v6340_v26 }
 0x608   : > { %v6432_v49 = vmax.f32 %v6400_v10, 0.0  ;;  %v6019_v61 = vadd.f32 %v12451_v56, %v5980_v34  ;;  %v9255_v13 = vpop.f32.mrb[38].mxu1  ;;  %v6378_v10 = vadd.f32 %v12445_v38, %v6339_v60  ;;  %v6341_v34 = vmul.f32 %v12434_v62, %v12429_v2 }
 0x609   : > { %6465 = vst [vmem:[%s12468_s27 + $0x98] sm:$0xff] %v6433_v15  ;;  %v6403_v30 = vadd.f32 %v6371_v8, %v6020_v48  ;;  %v5983_v11 = vmul.f32 %v9255_v13, %v12440_v59  ;;  %v5872_v7 = vpop.f32.mrb[39].mxu1  ;;  %v6381_v13 = vadd.f32 %v12445_v38, %v6342_v3 }
 0x60a   : > { %6464 = vst [vmem:[%s12468_s27 + $0x90] sm:$0xff] %v6432_v49  ;;  %v6402_v55 = vadd.f32 %v6370_v47, %v6019_v61  ;;  %v5982_v36 = vmul.f32 %v12440_v59, %v5872_v7 }
 0x60b   : > { %v6435_v22 = vmax.f32 %v6403_v30, 0.0  ;;  %v6022_v58 = vadd.f32 %v12451_v56, %v5983_v11  ;;  %v6380_v11 = vadd.f32 %v12445_v38, %v6341_v34 }
 0x60c   : > { %v6434_v39 = vmax.f32 %v6402_v55, 0.0  ;;  %v6021_v31 = vadd.f32 %v12451_v56, %v5982_v36  ;;  %v9258_v44 = vpop.f32.mrb[40].mxu1 }
 0x60d   : > { %6467 = vst [vmem:[%s12468_s27 + $0xa8] sm:$0xff] %v6435_v22  ;;  %v6405_v23 = vadd.f32 %v6373_v6, %v6022_v58  ;;  %v5985_v46 = vmul.f32 %v9258_v44, %v12440_v59  ;;  %v5882_v41 = vpop.f32.mrb[41].mxu1 }
 0x60e   : > { %6466 = vst [vmem:[%s12468_s27 + $0xa0] sm:$0xff] %v6434_v39  ;;  %v6404_v63 = vadd.f32 %v6372_v50, %v6021_v31  ;;  %v5984_v57 = vmul.f32 %v12440_v59, %v5882_v41 }
 0x60f   : > { %v6437_v14 = vmax.f32 %v6405_v23, 0.0  ;;  %v6024_v28 = vadd.f32 %v12451_v56, %v5985_v46 }
 0x610   : > { %v6436_v18 = vmax.f32 %v6404_v63, 0.0  ;;  %v6023_v29 = vadd.f32 %v12451_v56, %v5984_v57  ;;  %v9261_v51 = vpop.f32.mrb[42].mxu1 }
 0x611   : > { %6469 = vst [vmem:[%s12468_s27 + $0xb8] sm:$0xff] %v6437_v14  ;;  %v6407_v33 = vadd.f32 %v6375_v35, %v6024_v28  ;;  %v5987_v9 = vmul.f32 %v9261_v51, %v12440_v59  ;;  %v5892_v19 = vpop.f32.mrb[43].mxu1 }
 0x612   : > { %6468 = vst [vmem:[%s12468_s27 + $0xb0] sm:$0xff] %v6436_v18  ;;  %v6406_v32 = vadd.f32 %v6374_v52, %v6023_v29  ;;  %v5986_v21 = vmul.f32 %v12440_v59, %v5892_v19 }
 0x613   : > { %v6439_v4 = vmax.f32 %v6407_v33, 0.0  ;;  %v6026_v43 = vadd.f32 %v12451_v56, %v5987_v9 }
 0x614   : > { %v6438_v42 = vmax.f32 %v6406_v32, 0.0  ;;  %v6025_v53 = vadd.f32 %v12451_v56, %v5986_v21  ;;  %v9264_v1 = vpop.f32.mrb[44].mxu1 }
 0x615   : > { %6471 = vst [vmem:[%s12468_s27 + $0xc8] sm:$0xff] %v6439_v4  ;;  %v6409_v5 = vadd.f32 %v6377_v0, %v6026_v43  ;;  %v5989_v20 = vmul.f32 %v9264_v1, %v12440_v59  ;;  %v5902_v8 = vpop.f32.mrb[45].mxu1 }
 0x616   : > { %6470 = vst [vmem:[%s12468_s27 + $0xc0] sm:$0xff] %v6438_v42  ;;  %v6408_v40 = vadd.f32 %v6376_v45, %v6025_v53  ;;  %v5988_v12 = vmul.f32 %v12440_v59, %v5902_v8 }
 0x617   : > { %v6441_v47 = vmax.f32 %v6409_v5, 0.0  ;;  %v6028_v16 = vadd.f32 %v12451_v56, %v5989_v20 }
 0x618   : > { %v6440_v15 = vmax.f32 %v6408_v40, 0.0  ;;  %v6027_v48 = vadd.f32 %v12451_v56, %v5988_v12  ;;  %v9267_v49 = vpop.f32.mrb[46].mxu1 }
 0x619   : > { %6473 = vst [vmem:[%s12468_s27 + $0xd8] sm:$0xff] %v6441_v47  ;;  %v6411_v24 = vadd.f32 %v6379_v54, %v6028_v16  ;;  %v5991_v61 = vmul.f32 %v9267_v49, %v12440_v59  ;;  %v5912_v30 = vpop.f32.mrb[47].mxu1 }
 0x61a   : > { %6472 = vst [vmem:[%s12468_s27 + $0xd0] sm:$0xff] %v6440_v15  ;;  %v6410_v2 = vadd.f32 %v6378_v10, %v6027_v48  ;;  %v5990_v62 = vmul.f32 %v12440_v59, %v5912_v30 }
 0x61b   : > { %v6443_v6 = vmax.f32 %v6411_v24, 0.0  ;;  %v6030_v7 = vadd.f32 %v12451_v56, %v5991_v61 }
 0x61c   : > { %v6442_v37 = vmax.f32 %v6410_v2, 0.0  ;;  %v6029_v55 = vadd.f32 %v12451_v56, %v5990_v62 }
 0x61d   : > { %6475 = vst [vmem:[%s12468_s27 + $0xe8] sm:$0xff] %v6443_v6  ;;  %v6413_v36 = vadd.f32 %v6381_v13, %v6030_v7 }
 0x61e   : > { %6474 = vst [vmem:[%s12468_s27 + $0xe0] sm:$0xff] %v6442_v37  ;;  %v6412_v50 = vadd.f32 %v6380_v11, %v6029_v55 }
 0x61f   : > { %v6445_v25 = vmax.f32 %v6413_v36, 0.0 }
 0x620   : > { %v6444_v22 = vmax.f32 %v6412_v50, 0.0 }
 0x621   : > { %6477 = vst [vmem:[%s12468_s27 + $0xf8] sm:$0xff] %v6445_v25 }
 0x622   : > { %6476 = vst [vmem:[%s12468_s27 + $0xf0] sm:$0xff] %v6444_v22 }
 0x623 PF: > { %s21_s13 = sadd.s32 1, %s10546_s13  }
 0x624   : > { %p18_p3 = scmp.ge.s32.totalorder %s21_s13, 4  }
 0x626   :  { %20 = sbr.rel (!%p18_p3) target bundleno = 1 (0x1), region = 115 }
 0x62d   :  { %6499 = vsyncpa [#allocation4], 1 }
 0x62e   :  { %6501 = vsyncpa [#allocation4 + $0x1], 1 }

</bundles_post_ra>
